<compile_context>
chip_gen: v7x
topology: tpu7x:2x2x1
jax: 0.10.0
libtpu: 0.0.40
codegen_flags: <defaults>
</compile_context>

<pallas_src>
import functools

import jax
import jax.numpy as jnp
from jax.experimental import pallas as pl
from jax.experimental.pallas import tpu as pltpu

LRELU_SLOPE = 0.2
BN_EPS = 1e-5


def _leaky_relu(x):
    return jnp.where(x >= 0.0, x, LRELU_SLOPE * x)


def _vmem_limit_bytes():
    """~3/4 of physical VMEM, capped at 100 MiB (v7x -> 48 MiB, v5e/v6e -> 96)."""
    try:
        cap = int(pltpu.get_tpu_info().vmem_capacity_bytes)
        return int(min(cap * 3 // 4, 100 * 1024 * 1024))
    except Exception:
        return 48 * 1024 * 1024


def _choose_row_tile(ho, wo, bytes_per_row, budget_bytes):
    """Largest divisor of `ho` whose flat tile (th*wo) is lane-aligned
    (multiple of 128, or the whole image) and whose working set fits."""
    divs = [d for d in range(1, ho + 1)
            if ho % d == 0 and ((d * wo) % 128 == 0 or d == ho)]
    fitting = [d for d in divs if d * bytes_per_row <= budget_bytes]
    return max(fitting) if fitting else min(divs)


def _choose_flat_tile(s, c, budget_bytes):
    """Largest lane-aligned divisor of the flattened spatial dim (kernel B)."""
    cap = max(128, budget_bytes // (16 * c))   # f32 in + out, double buffered
    if s <= cap:
        return s
    t = (cap // 128) * 128
    while t >= 128:
        if s % t == 0:
            return t
        t -= 128
    return s


# ---------------------------------------------------------------------------
# Kernel 1: stride-2 3x3 conv (stride-1 2x2 conv over a space-to-depth view),
# channel-major lane-dense output + per-step partial BN statistics.
# Grid: (batch, row-tile); both axes "parallel".
# ---------------------------------------------------------------------------
def _stage1_kernel(x_ref, w_ref, y_ref, st_ref, *, th, wo, matmul_dtype):
    # x_ref : (1, 1, K, th+1, wo+1)  space-to-depth rows (with +1 halo row)
    # w_ref : (C, 4*K)               2x2 taps pre-concatenated along K
    # y_ref : (1, C, th*wo)          lane-dense conv output tile
    # st_ref: (1, 1, C, 2)           per-step [sum, sumsq] partials
    img = x_ref[0, 0].astype(matmul_dtype)               # (K, th+1, wo+1)
    K = img.shape[0]
    blk = th * wo

    patches = [img[:, a:a + th, b:b + wo].reshape(K, blk)
               for a in range(2) for b in range(2)]
    p = jnp.concatenate(patches, axis=0)                 # (4K, blk)
    acc = jnp.dot(w_ref[...].astype(matmul_dtype), p,
                  preferred_element_type=jnp.float32)    # (C, blk)

    y_ref[0] = acc.astype(y_ref.dtype)
    s = jnp.sum(acc, axis=1, keepdims=True)
    ss = jnp.sum(acc * acc, axis=1, keepdims=True)
    st_ref[0, 0] = jnp.concatenate([s, ss], axis=1)      # (C, 2)


# ---------------------------------------------------------------------------
# Kernel 2: fused [BN1 (folded scale/shift) + LeakyReLU + ReflectionPad(1)
# + stride-1 3x3 conv] + per-step partial BN2 statistics.
# Grid: (batch, row-tile); both axes "parallel".  The raw conv-1 image stays
# resident per batch element; halo rows are read with pl.ds (sublane axis).
# ---------------------------------------------------------------------------
def _stage2_kernel(y1_ref, sc_ref, sh_ref, w_ref, y2_ref, st_ref, *,
                   th, wo, matmul_dtype):
    # y1_ref: (1, C, Ho, Wo)  raw conv-1 output (4-D view of the flat array)
    # sc/sh : (C, 1)          folded BN1 scale / shift
    # w_ref : (C, 9*C)        3x3 taps pre-concatenated
    # y2_ref: (1, C, th*wo)   lane-dense conv-2 output tile
    # st_ref: (1, 1, C, 2)
    r = pl.program_id(1)
    last = pl.num_programs(1) - 1
    C = sc_ref.shape[0]
    blk = th * wo
    r0 = r * th

    zmain = y1_ref[0, :, pl.ds(r0, th), :]                    # (C, th, wo)
    top_idx = jnp.where(r == 0, r0 + 1, r0 - 1)               # top reflection
    bot_idx = jnp.where(r == last, r0 + th - 2, r0 + th)      # bottom reflection
    ztop = y1_ref[0, :, pl.ds(top_idx, 1), :]                 # (C, 1, wo)
    zbot = y1_ref[0, :, pl.ds(bot_idx, 1), :]                 # (C, 1, wo)

    z = jnp.concatenate([ztop, zmain, zbot], axis=1)          # (C, th+2, wo)
    # fused stage-1 epilogue: folded BN1 + LeakyReLU, kept in f32 (v5e-safe)
    z = z.astype(jnp.float32) * sc_ref[...].reshape(C, 1, 1) \
        + sh_ref[...].reshape(C, 1, 1)
    z = _leaky_relu(z)
    # in-tile ReflectionPad2d(1) along width (full width is resident)
    z = jnp.concatenate([z[:, :, 1:2], z, z[:, :, wo - 2:wo - 1]], axis=2)
    z = z.astype(matmul_dtype)                                # (C, th+2, wo+2)

    patches = [z[:, dy:dy + th, dx:dx + wo].reshape(C, blk)
               for dy in range(3) for dx in range(3)]
    p = jnp.concatenate(patches, axis=0)                      # (9C, blk)
    acc = jnp.dot(w_ref[...].astype(matmul_dtype), p,
                  preferred_element_type=jnp.float32)         # (C, blk)

    y2_ref[0] = acc.astype(y2_ref.dtype)
    s = jnp.sum(acc, axis=1, keepdims=True)
    ss = jnp.sum(acc * acc, axis=1, keepdims=True)
    st_ref[0, 0] = jnp.concatenate([s, ss], axis=1)


# ---------------------------------------------------------------------------
# Kernel 3: final BN2 (folded scale/shift) + LeakyReLU, lane-dense tiles.
# ---------------------------------------------------------------------------
def _bn_act_kernel(y_ref, sc_ref, sh_ref, o_ref):
    z = y_ref[...].astype(jnp.float32) * sc_ref[...] + sh_ref[...]
    o_ref[...] = _leaky_relu(z).astype(o_ref.dtype)


# ---------------------------------------------------------------------------
# pallas_call wrappers
# ---------------------------------------------------------------------------
def _call_stage1(x_tiles, w1cat, *, ho, wo, th, store_dtype, matmul_dtype,
                 vmem_limit):
    N, R, K, thp1, wip1 = x_tiles.shape
    C = w1cat.shape[0]
    S = ho * wo
    blk = th * wo
    kernel = functools.partial(_stage1_kernel, th=th, wo=wo,
                               matmul_dtype=matmul_dtype)
    flops = 2 * N * S * (4 * K) * C
    bytes_accessed = int(4 * x_tiles.size + 4 * w1cat.size
                         + jnp.dtype(store_dtype).itemsize * N * C * S
                         + 4 * N * R * C * 2)
    return pl.pallas_call(
        kernel,
        out_shape=(jax.ShapeDtypeStruct((N, C, S), store_dtype),
                   jax.ShapeDtypeStruct((N, R, C, 2), jnp.float32)),
        grid=(N, R),
        in_specs=[
            pl.BlockSpec((1, 1, K, thp1, wip1), lambda n, r: (n, r, 0, 0, 0)),
            pl.BlockSpec((C, 4 * K), lambda n, r: (0, 0)),
        ],
        out_specs=(
            pl.BlockSpec((1, C, blk), lambda n, r: (n, 0, r)),
            pl.BlockSpec((1, 1, C, 2), lambda n, r: (n, r, 0, 0)),
        ),
        compiler_params=pltpu.CompilerParams(
            dimension_semantics=("parallel", "parallel"),
            vmem_limit_bytes=vmem_limit),
        cost_estimate=pl.CostEstimate(flops=flops, transcendentals=0,
                                      bytes_accessed=bytes_accessed),
    )(x_tiles, w1cat)


def _call_stage2(y1_flat, scale1, shift1, w2cat, *, ho, wo, th, store_dtype,
                 matmul_dtype, vmem_limit):
    N, C, S = y1_flat.shape
    R = ho // th
    blk = th * wo
    # Free view: (N, C, S) and (N, C, Ho, Wo) share the same memory layout.
    y1_4d = y1_flat.reshape(N, C, ho, wo)
    kernel = functools.partial(_stage2_kernel, th=th, wo=wo,
                               matmul_dtype=matmul_dtype)
    item = jnp.dtype(store_dtype).itemsize
    flops = 2 * N * S * 9 * C * C
    bytes_accessed = int(item * y1_flat.size + 4 * (w2cat.size + 4 * C)
                         + item * N * C * S + 4 * N * R * C * 2)
    return pl.pallas_call(
        kernel,
        out_shape=(jax.ShapeDtypeStruct((N, C, S), store_dtype),
                   jax.ShapeDtypeStruct((N, R, C, 2), jnp.float32)),
        grid=(N, R),
        in_specs=[
            pl.BlockSpec((1, C, ho, wo), lambda n, r: (n, 0, 0, 0)),
            pl.BlockSpec((C, 1), lambda n, r: (0, 0)),
            pl.BlockSpec((C, 1), lambda n, r: (0, 0)),
            pl.BlockSpec((C, 9 * C), lambda n, r: (0, 0)),
        ],
        out_specs=(
            pl.BlockSpec((1, C, blk), lambda n, r: (n, 0, r)),
            pl.BlockSpec((1, 1, C, 2), lambda n, r: (n, r, 0, 0)),
        ),
        compiler_params=pltpu.CompilerParams(
            dimension_semantics=("parallel", "parallel"),
            vmem_limit_bytes=vmem_limit),
        cost_estimate=pl.CostEstimate(flops=flops, transcendentals=0,
                                      bytes_accessed=bytes_accessed),
    )(y1_4d, scale1, shift1, w2cat)


def _call_bn_act(y2_flat, scale2, shift2, *, vmem_limit):
    N, C, S = y2_flat.shape
    tS = _choose_flat_tile(S, C, vmem_limit // 4)
    flops = 4 * N * C * S
    bytes_accessed = int(jnp.dtype(y2_flat.dtype).itemsize * y2_flat.size
                         + 4 * N * C * S + 8 * C)
    return pl.pallas_call(
        _bn_act_kernel,
        out_shape=jax.ShapeDtypeStruct((N, C, S), jnp.float32),
        grid=(N, S // tS),
        in_specs=[
            pl.BlockSpec((1, C, tS), lambda n, s: (n, 0, s)),
            pl.BlockSpec((C, 1), lambda n, s: (0, 0)),
            pl.BlockSpec((C, 1), lambda n, s: (0, 0)),
        ],
        out_specs=pl.BlockSpec((1, C, tS), lambda n, s: (n, 0, s)),
        compiler_params=pltpu.CompilerParams(
            dimension_semantics=("parallel", "parallel"),
            vmem_limit_bytes=vmem_limit),
        cost_estimate=pl.CostEstimate(flops=flops, transcendentals=0,
                                      bytes_accessed=bytes_accessed),
    )(y2_flat, scale2, shift2)


# ---------------------------------------------------------------------------
# Host-side helpers (tiny per-channel math / pure relayouts)
# ---------------------------------------------------------------------------
def _fold_bn(partial_stats, m, gamma, beta):
    """Reduce per-step [sum, sumsq] partials and fold training-mode BN into
    one per-channel scale/shift pair (biased variance, eps=1e-5)."""
    s = jnp.sum(partial_stats, axis=(0, 1))                  # (C, 2)
    mean = s[:, 0] / m
    var = jnp.maximum(s[:, 1] / m - mean * mean, 0.0)
    scale = gamma.reshape(-1) * jax.lax.rsqrt(var + BN_EPS)
    shift = beta.reshape(-1) - mean * scale
    return scale.reshape(-1, 1), shift.reshape(-1, 1)        # each (C, 1)


def encoder_block(x_nchw, params, *, matmul_dtype=jnp.float32,
                  intermediate_dtype=jnp.float32):
    """EncoderBlock forward: (N, Cin, H, W) -> (N, Cout, H//2, W//2)."""
    N, Cin, H, W = x_nchw.shape
    Cout = params["w1"].shape[0]
    assert H % 2 == 0 and W % 2 == 0, "even spatial dims expected (stride-2)"
    Ho, Wo = H // 2, W // 2
    assert Ho >= 2 and Wo >= 2, "reflection padding needs >= 2 rows/cols"
    S = Ho * Wo
    K = 4 * Cin
    vmem_limit = _vmem_limit_bytes()

    # --- stage-1 input relayout: reflection pad + space-to-depth by 2 +
    #     overlapping row tiles (one XLA relayout pass, no im2col blowup).
    th1 = _choose_row_tile(
        Ho, Wo,
        bytes_per_row=4 * (3 * K * (Wo + 1) + 4 * K * Wo + 2 * Cout * Wo),
        budget_bytes=vmem_limit // 3)
    R1 = Ho // th1
    xp = jnp.pad(x_nchw, ((0, 0), (0, 0), (1, 1), (1, 1)), mode="reflect")
    xp = xp.reshape(N, Cin, Ho + 1, 2, Wo + 1, 2)            # (n,ci,I,a,J,b)
    x_s2d = jnp.transpose(xp, (0, 3, 5, 1, 2, 4)).reshape(N, K, Ho + 1, Wo + 1)
    row_idx = jnp.arange(R1)[:, None] * th1 + jnp.arange(th1 + 1)[None, :]
    x_tiles = jnp.transpose(x_s2d[:, :, row_idx, :], (0, 2, 1, 3, 4))
    # x_tiles: (N, R1, K, th1+1, Wo+1)

    # --- stride-2 3x3 weights -> one (Cout, 4*K) matrix (taps along K).
    w1 = params["w1"]                                        # (Cout, Cin, 3, 3)
    w1pad = jnp.zeros((Cout, Cin, 4, 4), w1.dtype).at[:, :, :3, :3].set(w1)
    w1pad = w1pad.reshape(Cout, Cin, 2, 2, 2, 2)             # (co,ci,A,a,B,b)
    w1cat = jnp.transpose(w1pad, (0, 2, 4, 3, 5, 1)).reshape(Cout, 4 * K)

    # --- stride-1 3x3 weights -> (Cout, 9*Cout), taps ordered (dy, dx, ci).
    w2cat = jnp.transpose(params["w2"], (0, 2, 3, 1)).reshape(Cout, 9 * Cout)

    # NOTE: conv biases are not fed to the kernels - under training-mode BN a
    # per-channel bias is exactly cancelled by the mean subtraction.

    # Stage 1: conv(stride 2) + partial BN1 statistics.
    y1, st1 = _call_stage1(x_tiles, w1cat, ho=Ho, wo=Wo, th=th1,
                           store_dtype=intermediate_dtype,
                           matmul_dtype=matmul_dtype, vmem_limit=vmem_limit)
    scale1, shift1 = _fold_bn(st1, N * S, params["g1"], params["beta1"])

    # Stage 2: fused BN1 + LeakyReLU + ReflectionPad + conv(stride 1) + stats.
    th2 = _choose_row_tile(Ho, Wo, bytes_per_row=4 * (12 * Cout * Wo),
                           budget_bytes=vmem_limit // 4)
    y2, st2 = _call_stage2(y1, scale1, shift1, w2cat, ho=Ho, wo=Wo, th=th2,
                           store_dtype=intermediate_dtype,
                           matmul_dtype=matmul_dtype, vmem_limit=vmem_limit)
    scale2, shift2 = _fold_bn(st2, N * S, params["g2"], params["beta2"])

    # Final BN2 + LeakyReLU: lane-dense, fully parallel elementwise pass.
    y3 = _call_bn_act(y2, scale2, shift2, vmem_limit=vmem_limit)

    # Channel-major (N, C, Ho*Wo) already IS NCHW memory layout: free reshape.
    return y3.reshape(N, Cout, Ho, Wo)


def init_params(key, in_channel, out_channel, k=3):
    ks = jax.random.split(key, 6)
    return {
        "w1": 0.1 * jax.random.normal(ks[0], (out_channel, in_channel, k, k), jnp.float32),
        # biases kept for interface parity with bias=True; they are exactly
        # cancelled by training-mode BatchNorm, so the kernels never read them.
        "b1": 0.1 * jax.random.normal(ks[1], (1, out_channel), jnp.float32),
        "g1": 1.0 + 0.05 * jax.random.normal(ks[2], (1, out_channel), jnp.float32),
        "beta1": 0.05 * jax.random.normal(ks[3], (1, out_channel), jnp.float32),
        "w2": 0.1 * jax.random.normal(ks[4], (out_channel, out_channel, k, k), jnp.float32),
        "b2": 0.1 * jax.random.normal(ks[5], (1, out_channel), jnp.float32),
        "g2": jnp.ones((1, out_channel), jnp.float32),
        "beta2": jnp.zeros((1, out_channel), jnp.float32),
    }


def _reference_forward(x, params):
    """Pure-JAX reference of the PyTorch module (training-mode BatchNorm)."""
    hi = jax.lax.Precision.HIGHEST

    def conv(x, w, b, stride):
        xp = jnp.pad(x, ((0, 0), (0, 0), (1, 1), (1, 1)), mode="reflect")
        y = jax.lax.conv_general_dilated(
            xp, w, (stride, stride), "VALID",
            dimension_numbers=("NCHW", "OIHW", "NCHW"), precision=hi)
        return y + b.reshape(1, -1, 1, 1)

    def bn_act(y, g, beta):
        mean = jnp.mean(y, axis=(0, 2, 3), keepdims=True)
        var = jnp.var(y, axis=(0, 2, 3), keepdims=True)
        y = (y - mean) * jax.lax.rsqrt(var + BN_EPS)
        y = y * g.reshape(1, -1, 1, 1) + beta.reshape(1, -1, 1, 1)
        return _leaky_relu(y)

    y = conv(x, params["w1"], params["b1"].reshape(-1), 2)
    y = bn_act(y, params["g1"], params["beta1"])
    y = conv(y, params["w2"], params["b2"].reshape(-1), 1)
    y = bn_act(y, params["g2"], params["beta2"])
    return y


if __name__ == "__main__":
    # EncoderBlock(in_channel=4, out_channel=8, kernel_size=3, bias=True,
    #              pad='reflection', act_fun='LeakyReLU', downsample_mode='stride')
    key = jax.random.PRNGKey(0)
    k_x, k_p = jax.random.split(key)
    x = jax.random.normal(k_x, (2, 4, 16, 16), jnp.float32)   # NCHW, like PyTorch
    params = init_params(k_p, in_channel=4, out_channel=8, k=3)

    out = jax.jit(encoder_block)(x, params)
    out = jax.block_until_ready(out)
    assert out.shape == (2, 8, 8, 8), out.shape
    assert bool(jnp.all(jnp.isfinite(out)))

    ref = _reference_forward(x, params)
    max_err = float(jnp.max(jnp.abs(out - ref)))
    assert max_err < 2e-2, f"mismatch vs pure-JAX reference: {max_err}"
    print("KERNEL_OK")
</pallas_src>

<mosaic_0001>
module attributes {stable_mosaic.version = 11 : i64} {
  func.func @_stage1_kernel(%arg0: i32, %arg1: i32, %arg2: memref<1x1x16x9x9xf32, #tpu.memory_space<vmem>>, %arg3: memref<8x64xf32, #tpu.memory_space<vmem>>, %arg4: memref<1x8x64xf32, #tpu.memory_space<vmem>>, %arg5: memref<1x1x8x2xf32, #tpu.memory_space<vmem>>) attributes {dimension_semantics = [#tpu.dimension_semantics<parallel>, #tpu.dimension_semantics<parallel>], iteration_bounds = array<i64: 2, 1>, scalar_prefetch = 0 : i64, scratch_operands = 0 : i64, tpu.core_type = #tpu.core_type<tc>, window_params = [{transform_indices = @transform_0, window_bounds = array<i64: 1, 1, 16, 9, 9>}, {pipeline_mode = #tpu.pipeline_mode<synchronous>, transform_indices = @transform_1, window_bounds = array<i64: 8, 64>}, {transform_indices = @transform_2, window_bounds = array<i64: 1, 8, 64>}, {transform_indices = @transform_3, window_bounds = array<i64: 1, 1, 8, 2>}]} {
    %c0 = arith.constant 0 : index
    %c0_0 = arith.constant 0 : index
    %c0_1 = arith.constant 0 : index
    %c0_2 = arith.constant 0 : index
    %c0_3 = arith.constant 0 : index
    %0 = vector.load %arg2[%c0, %c0_0, %c0_1, %c0_2, %c0_3] : memref<1x1x16x9x9xf32, #tpu.memory_space<vmem>>, vector<1x1x16x9x9xf32>
    %1 = vector.shape_cast %0 : vector<1x1x16x9x9xf32> to vector<16x9x9xf32>
    %2 = vector.extract_strided_slice %1 {offsets = [0, 0, 0], sizes = [16, 8, 8], strides = [1, 1, 1]} : vector<16x9x9xf32> to vector<16x8x8xf32>
    %3 = vector.shape_cast %2 : vector<16x8x8xf32> to vector<16x64xf32>
    %4 = vector.extract_strided_slice %1 {offsets = [0, 0, 1], sizes = [16, 8, 8], strides = [1, 1, 1]} : vector<16x9x9xf32> to vector<16x8x8xf32>
    %5 = vector.shape_cast %4 : vector<16x8x8xf32> to vector<16x64xf32>
    %6 = vector.extract_strided_slice %1 {offsets = [0, 1, 0], sizes = [16, 8, 8], strides = [1, 1, 1]} : vector<16x9x9xf32> to vector<16x8x8xf32>
    %7 = vector.shape_cast %6 : vector<16x8x8xf32> to vector<16x64xf32>
    %8 = vector.extract_strided_slice %1 {offsets = [0, 1, 1], sizes = [16, 8, 8], strides = [1, 1, 1]} : vector<16x9x9xf32> to vector<16x8x8xf32>
    %9 = vector.shape_cast %8 : vector<16x8x8xf32> to vector<16x64xf32>
    %10 = tpu.concatenate %3, %5, %7, %9 in 0 : vector<16x64xf32>, vector<16x64xf32>, vector<16x64xf32>, vector<16x64xf32> -> vector<64x64xf32>
    %c0_4 = arith.constant 0 : index
    %c0_5 = arith.constant 0 : index
    %11 = vector.load %arg3[%c0_4, %c0_5] : memref<8x64xf32, #tpu.memory_space<vmem>>, vector<8x64xf32>
    %cst = arith.constant dense<0.000000e+00> : vector<8x64xf32>
    %12 = tpu.matmul %11, %10, %cst {dimension_numbers = #tpu.dot_dimension_numbers<[1], [0], [0], [1], [0, 0, 1, 1], [], []>} : vector<8x64xf32>, vector<64x64xf32>, vector<8x64xf32> -> vector<8x64xf32>
    %c0_6 = arith.constant 0 : index
    %c0_7 = arith.constant 0 : index
    %c0_8 = arith.constant 0 : index
    %13 = vector.load %arg4[%c0_6, %c0_7, %c0_8] : memref<1x8x64xf32, #tpu.memory_space<vmem>>, vector<1x8x64xf32>
    %14 = vector.shape_cast %13 : vector<1x8x64xf32> to vector<8x64xf32>
    %15 = vector.shape_cast %12 : vector<8x64xf32> to vector<1x8x64xf32>
    tpu.vector_store %arg4[%c0_6, %c0_7, %c0_8], %15 {strides = array<i32>} : memref<1x8x64xf32, #tpu.memory_space<vmem>>, vector<1x8x64xf32>,
    %cst_9 = arith.constant dense<0.000000e+00> : vector<8xf32>
    %16 = vector.multi_reduction <add>, %12, %cst_9 [1] : vector<8x64xf32> to vector<8xf32>
    %17 = vector.shape_cast %16 : vector<8xf32> to vector<8x1xf32>
    %18 = arith.mulf %12, %12 : vector<8x64xf32>
    %cst_10 = arith.constant dense<0.000000e+00> : vector<8xf32>
    %19 = vector.multi_reduction <add>, %18, %cst_10 [1] : vector<8x64xf32> to vector<8xf32>
    %20 = vector.shape_cast %19 : vector<8xf32> to vector<8x1xf32>
    %21 = tpu.concatenate %17, %20 in 1 : vector<8x1xf32>, vector<8x1xf32> -> vector<8x2xf32>
    %c0_11 = arith.constant 0 : index
    %c0_12 = arith.constant 0 : index
    %c0_13 = arith.constant 0 : index
    %c0_14 = arith.constant 0 : index
    %22 = vector.load %arg5[%c0_11, %c0_12, %c0_13, %c0_14] : memref<1x1x8x2xf32, #tpu.memory_space<vmem>>, vector<1x1x8x2xf32>
    %23 = vector.shape_cast %22 : vector<1x1x8x2xf32> to vector<8x2xf32>
    %24 = vector.shape_cast %21 : vector<8x2xf32> to vector<1x1x8x2xf32>
    tpu.vector_store %arg5[%c0_11, %c0_12, %c0_13, %c0_14], %24 {strides = array<i32>} : memref<1x1x8x2xf32, #tpu.memory_space<vmem>>, vector<1x1x8x2xf32>,
    return
  }
  func.func @transform_0(%arg0: i32, %arg1: i32) -> (i32, i32, i32, i32, i32) {
    %c0_i32 = arith.constant 0 : i32
    %c0_i32_0 = arith.constant 0 : i32
    %c0_i32_1 = arith.constant 0 : i32
    %c0_i32_2 = arith.constant 0 : i32
    return %arg0, %arg1, %c0_i32, %c0_i32_0, %c0_i32_1 : i32, i32, i32, i32, i32
  }
  func.func @transform_1(%arg0: i32, %arg1: i32) -> (i32, i32) {
    %c0_i32 = arith.constant 0 : i32
    %c0_i32_0 = arith.constant 0 : i32
    %c0_i32_1 = arith.constant 0 : i32
    return %c0_i32, %c0_i32_0 : i32, i32
  }
  func.func @transform_2(%arg0: i32, %arg1: i32) -> (i32, i32, i32) {
    %c0_i32 = arith.constant 0 : i32
    %c0_i32_0 = arith.constant 0 : i32
    return %arg0, %c0_i32, %arg1 : i32, i32, i32
  }
  func.func @transform_3(%arg0: i32, %arg1: i32) -> (i32, i32, i32, i32) {
    %c0_i32 = arith.constant 0 : i32
    %c0_i32_0 = arith.constant 0 : i32
    %c0_i32_1 = arith.constant 0 : i32
    return %arg0, %arg1, %c0_i32, %c0_i32_0 : i32, i32, i32, i32
  }
}

module attributes {stable_mosaic.version = 11 : i64} {
  func.func @_stage2_kernel(%arg0: i32, %arg1: i32, %arg2: memref<1x8x8x8xf32, #tpu.memory_space<vmem>>, %arg3: memref<8x1xf32, #tpu.memory_space<vmem>>, %arg4: memref<8x1xf32, #tpu.memory_space<vmem>>, %arg5: memref<8x72xf32, #tpu.memory_space<vmem>>, %arg6: memref<1x8x64xf32, #tpu.memory_space<vmem>>, %arg7: memref<1x1x8x2xf32, #tpu.memory_space<vmem>>) attributes {dimension_semantics = [#tpu.dimension_semantics<parallel>, #tpu.dimension_semantics<parallel>], iteration_bounds = array<i64: 2, 1>, scalar_prefetch = 0 : i64, scratch_operands = 0 : i64, tpu.core_type = #tpu.core_type<tc>, window_params = [{transform_indices = @transform_0, window_bounds = array<i64: 1, 8, 8, 8>}, {pipeline_mode = #tpu.pipeline_mode<synchronous>, transform_indices = @transform_1, window_bounds = array<i64: 8, 1>}, {pipeline_mode = #tpu.pipeline_mode<synchronous>, transform_indices = @transform_2, window_bounds = array<i64: 8, 1>}, {pipeline_mode = #tpu.pipeline_mode<synchronous>, transform_indices = @transform_3, window_bounds = array<i64: 8, 72>}, {transform_indices = @transform_4, window_bounds = array<i64: 1, 8, 64>}, {transform_indices = @transform_5, window_bounds = array<i64: 1, 1, 8, 2>}]} {
    %c8_i32 = arith.constant 8 : i32
    %0 = arith.muli %arg1, %c8_i32 : i32
    %c0 = arith.constant 0 : index
    %c0_0 = arith.constant 0 : index
    %1 = arith.index_cast %0 : i32 to index
    %c0_1 = arith.constant 0 : index
    %2 = vector.load %arg2[%c0, %c0_0, %1, %c0_1] : memref<1x8x8x8xf32, #tpu.memory_space<vmem>>, vector<1x8x8x8xf32>
    %3 = vector.shape_cast %2 : vector<1x8x8x8xf32> to vector<8x8x8xf32>
    %c0_i32 = arith.constant 0 : i32
    %4 = arith.cmpi eq, %arg1, %c0_i32 : i32
    %c1_i32 = arith.constant 1 : i32
    %5 = arith.addi %0, %c1_i32 : i32
    %c1_i32_2 = arith.constant 1 : i32
    %6 = arith.subi %0, %c1_i32_2 : i32
    %7 = arith.select %4, %5, %6 : i32
    %c0_i32_3 = arith.constant 0 : i32
    %8 = arith.cmpi eq, %arg1, %c0_i32_3 : i32
    %c8_i32_4 = arith.constant 8 : i32
    %9 = arith.addi %0, %c8_i32_4 : i32
    %c2_i32 = arith.constant 2 : i32
    %10 = arith.subi %9, %c2_i32 : i32
    %c8_i32_5 = arith.constant 8 : i32
    %11 = arith.addi %0, %c8_i32_5 : i32
    %12 = arith.select %8, %10, %11 : i32
    %c0_6 = arith.constant 0 : index
    %c0_7 = arith.constant 0 : index
    %13 = arith.index_cast %7 : i32 to index
    %c0_8 = arith.constant 0 : index
    %14 = vector.load %arg2[%c0_6, %c0_7, %13, %c0_8] : memref<1x8x8x8xf32, #tpu.memory_space<vmem>>, vector<1x8x1x8xf32>
    %15 = vector.shape_cast %14 : vector<1x8x1x8xf32> to vector<8x1x8xf32>
    %c0_9 = arith.constant 0 : index
    %c0_10 = arith.constant 0 : index
    %16 = arith.index_cast %12 : i32 to index
    %c0_11 = arith.constant 0 : index
    %17 = vector.load %arg2[%c0_9, %c0_10, %16, %c0_11] : memref<1x8x8x8xf32, #tpu.memory_space<vmem>>, vector<1x8x1x8xf32>
    %18 = vector.shape_cast %17 : vector<1x8x1x8xf32> to vector<8x1x8xf32>
    %19 = tpu.concatenate %15, %3, %18 in 1 : vector<8x1x8xf32>, vector<8x8x8xf32>, vector<8x1x8xf32> -> vector<8x10x8xf32>
    %c0_12 = arith.constant 0 : index
    %c0_13 = arith.constant 0 : index
    %20 = vector.load %arg3[%c0_12, %c0_13] : memref<8x1xf32, #tpu.memory_space<vmem>>, vector<8x1xf32>
    %21 = vector.shape_cast %20 : vector<8x1xf32> to vector<8x1x1xf32>
    %22 = vector.broadcast %21 : vector<8x1x1xf32> to vector<8x10x8xf32>
    %23 = arith.mulf %19, %22 : vector<8x10x8xf32>
    %c0_14 = arith.constant 0 : index
    %c0_15 = arith.constant 0 : index
    %24 = vector.load %arg4[%c0_14, %c0_15] : memref<8x1xf32, #tpu.memory_space<vmem>>, vector<8x1xf32>
    %25 = vector.shape_cast %24 : vector<8x1xf32> to vector<8x1x1xf32>
    %26 = vector.broadcast %25 : vector<8x1x1xf32> to vector<8x10x8xf32>
    %27 = arith.addf %23, %26 : vector<8x10x8xf32>
    %cst = arith.constant 0.000000e+00 : f32
    %28 = vector.broadcast %cst : f32 to vector<8x10x8xf32>
    %29 = arith.cmpf oge, %27, %28 : vector<8x10x8xf32>
    %cst_16 = arith.constant 2.000000e-01 : f32
    %30 = vector.broadcast %cst_16 : f32 to vector<8x10x8xf32>
    %31 = arith.mulf %30, %27 : vector<8x10x8xf32>
    %32 = arith.select %29, %27, %31 : vector<8x10x8xi1>, vector<8x10x8xf32>
    %33 = vector.extract_strided_slice %32 {offsets = [0, 0, 1], sizes = [8, 10, 1], strides = [1, 1, 1]} : vector<8x10x8xf32> to vector<8x10x1xf32>
    %34 = vector.extract_strided_slice %32 {offsets = [0, 0, 6], sizes = [8, 10, 1], strides = [1, 1, 1]} : vector<8x10x8xf32> to vector<8x10x1xf32>
    %35 = tpu.concatenate %33, %32, %34 in 2 : vector<8x10x1xf32>, vector<8x10x8xf32>, vector<8x10x1xf32> -> vector<8x10x10xf32>
    %36 = vector.extract_strided_slice %35 {offsets = [0, 0, 0], sizes = [8, 8, 8], strides = [1, 1, 1]} : vector<8x10x10xf32> to vector<8x8x8xf32>
    %37 = vector.shape_cast %36 : vector<8x8x8xf32> to vector<8x64xf32>
    %38 = vector.extract_strided_slice %35 {offsets = [0, 0, 1], sizes = [8, 8, 8], strides = [1, 1, 1]} : vector<8x10x10xf32> to vector<8x8x8xf32>
    %39 = vector.shape_cast %38 : vector<8x8x8xf32> to vector<8x64xf32>
    %40 = vector.extract_strided_slice %35 {offsets = [0, 0, 2], sizes = [8, 8, 8], strides = [1, 1, 1]} : vector<8x10x10xf32> to vector<8x8x8xf32>
    %41 = vector.shape_cast %40 : vector<8x8x8xf32> to vector<8x64xf32>
    %42 = vector.extract_strided_slice %35 {offsets = [0, 1, 0], sizes = [8, 8, 8], strides = [1, 1, 1]} : vector<8x10x10xf32> to vector<8x8x8xf32>
    %43 = vector.shape_cast %42 : vector<8x8x8xf32> to vector<8x64xf32>
    %44 = vector.extract_strided_slice %35 {offsets = [0, 1, 1], sizes = [8, 8, 8], strides = [1, 1, 1]} : vector<8x10x10xf32> to vector<8x8x8xf32>
    %45 = vector.shape_cast %44 : vector<8x8x8xf32> to vector<8x64xf32>
    %46 = vector.extract_strided_slice %35 {offsets = [0, 1, 2], sizes = [8, 8, 8], strides = [1, 1, 1]} : vector<8x10x10xf32> to vector<8x8x8xf32>
    %47 = vector.shape_cast %46 : vector<8x8x8xf32> to vector<8x64xf32>
    %48 = vector.extract_strided_slice %35 {offsets = [0, 2, 0], sizes = [8, 8, 8], strides = [1, 1, 1]} : vector<8x10x10xf32> to vector<8x8x8xf32>
    %49 = vector.shape_cast %48 : vector<8x8x8xf32> to vector<8x64xf32>
    %50 = vector.extract_strided_slice %35 {offsets = [0, 2, 1], sizes = [8, 8, 8], strides = [1, 1, 1]} : vector<8x10x10xf32> to vector<8x8x8xf32>
    %51 = vector.shape_cast %50 : vector<8x8x8xf32> to vector<8x64xf32>
    %52 = vector.extract_strided_slice %35 {offsets = [0, 2, 2], sizes = [8, 8, 8], strides = [1, 1, 1]} : vector<8x10x10xf32> to vector<8x8x8xf32>
    %53 = vector.shape_cast %52 : vector<8x8x8xf32> to vector<8x64xf32>
    %54 = tpu.concatenate %37, %39, %41, %43, %45, %47, %49, %51, %53 in 0 : vector<8x64xf32>, vector<8x64xf32>, vector<8x64xf32>, vector<8x64xf32>, vector<8x64xf32>, vector<8x64xf32>, vector<8x64xf32>, vector<8x64xf32>, vector<8x64xf32> -> vector<72x64xf32>
    %c0_17 = arith.constant 0 : index
    %c0_18 = arith.constant 0 : index
    %55 = vector.load %arg5[%c0_17, %c0_18] : memref<8x72xf32, #tpu.memory_space<vmem>>, vector<8x72xf32>
    %cst_19 = arith.constant dense<0.000000e+00> : vector<8x64xf32>
    %56 = tpu.matmul %55, %54, %cst_19 {dimension_numbers = #tpu.dot_dimension_numbers<[1], [0], [0], [1], [0, 0, 1, 1], [], []>} : vector<8x72xf32>, vector<72x64xf32>, vector<8x64xf32> -> vector<8x64xf32>
    %c0_20 = arith.constant 0 : index
    %c0_21 = arith.constant 0 : index
    %c0_22 = arith.constant 0 : index
    %57 = vector.load %arg6[%c0_20, %c0_21, %c0_22] : memref<1x8x64xf32, #tpu.memory_space<vmem>>, vector<1x8x64xf32>
    %58 = vector.shape_cast %57 : vector<1x8x64xf32> to vector<8x64xf32>
    %59 = vector.shape_cast %56 : vector<8x64xf32> to vector<1x8x64xf32>
    tpu.vector_store %arg6[%c0_20, %c0_21, %c0_22], %59 {strides = array<i32>} : memref<1x8x64xf32, #tpu.memory_space<vmem>>, vector<1x8x64xf32>,
    %cst_23 = arith.constant dense<0.000000e+00> : vector<8xf32>
    %60 = vector.multi_reduction <add>, %56, %cst_23 [1] : vector<8x64xf32> to vector<8xf32>
    %61 = vector.shape_cast %60 : vector<8xf32> to vector<8x1xf32>
    %62 = arith.mulf %56, %56 : vector<8x64xf32>
    %cst_24 = arith.constant dense<0.000000e+00> : vector<8xf32>
    %63 = vector.multi_reduction <add>, %62, %cst_24 [1] : vector<8x64xf32> to vector<8xf32>
    %64 = vector.shape_cast %63 : vector<8xf32> to vector<8x1xf32>
    %65 = tpu.concatenate %61, %64 in 1 : vector<8x1xf32>, vector<8x1xf32> -> vector<8x2xf32>
    %c0_25 = arith.constant 0 : index
    %c0_26 = arith.constant 0 : index
    %c0_27 = arith.constant 0 : index
    %c0_28 = arith.constant 0 : index
    %66 = vector.load %arg7[%c0_25, %c0_26, %c0_27, %c0_28] : memref<1x1x8x2xf32, #tpu.memory_space<vmem>>, vector<1x1x8x2xf32>
    %67 = vector.shape_cast %66 : vector<1x1x8x2xf32> to vector<8x2xf32>
    %68 = vector.shape_cast %65 : vector<8x2xf32> to vector<1x1x8x2xf32>
    tpu.vector_store %arg7[%c0_25, %c0_26, %c0_27, %c0_28], %68 {strides = array<i32>} : memref<1x1x8x2xf32, #tpu.memory_space<vmem>>, vector<1x1x8x2xf32>,
    return
  }
  func.func @transform_0(%arg0: i32, %arg1: i32) -> (i32, i32, i32, i32) {
    %c0_i32 = arith.constant 0 : i32
    %c0_i32_0 = arith.constant 0 : i32
    %c0_i32_1 = arith.constant 0 : i32
    %c0_i32_2 = arith.constant 0 : i32
    return %arg0, %c0_i32, %c0_i32_0, %c0_i32_1 : i32, i32, i32, i32
  }
  func.func @transform_1(%arg0: i32, %arg1: i32) -> (i32, i32) {
    %c0_i32 = arith.constant 0 : i32
    %c0_i32_0 = arith.constant 0 : i32
    %c0_i32_1 = arith.constant 0 : i32
    return %c0_i32, %c0_i32_0 : i32, i32
  }
  func.func @transform_2(%arg0: i32, %arg1: i32) -> (i32, i32) {
    %c0_i32 = arith.constant 0 : i32
    %c0_i32_0 = arith.constant 0 : i32
    %c0_i32_1 = arith.constant 0 : i32
    return %c0_i32, %c0_i32_0 : i32, i32
  }
  func.func @transform_3(%arg0: i32, %arg1: i32) -> (i32, i32) {
    %c0_i32 = arith.constant 0 : i32
    %c0_i32_0 = arith.constant 0 : i32
    %c0_i32_1 = arith.constant 0 : i32
    return %c0_i32, %c0_i32_0 : i32, i32
  }
  func.func @transform_4(%arg0: i32, %arg1: i32) -> (i32, i32, i32) {
    %c0_i32 = arith.constant 0 : i32
    %c0_i32_0 = arith.constant 0 : i32
    return %arg0, %c0_i32, %arg1 : i32, i32, i32
  }
  func.func @transform_5(%arg0: i32, %arg1: i32) -> (i32, i32, i32, i32) {
    %c0_i32 = arith.constant 0 : i32
    %c0_i32_0 = arith.constant 0 : i32
    %c0_i32_1 = arith.constant 0 : i32
    return %arg0, %arg1, %c0_i32, %c0_i32_0 : i32, i32, i32, i32
  }
}

module attributes {stable_mosaic.version = 11 : i64} {
  func.func @_bn_act_kernel(%arg0: i32, %arg1: i32, %arg2: memref<1x8x64xf32, #tpu.memory_space<vmem>>, %arg3: memref<8x1xf32, #tpu.memory_space<vmem>>, %arg4: memref<8x1xf32, #tpu.memory_space<vmem>>, %arg5: memref<1x8x64xf32, #tpu.memory_space<vmem>>) attributes {dimension_semantics = [#tpu.dimension_semantics<parallel>, #tpu.dimension_semantics<parallel>], iteration_bounds = array<i64: 2, 1>, scalar_prefetch = 0 : i64, scratch_operands = 0 : i64, tpu.core_type = #tpu.core_type<tc>, window_params = [{transform_indices = @transform_0, window_bounds = array<i64: 1, 8, 64>}, {pipeline_mode = #tpu.pipeline_mode<synchronous>, transform_indices = @transform_1, window_bounds = array<i64: 8, 1>}, {pipeline_mode = #tpu.pipeline_mode<synchronous>, transform_indices = @transform_2, window_bounds = array<i64: 8, 1>}, {transform_indices = @transform_3, window_bounds = array<i64: 1, 8, 64>}]} {
    %c0 = arith.constant 0 : index
    %c0_0 = arith.constant 0 : index
    %c0_1 = arith.constant 0 : index
    %0 = vector.load %arg2[%c0, %c0_0, %c0_1] : memref<1x8x64xf32, #tpu.memory_space<vmem>>, vector<1x8x64xf32>
    %c0_2 = arith.constant 0 : index
    %c0_3 = arith.constant 0 : index
    %1 = vector.load %arg3[%c0_2, %c0_3] : memref<8x1xf32, #tpu.memory_space<vmem>>, vector<8x1xf32>
    %2 = vector.shape_cast %1 : vector<8x1xf32> to vector<1x8x1xf32>
    %3 = vector.broadcast %2 : vector<1x8x1xf32> to vector<1x8x64xf32>
    %4 = arith.mulf %0, %3 : vector<1x8x64xf32>
    %c0_4 = arith.constant 0 : index
    %c0_5 = arith.constant 0 : index
    %5 = vector.load %arg4[%c0_4, %c0_5] : memref<8x1xf32, #tpu.memory_space<vmem>>, vector<8x1xf32>
    %6 = vector.shape_cast %5 : vector<8x1xf32> to vector<1x8x1xf32>
    %7 = vector.broadcast %6 : vector<1x8x1xf32> to vector<1x8x64xf32>
    %8 = arith.addf %4, %7 : vector<1x8x64xf32>
    %cst = arith.constant 0.000000e+00 : f32
    %9 = vector.broadcast %cst : f32 to vector<1x8x64xf32>
    %10 = arith.cmpf oge, %8, %9 : vector<1x8x64xf32>
    %cst_6 = arith.constant 2.000000e-01 : f32
    %11 = vector.broadcast %cst_6 : f32 to vector<1x8x64xf32>
    %12 = arith.mulf %11, %8 : vector<1x8x64xf32>
    %13 = arith.select %10, %8, %12 : vector<1x8x64xi1>, vector<1x8x64xf32>
    %c0_7 = arith.constant 0 : index
    %c0_8 = arith.constant 0 : index
    %c0_9 = arith.constant 0 : index
    %14 = vector.load %arg5[%c0_7, %c0_8, %c0_9] : memref<1x8x64xf32, #tpu.memory_space<vmem>>, vector<1x8x64xf32>
    tpu.vector_store %arg5[%c0_7, %c0_8, %c0_9], %13 {strides = array<i32>} : memref<1x8x64xf32, #tpu.memory_space<vmem>>, vector<1x8x64xf32>,
    return
  }
  func.func @transform_0(%arg0: i32, %arg1: i32) -> (i32, i32, i32) {
    %c0_i32 = arith.constant 0 : i32
    %c0_i32_0 = arith.constant 0 : i32
    return %arg0, %c0_i32, %arg1 : i32, i32, i32
  }
  func.func @transform_1(%arg0: i32, %arg1: i32) -> (i32, i32) {
    %c0_i32 = arith.constant 0 : i32
    %c0_i32_0 = arith.constant 0 : i32
    %c0_i32_1 = arith.constant 0 : i32
    return %c0_i32, %c0_i32_0 : i32, i32
  }
  func.func @transform_2(%arg0: i32, %arg1: i32) -> (i32, i32) {
    %c0_i32 = arith.constant 0 : i32
    %c0_i32_0 = arith.constant 0 : i32
    %c0_i32_1 = arith.constant 0 : i32
    return %c0_i32, %c0_i32_0 : i32, i32
  }
  func.func @transform_3(%arg0: i32, %arg1: i32) -> (i32, i32, i32) {
    %c0_i32 = arith.constant 0 : i32
    %c0_i32_0 = arith.constant 0 : i32
    return %arg0, %c0_i32, %arg1 : i32, i32, i32
  }
}

</mosaic_0001>

<bundles_post_ra>
// kernel: encoder_block.5
= control target key start
LH: loop header
LB: loop body
LE: loop exit
PB: predicated region body
PF: predicated region fallthrough
CT: control target
= control target key end

     0   :  { %s371_s12 = smov 0   ;;  %s373_s13 = smov 0   ;;  %s407_s0 = inlined_call_operand.vmem [shape: f32[2,8,64], index: 0, kind: input, shape index: {}]   ;;  %s408_s1 = inlined_call_operand.vmem [shape: f32[8,1], index: 1, kind: input, shape index: {}]   ;;  %s409_s2 = inlined_call_operand.vmem [shape: f32[8,1], index: 2, kind: input, shape index: {}]   ;;  %s410_s3 = inlined_call_operand.vmem [shape: f32[2,8,64], index: 3, kind: output, shape index: {}]  }
   0x1   :  { %s375_s14 = smov 0  }
   0x2 LB: > { %s25_s15 = sadd.s32 1, %s344_s13  ;;  %p295_p0 = scmp.ge.s32.totalorder %s348_s14, 1  ;;  %s348_s14 = sphi %s375_s14, %s13_s14   ;;  %s344_s13 = sphi %s373_s13, %s412_s13   ;;  %s340_s12 = sphi %s371_s12, %s411_s12  }
   0x3   : > { %p27_p1 = scmp.ge.s32.totalorder %s25_s15, 2  ;;  %p155_p2 = scmp.lt.s32.totalorder %s348_s14, 3 }
   0x5   : > { %s414_s15 = smov (%p27_p1, %s25_s15), 0  ;;  %p156_p3 = pnand %p295_p0, %p155_p2 }
   0x6   : > { %v198_v0 = vld [vmem:[%s408_s1] sm:$0xff] (!%p156_p3)  ;;  %v350_v1 = vmov (!%p156_p3), 0   ;;  %p183_p4 = scmp.lt.s32.totalorder (!%p156_p3), %s340_s12, 1  ;;  %vm215_vm0 = vcmask (!%p156_p3), 523264  }
   0x7   : > { %159 = sbr.rel (%p156_p3) target bundleno = 146 (0x92), region = 32  ;;  %325 = vset.pattern.permute.xlu0 (!%p156_p3), %v350_v1  ;;  %v205_v2 = vld [vmem:[%s409_s2] sm:$0xff] (!%p156_p3) }
   0x8   : > { %201 = vperm.xlu0 (!%p156_p3), %325, %v198_v0  }
   0xc   : > { %208 = vperm.xlu0 (!%p156_p3), %325, %v205_v2  }
   0xe   : > { %s416_s12 = smov (!%p183_p4, %s340_s12), 1 }
   0xf   : > { %s296_s20 = sshll.u32 %s416_s12, 3 }
  0x10   : > { %s189_s23 = scalar_lea.vmem %s407_s0, %s296_s20  ;;  %s196_s26 = scalar_lea.vmem %s410_s3, %s296_s20 }
  0x11   : > { %v197_v4 = vld [vmem:[%s189_s23] sm:$0xff] }
  0x87   : > { %v202_v3 = vpop.permute.xlu0 %201 }
  0x88   : > { %v204_v5 = vmul.f32 %v202_v3, %v197_v4 }
  0x8b   : > { %v209_v6 = vpop.permute.xlu0 %208 }
  0x8c   : > { %v211_v7 = vadd.f32 %v209_v6, %v204_v5 }
  0x8e   : > { %vm212_vm1 = vcmp.ge.f32.partialorder %v211_v7, 0.0  ;;  %v213_v8 = vmul.f32 0.2, %v211_v7 }
  0x90   : > { %v214_v9 = vsel %vm212_vm1, %v211_v7, %v213_v8 }
  0x91   : > { %216 = vst.msk [vmem:[%s196_s26] sm:$0xff] %vm215_vm0, %v214_v9 }
  0x92 PF: > { %s13_s14 = sadd.s32 1, %s348_s14   ;;  %s411_s12 = smov %s344_s13 }
  0x93   : > { %p10_p5 = scmp.ge.s32.totalorder %s13_s14, 4   ;;  %s412_s13 = smov %s414_s15 }
  0x95   :  { %12 = sbr.rel (!%p10_p5) target bundleno = 2 (0x2), region = 62 }

// kernel: encoder_block.3
= control target key start
LH: loop header
LB: loop body
LE: loop exit
PB: predicated region body
PF: predicated region fallthrough
CT: control target
= control target key end

     0   :  { %s2317_s12 = smov 0   ;;  %s2319_s13 = smov 0   ;;  %s3190_s0 = inlined_call_operand.vmem [shape: f32[2,1,16,9,9], index: 0, kind: input, shape index: {}]   ;;  %s3191_s1 = inlined_call_operand.vmem [shape: f32[8,64], index: 1, kind: input, shape index: {}]   ;;  %s3192_s2 = inlined_call_operand.vmem [shape: f32[2,8,64], index: 2, kind: output, shape index: {0}]   ;;  %s3193_s3 = inlined_call_operand.vmem [shape: f32[2,1,8,2], index: 3, kind: output, shape index: {1}]  }
   0x1   :  { %s2321_s14 = smov 0  }
   0x2 LB: > { %s26_s15 = sadd.s32 1, %s2278_s13  ;;  %p2034_p0 = scmp.ge.s32.totalorder %s2282_s14, 1  ;;  %s2282_s14 = sphi %s2321_s14, %s14_s14   ;;  %s2278_s13 = sphi %s2319_s13, %s3196_s13   ;;  %s2274_s12 = sphi %s2317_s12, %s3195_s12  }
   0x3   : > { %p28_p1 = scmp.ge.s32.totalorder %s26_s15, 2  ;;  %p162_p2 = scmp.lt.s32.totalorder %s2282_s14, 3 }
   0x5   : > { %s3198_s15 = smov (%p28_p1, %s26_s15), 0  ;;  %p163_p3 = pnand %p2034_p0, %p162_p2 }
   0x6   : > { %p199_p4 = scmp.lt.s32.totalorder (!%p163_p3), %s2274_s12, 1  ;;  %s2284_s20 = smov (!%p163_p3), 127   ;;  %v2285_v4 = vmov (!%p163_p3), 1983009808   ;;  %v259_v6 = vlaneseq (!%p163_p3)  ;;  %v2286_v9 = vmov (!%p163_p3), 1934713408  }
   0x7   : > { %166 = sbr.rel (%p163_p3) target bundleno = 704 (0x2c0), region = 28  ;;  %v257_v5 = vunpack.c.l.s4 (!%p163_p3), %v2285_v4  ;;  %v321_v10 = vunpack.c.l.s4 (!%p163_p3), %v2286_v9  ;;  %vm1025_vm0 = vcmask (!%p163_p3), 1046528   ;;  %s2287_s21 = smov (!%p163_p3), 8   ;;  %vm582_vm1 = vcmask (!%p163_p3), 64512  }
   0x8   : > { %v260_v12 = vshrl.u32 (!%p163_p3), %v259_v6, 7  ;;  %s2288_s22 = smov (!%p163_p3), 16   ;;  %s2289_s23 = smov (!%p163_p3), 24   ;;  %vm585_vm2 = vcmask (!%p163_p3), 130048   ;;  %vm588_vm3 = vcmask (!%p163_p3), 195584   ;;  %vm591_vm4 = vcmask (!%p163_p3), 261120  }
   0x9   : > { %v258_v11 = vunpack.c.0.s8 (!%p163_p3), %v257_v5  ;;  %v322_v15 = vunpack.c.0.s8 (!%p163_p3), %v321_v10  ;;  %s2290_s24 = smov (!%p163_p3), 32   ;;  %s2291_s25 = smov (!%p163_p3), 40   ;;  %vm594_vm5 = vcmask (!%p163_p3), 326656   ;;  %vm597_vm6 = vcmask (!%p163_p3), 392192  }
   0xa   : > { %s2292_s26 = smov (!%p163_p3), 48   ;;  %s2293_s27 = smov (!%p163_p3), 56   ;;  %vm600_vm7 = vcmask (!%p163_p3), 457728   ;;  %vm2295_vm8 = vmmov (!%p163_p3), 0   ;;  %vm1823_vm9 = vcmask (!%p163_p3), 523264   ;;  %vm1905_vm10 = vcmask (!%p163_p3), 7168  }
   0xb   : > { %v2385_v18 = vsub.s32 (!%p163_p3), %v258_v11, %v260_v12  ;;  %v2420_v35 = vsub.s32 (!%p163_p3), %v322_v15, %v260_v12  ;;  %vm1907_vm11 = vcmask (!%p163_p3), 15360  }
   0xe   : > { %s3200_s12 = smov (!%p199_p4, %s2274_s12), 1 }
   0xf   : > { %s2042_s16 = sshll.u32 %s3200_s12, 8  ;;  %s2037_s30 = sshll.u32 %s3200_s12, 3 }
  0x10   : > { %s2341_s19 = scalar_lea.vmem %s3190_s0, %s2042_s16  ;;  %s214_s6 = scalar_lea.vmem %s3192_s2, %s2037_s30 }
  0x11   : > { %v2344_v0 = vld [vmem:[%s2341_s19 + $0x20] sm:$0xff]  ;;  %v2354_v2 = vld [vmem:[%s2341_s19 + $0x30] sm:$0xff]  ;;  %v225_v28 = vld [vmem:[%s2341_s19 + $0x18] sm:$0x1]  ;;  %s221_s9 = scalar_lea.vmem %s3193_s3, %s2037_s30 }
  0x12   : > { %v2347_v1 = vld [vmem:[%s2341_s19] sm:$0xff]  ;;  %623 = vrot.lane.b32.xlu1 %v2344_v0, %s2284_s20  ;;  %v2357_v3 = vld [vmem:[%s2341_s19 + $0x10] sm:$0xff]  ;;  %v1035_v24 = vrot.slane %v2354_v2, 1  ;;  %v229_v30 = vld [vmem:[%s2341_s19 + $0x38] sm:$0x1]  ;;  %v1032_v34 = vrot.slane %v2344_v0, 1 }
  0x13   : > { %619 = vrot.lane.b32.xlu0 %v2347_v1, %s2284_s20  ;;  %v2364_v7 = vld [vmem:[%s2341_s19 + $0x50] sm:$0xff]  ;;  %v2367_v8 = vld [vmem:[%s2341_s19 + $0x40] sm:$0xff]  ;;  %v254_v19 = vcombine.low %v2347_v1, %v2344_v0  ;;  %v1026_v23 = vrot.slane %v2347_v1, 1  ;;  %v270_v25 = vcombine.low %v2357_v3, %v2354_v2  ;;  %v1029_v29 = vrot.slane %v2357_v3, 1  ;;  %v223_v32 = vld [vmem:[%s2341_s19 + $0x8] sm:$0x1] }
  0x14   : > { %v2374_v13 = vld [vmem:[%s2341_s19 + $0x70] sm:$0xff]  ;;  %v2377_v14 = vld [vmem:[%s2341_s19 + $0x60] sm:$0xff]  ;;  %v227_v33 = vld [vmem:[%s2341_s19 + $0x28] sm:$0x1]  ;;  %v1030_v45 = vrot.slane %v225_v28, 1  ;;  %v1036_v46 = vrot.slane %v229_v30, 1 }
  0x15   : > { %v2380_v16 = vld [vmem:[%s2341_s19 + $0x90] sm:$0xff]  ;;  %v2383_v17 = vld [vmem:[%s2341_s19 + $0x80] sm:$0xff]  ;;  %v302_v26 = vcombine.low %v2364_v7, %v2374_v13  ;;  %v286_v36 = vcombine.low %v2367_v8, %v2377_v14  ;;  %v233_v41 = vld [vmem:[%s2341_s19 + $0x58] sm:$0x1]  ;;  %v2436_v43 = vrot.slane %v254_v19, %v2385_v18  ;;  %v2445_v47 = vrot.slane %v270_v25, %v2385_v18 }
  0x16   : > { %625 = vrot.lane.b32.xlu1 %v2354_v2, %s2284_s20  ;;  %v2394_v20 = vld [vmem:[%s2341_s19 + $0xb0] sm:$0xff]  ;;  %v2397_v21 = vld [vmem:[%s2341_s19 + $0xa0] sm:$0xff]  ;;  %v231_v42 = vld [vmem:[%s2341_s19 + $0x48] sm:$0x1]  ;;  %v1027_v49 = vrot.slane %v223_v32, 1  ;;  %v1033_v50 = vrot.slane %v227_v33, 1  ;;  %v2474_v62 = vsel %vm1025_vm0, %v1029_v29, %v1030_v45  ;;  %v2477_v63 = vsel %vm1025_vm0, %v1035_v24, %v1036_v46 }
  0x17   : > { %621 = vrot.lane.b32.xlu0 %v2357_v3, %s2284_s20  ;;  %v2400_v22 = vld [vmem:[%s2341_s19 + $0xd0] sm:$0xff]  ;;  %v2409_v27 = vld [vmem:[%s2341_s19 + $0xc0] sm:$0xff]  ;;  %v406_v37 = vcombine.low %v2380_v16, %v2394_v20  ;;  %v390_v38 = vcombine.low %v2383_v17, %v2397_v21  ;;  %v2448_v48 = vrot.slane %v302_v26, %v2385_v18  ;;  %v1041_v51 = vrot.slane %v2364_v7, 1  ;;  %v237_v59 = vld [vmem:[%s2341_s19 + $0x78] sm:$0x1] }
  0x18   : > { %v2415_v31 = vld [vmem:[%s2341_s19 + $0xf0] sm:$0xff]  ;;  %v2431_v40 = vld [vmem:[%s2341_s19 + $0xe0] sm:$0xff]  ;;  %v1042_v52 = vrot.slane %v233_v41, 1  ;;  %v1038_v53 = vrot.slane %v2367_v8, 1  ;;  %v1039_v54 = vrot.slane %v231_v42, 1  ;;  %v2453_v55 = vrot.slane %v286_v36, %v2385_v18 }
  0x19   : > { %v438_v39 = vcombine.low %v2400_v22, %v2415_v31  ;;  %v422_v44 = vcombine.low %v2409_v27, %v2431_v40  ;;  %v2456_v56 = vrot.slane %v406_v37, %v2385_v18  ;;  %v2459_v57 = vrot.slane %v390_v38, %v2385_v18  ;;  %v235_v60 = vld [vmem:[%s2341_s19 + $0x68] sm:$0x1]  ;;  %v241_v4 = vld [vmem:[%s2341_s19 + $0x98] sm:$0x1] }
  0x1a   : > { %629 = vrot.lane.b32.xlu1 %v2364_v7, %s2284_s20  ;;  %v239_v5 = vld [vmem:[%s2341_s19 + $0x88] sm:$0x1]  ;;  %v2482_v6 = vsel %vm1025_vm0, %v1026_v23, %v1027_v49  ;;  %v1106_v9 = vcombine.low %v2474_v62, %v2477_v63  ;;  %v2487_v10 = vsel %vm1025_vm0, %v1032_v34, %v1033_v50  ;;  %v1047_v11 = vrot.slane %v2374_v13, 1  ;;  %v245_v12 = vld [vmem:[%s2341_s19 + $0xb8] sm:$0x1] }
  0x1b   : > { %627 = vrot.lane.b32.xlu0 %v2367_v8, %s2284_s20  ;;  %v2462_v58 = vrot.slane %v438_v39, %v2385_v18  ;;  %v2471_v61 = vrot.slane %v422_v44, %v2385_v18  ;;  %v243_v15 = vld [vmem:[%s2341_s19 + $0xa8] sm:$0x1]  ;;  %v1090_v19 = vcombine.low %v2482_v6, %v2487_v10  ;;  %v2495_v24 = vsel %vm1025_vm0, %v1041_v51, %v1042_v52  ;;  %v249_v26 = vld [vmem:[%s2341_s19 + $0xd8] sm:$0x1] }
  0x1c   : > { %v2498_v23 = vsel %vm1025_vm0, %v1038_v53, %v1039_v54  ;;  %v1048_v25 = vrot.slane %v237_v59, 1  ;;  %v247_v28 = vld [vmem:[%s2341_s19 + $0xc8] sm:$0x1]  ;;  %v1044_v29 = vrot.slane %v2377_v14, 1  ;;  %v1045_v30 = vrot.slane %v235_v60, 1 }
  0x1d   : > { %v1053_v32 = vrot.slane %v2380_v16, 1  ;;  %v1054_v33 = vrot.slane %v241_v4, 1  ;;  %v253_v34 = vld [vmem:[%s2341_s19 + $0xf8] sm:$0x1]  ;;  %v1050_v36 = vrot.slane %v2383_v17, 1  ;;  %v1051_v37 = vrot.slane %v239_v5, 1 }
  0x1e   : > { %633 = vrot.lane.b32.xlu1 %v2374_v13, %s2284_s20  ;;  %v1059_v38 = vrot.slane %v2394_v20, 1  ;;  %v1060_v39 = vrot.slane %v245_v12, 1  ;;  %v251_v41 = vld [vmem:[%s2341_s19 + $0xe8] sm:$0x1]  ;;  %v1056_v42 = vrot.slane %v2397_v21, 1  ;;  %v1057_v44 = vrot.slane %v243_v15, 1 }
  0x1f   : > { %631 = vrot.lane.b32.xlu0 %v2377_v14, %s2284_s20  ;;  %v1065_v45 = vrot.slane %v2400_v22, 1  ;;  %v1066_v46 = vrot.slane %v249_v26, 1  ;;  %v1062_v49 = vrot.slane %v2409_v27, 1  ;;  %v1063_v50 = vrot.slane %v247_v28, 1 }
  0x20   : > { %v1071_v51 = vrot.slane %v2415_v31, 1  ;;  %v1072_v52 = vrot.slane %v253_v34, 1  ;;  %v2517_v53 = vsel %vm1025_vm0, %v1047_v11, %v1048_v25  ;;  %v2520_v54 = vsel %vm1025_vm0, %v1044_v29, %v1045_v30 }
  0x21   : > { %v1068_v59 = vrot.slane %v2431_v40, 1  ;;  %v1069_v60 = vrot.slane %v251_v41, 1  ;;  %v1138_v4 = vcombine.low %v2495_v24, %v2517_v53  ;;  %v1122_v5 = vcombine.low %v2498_v23, %v2520_v54 }
  0x22   : > { %637 = vrot.lane.b32.xlu1 %v2380_v16, %s2284_s20  ;;  %v2532_v11 = vsel %vm1025_vm0, %v1053_v32, %v1054_v33  ;;  %v2535_v12 = vsel %vm1025_vm0, %v1050_v36, %v1051_v37  ;;  %v2538_v15 = vsel %vm1025_vm0, %v1059_v38, %v1060_v39  ;;  %v2541_v25 = vsel %vm1025_vm0, %v1056_v42, %v1057_v44 }
  0x23   : > { %635 = vrot.lane.b32.xlu0 %v2383_v17, %s2284_s20  ;;  %v318_v26 = vcombine.low %v2436_v43, %v2445_v47  ;;  %v1242_v28 = vcombine.low %v2532_v11, %v2538_v15  ;;  %v2548_v29 = vsel %vm1025_vm0, %v1065_v45, %v1066_v46  ;;  %v2551_v30 = vsel %vm1025_vm0, %v1062_v49, %v1063_v50 }
  0x24   : > { %v2554_v32 = vsel %vm1025_vm0, %v1071_v51, %v1072_v52  ;;  %v2557_v33 = vsel %vm1025_vm0, %v1068_v59, %v1069_v60  ;;  %v350_v34 = vcombine.low %v2453_v55, %v2448_v48  ;;  %v454_v36 = vcombine.low %v2459_v57, %v2456_v56 }
  0x25   : > { %v486_v37 = vcombine.low %v2471_v61, %v2462_v58  ;;  %v1226_v38 = vcombine.low %v2535_v12, %v2541_v25  ;;  %v1274_v39 = vcombine.low %v2548_v29, %v2554_v32  ;;  %v1258_v41 = vcombine.low %v2551_v30, %v2557_v33 }
  0x26   : > { %641 = vrot.lane.b32.xlu1 %v2394_v20, %s2284_s20  ;;  %v2576_v42 = vrot.slane %v318_v26, %v2420_v35  ;;  %v2579_v44 = vrot.slane %v350_v34, %v2420_v35  ;;  %v2582_v45 = vrot.slane %v454_v36, %v2420_v35  ;;  %v2588_v49 = vrot.slane %v1106_v9, %v2385_v18 }
  0x27   : > { %639 = vrot.lane.b32.xlu0 %v2397_v21, %s2284_s20  ;;  %v2585_v46 = vrot.slane %v486_v37, %v2420_v35  ;;  %v2591_v50 = vrot.slane %v1090_v19, %v2385_v18  ;;  %v2594_v51 = vrot.slane %v1138_v4, %v2385_v18  ;;  %v2597_v52 = vrot.slane %v1122_v5, %v2385_v18 }
  0x28   : > { %v255_v26 = vcombine.high %v2347_v1, %v2344_v0  ;;  %v2610_v9 = vrot.slane %v1242_v28, %v2385_v18  ;;  %v2613_v19 = vrot.slane %v1226_v38, %v2385_v18  ;;  %v2616_v4 = vrot.slane %v1274_v39, %v2385_v18 }
  0x29   : > { %v518_v59 = vcombine.low %v2582_v45, %v2585_v46  ;;  %v2619_v5 = vrot.slane %v1258_v41, %v2385_v18  ;;  %v271_v0 = vcombine.high %v2357_v3, %v2354_v2  ;;  %v1154_v1 = vcombine.low %v2591_v50, %v2588_v49 }
  0x2a   : > { %645 = vrot.lane.b32.xlu1 %v2400_v22, %s2284_s20  ;;  %v1186_v34 = vcombine.low %v2597_v52, %v2594_v51  ;;  %v2632_v28 = vrot.slane %v255_v26, %v2385_v18  ;;  %v1290_v36 = vcombine.low %v2613_v19, %v2610_v9  ;;  %v303_v37 = vcombine.high %v2364_v7, %v2374_v13 }
  0x2b   : > { %643 = vrot.lane.b32.xlu0 %v2409_v27, %s2284_s20  ;;  %v1322_v2 = vcombine.low %v2619_v5, %v2616_v4  ;;  %v2639_v3 = vrot.slane %v271_v0, %v2385_v18  ;;  %v287_v38 = vcombine.high %v2367_v8, %v2377_v14  ;;  %v407_v39 = vcombine.high %v2380_v16, %v2394_v20 }
  0x2c   : > { %v391_v41 = vcombine.high %v2383_v17, %v2397_v21  ;;  %v439_v26 = vcombine.high %v2400_v22, %v2415_v31  ;;  %v2652_v60 = vrot.slane %v1154_v1, %v2420_v35  ;;  %v2655_v0 = vrot.slane %v1186_v34, %v2420_v35 }
  0x2d   : > { %v423_v7 = vcombine.high %v2409_v27, %v2431_v40  ;;  %v1107_v8 = vcombine.high %v2474_v62, %v2477_v63  ;;  %v1091_v13 = vcombine.high %v2482_v6, %v2487_v10  ;;  %v1139_v14 = vcombine.high %v2495_v24, %v2517_v53 }
  0x2e   : > { %649 = vrot.lane.b32.xlu1 %v2415_v31, %s2284_s20  ;;  %v2670_v16 = vrot.slane %v1290_v36, %v2420_v35  ;;  %v2673_v17 = vrot.slane %v1322_v2, %v2420_v35  ;;  %v1218_v20 = vcombine.low %v2652_v60, %v2655_v0  ;;  %v2678_v21 = vrot.slane %v303_v37, %v2385_v18 }
  0x2f   : > { %647 = vrot.lane.b32.xlu0 %v2431_v40, %s2284_s20  ;;  %v2681_v22 = vrot.slane %v287_v38, %v2385_v18  ;;  %v2684_v27 = vrot.slane %v407_v39, %v2385_v18  ;;  %v1123_v31 = vcombine.high %v2498_v23, %v2520_v54  ;;  %v1243_v40 = vcombine.high %v2532_v11, %v2538_v15 }
  0x30   : > { %v2713_v1 = vrot.slane %v1091_v13, %v2385_v18  ;;  %v2716_v34 = vrot.slane %v1139_v14, %v2385_v18  ;;  %v455_v36 = vcombine.high %v2459_v57, %v2456_v56  ;;  %v487_v2 = vcombine.high %v2471_v61, %v2462_v58 }
  0x31   : > { %v2727_v37 = vrot.slane %v1123_v31, %v2385_v18  ;;  %v2730_v38 = vrot.slane %v1243_v40, %v2385_v18  ;;  %v519_v56 = vcombine.high %v2582_v45, %v2585_v46  ;;  %v366_v57 = vcombine.low %v2681_v22, %v2678_v21 }
  0x32   : > { %1434 = vrot.lane.b32.xlu1 %v2474_v62, %s2284_s20  ;;  %v1227_v62 = vcombine.high %v2535_v12, %v2541_v25 }
  0x33   : > { %1432 = vrot.lane.b32.xlu0 %v2482_v6, %s2284_s20  ;;  %v1354_v6 = vcombine.low %v2670_v16, %v2673_v17  ;;  %v374_v40 = vrot.slane %v366_v57, %v2420_v35 }
  0x34   : > { %v2733_v39 = vrot.slane %v1227_v62, %v2385_v18 }
  0x36   : > { %1438 = vrot.lane.b32.xlu1 %v2477_v63, %s2284_s20  ;;  %v1275_v63 = vcombine.high %v2548_v29, %v2554_v32 }
  0x37   : > { %1436 = vrot.lane.b32.xlu0 %v2487_v10, %s2284_s20  ;;  %v2697_v10 = vrot.slane %v391_v41, %v2385_v18  ;;  %v469_v41 = vrot.slane %v455_v36, %v2420_v35 }
  0x39   : > { %v470_v58 = vcombine.low %v2697_v10, %v2684_v27 }
  0x3a   : > { %1442 = vrot.lane.b32.xlu1 %v2495_v24, %s2284_s20  ;;  %v2700_v24 = vrot.slane %v439_v26, %v2385_v18  ;;  %v501_v26 = vrot.slane %v487_v2, %v2420_v35  ;;  %v367_v2 = vcombine.high %v2681_v22, %v2678_v21 }
  0x3b   : > { %1440 = vrot.lane.b32.xlu0 %v2498_v23, %s2284_s20  ;;  %v1259_v23 = vcombine.high %v2551_v30, %v2557_v33  ;;  %v478_v62 = vrot.slane %v470_v58, %v2420_v35 }
  0x3c   : > { %v520_v31 = vcombine.low %v469_v41, %v501_v26  ;;  %v521_v36 = vcombine.high %v469_v41, %v501_v26 }
  0x3e   : > { %1446 = vrot.lane.b32.xlu1 %v2517_v53, %s2284_s20  ;;  %v437_v53 = vrot.slane %v423_v7, %v2385_v18 }
  0x3f   : > { %1444 = vrot.lane.b32.xlu0 %v2520_v54, %s2284_s20  ;;  %v2710_v54 = vrot.slane %v1107_v8, %v2385_v18  ;;  %v1202_v8 = vcombine.low %v2727_v37, %v2716_v34 }
  0x40   : > { %v502_v61 = vcombine.low %v437_v53, %v2700_v24  ;;  %v503_v57 = vcombine.high %v437_v53, %v2700_v24 }
  0x41   : > { %v1170_v7 = vcombine.low %v2713_v1, %v2710_v54  ;;  %v2792_v22 = vrot.slane %v1202_v8, %v2420_v35 }
  0x42   : > { %1450 = vrot.lane.b32.xlu1 %v2532_v11, %s2284_s20  ;;  %v319_v11 = vcombine.high %v2436_v43, %v2445_v47  ;;  %v2736_v43 = vrot.slane %v1275_v63, %v2385_v18  ;;  %v2743_v47 = vrot.slane %v1259_v23, %v2385_v18  ;;  %v510_v63 = vrot.slane %v502_v61, %v2420_v35 }
  0x43   : > { %1448 = vrot.lane.b32.xlu0 %v2535_v12, %s2284_s20  ;;  %v351_v12 = vcombine.high %v2453_v55, %v2448_v48  ;;  %v383_v48 = vcombine.high %v2576_v42, %v2579_v44  ;;  %v334_v55 = vcombine.low %v2632_v28, %v2639_v3  ;;  %v335_v23 = vcombine.high %v2632_v28, %v2639_v3 }
  0x44   : > { %v522_v58 = vcombine.low %v478_v62, %v510_v63  ;;  %v2789_v21 = vrot.slane %v1170_v7, %v2420_v35  ;;  %v517_v53 = vrot.slane %v503_v57, %v2420_v35  ;;  %v1307_v57 = vcombine.high %v2733_v39, %v2730_v38 }
  0x45   : > { %v342_v13 = vrot.slane %v334_v55, %v2420_v35  ;;  %v471_v55 = vcombine.high %v2697_v10, %v2684_v27  ;;  %v349_v61 = vrot.slane %v335_v23, %v2420_v35 }
  0x46   : > { %1454 = vrot.lane.b32.xlu1 %v2538_v15, %s2284_s20  ;;  %v333_v15 = vrot.slane %v319_v11, %v2420_v35  ;;  %v1306_v11 = vcombine.low %v2733_v39, %v2730_v38 }
  0x47   : > { %1452 = vrot.lane.b32.xlu0 %v2541_v25, %s2284_s20  ;;  %v365_v25 = vrot.slane %v351_v12, %v2420_v35  ;;  %v386_v3 = vcombine.low %v342_v13, %v374_v40  ;;  %v485_v24 = vrot.slane %v471_v55, %v2420_v35  ;;  %v1203_v55 = vcombine.high %v2727_v37, %v2716_v34 }
  0x48   : > { %v2795_v27 = vrot.slane %v1306_v11, %v2420_v35  ;;  %v2848_v37 = vrot.slane %v1307_v57, %v2420_v35 }
  0x49   : > { %v384_v14 = vcombine.low %v333_v15, %v365_v25  ;;  %v385_v12 = vcombine.high %v333_v15, %v365_v25  ;;  %v2135_v15 = vpack.i.bf16 %v522_v58, %v386_v3  ;;  %v1222_v25 = vcombine.low %v2789_v21, %v2792_v22 }
  0x4a   : > { %1458 = vrot.lane.b32.xlu1 %v2548_v29, %s2284_s20  ;;  %v1338_v29 = vcombine.low %v2743_v47, %v2736_v43  ;;  %v524_v8 = vcombine.low %v485_v24, %v517_v53  ;;  %v525_v11 = vcombine.high %v485_v24, %v517_v53  ;;  %v2845_v34 = vrot.slane %v1203_v55, %v2420_v35 }
  0x4b   : > { %1456 = vrot.lane.b32.xlu0 %v2551_v30, %s2284_s20  ;;  %v2120_v30 = vpack.i.bf16 %v519_v56, %v383_v48  ;;  %v2125_v28 = vpack.i.bf16 %v520_v31, %v384_v14  ;;  %v387_v48 = vcombine.high %v342_v13, %v374_v40  ;;  %v523_v56 = vcombine.high %v478_v62, %v510_v63 }
  0x4c   : > { %v2130_v10 = vpack.i.bf16 %v521_v36, %v385_v12  ;;  %v1155_v14 = vcombine.high %v2591_v50, %v2588_v49  ;;  %v1187_v31 = vcombine.high %v2597_v52, %v2594_v51  ;;  %v1291_v40 = vcombine.high %v2613_v19, %v2610_v9 }
  0x4d   : > { %v2140_v26 = vpack.i.bf16 %v523_v56, %v387_v48  ;;  %v1323_v62 = vcombine.high %v2619_v5, %v2616_v4  ;;  %v1219_v49 = vcombine.high %v2652_v60, %v2655_v0  ;;  %v1355_v9 = vcombine.high %v2670_v16, %v2673_v17 }
  0x4e   : > { %1462 = vrot.lane.b32.xlu1 %v2554_v32, %s2284_s20  ;;  %v1346_v32 = vrot.slane %v1338_v29, %v2420_v35  ;;  %v1169_v50 = vrot.slane %v1155_v14, %v2420_v35  ;;  %v1201_v51 = vrot.slane %v1187_v31, %v2420_v35  ;;  %v1305_v19 = vrot.slane %v1291_v40, %v2420_v35 }
  0x4f   : > { %1460 = vrot.lane.b32.xlu0 %v2557_v33, %s2284_s20  ;;  %v381_v33 = vrot.slane %v367_v2, %v2420_v35  ;;  %v1337_v4 = vrot.slane %v1323_v62, %v2420_v35  ;;  %v2155_v5 = vpack.i.bf16 %v1355_v9, %v1219_v49  ;;  %v1171_v12 = vcombine.high %v2713_v1, %v2710_v54 }
  0x50   : > { %v1358_v41 = vcombine.low %v2795_v27, %v1346_v32  ;;  %v1220_v29 = vcombine.low %v1169_v50, %v1201_v51  ;;  %v1221_v36 = vcombine.high %v1169_v50, %v1201_v51  ;;  %v1223_v48 = vcombine.high %v2789_v21, %v2792_v22 }
  0x51   : > { %v388_v7 = vcombine.low %v349_v61, %v381_v33  ;;  %v389_v23 = vcombine.high %v349_v61, %v381_v33  ;;  %v1357_v2 = vcombine.high %v1305_v19, %v1337_v4  ;;  %v2840_v54 = vrot.slane %v1171_v12, %v2420_v35 }
  0x52   : > { %2126 = vrot.lane.b32.xlu1 %v2125_v28, %s2288_s22  ;;  %v2170_v13 = vpack.i.bf16 %v1358_v41, %v1222_v25  ;;  %v1339_v28 = vcombine.high %v2743_v47, %v2736_v43  ;;  %v1359_v1 = vcombine.high %v2795_v27, %v1346_v32 }
  0x53   : > { %2121 = vrot.lane.b32.xlu0 %v2120_v30, %s2287_s21  ;;  %v2145_v63 = vpack.i.bf16 %v524_v8, %v388_v7  ;;  %v2150_v52 = vpack.i.bf16 %v525_v11, %v389_v23  ;;  %v1356_v30 = vcombine.low %v1305_v19, %v1337_v4  ;;  %v2165_v58 = vpack.i.bf16 %v1357_v2, %v1221_v36 }
  0x54   : > { %v2851_v38 = vrot.slane %v1339_v28, %v2420_v35  ;;  %v2175_v39 = vpack.i.bf16 %v1359_v1, %v1223_v48  ;;  %v1224_v43 = vcombine.low %v2840_v54, %v2845_v34 }
  0x55   : > { %v2160_v3 = vpack.i.bf16 %v1356_v30, %v1220_v29 }
  0x56   : > { %2136 = vrot.lane.b32.xlu1 %v2135_v15, %s2290_s24  ;;  %v1360_v47 = vcombine.low %v2848_v37, %v2851_v38 }
  0x57   : > { %2131 = vrot.lane.b32.xlu0 %v2130_v10, %s2289_s23 }
  0x58   : > { %v2180_v56 = vpack.i.bf16 %v1360_v47, %v1224_v43 }
  0x5a   : > { %2171 = vrot.lane.b32.xlu1 %v2170_v13, %s2290_s24 }
  0x5b   : > { %2141 = vrot.lane.b32.xlu0 %v2140_v26, %s2291_s25 }
  0x5f   : > { %2146 = vrot.lane.b32.xlu0 %v2145_v63, %s2292_s26 }
  0x63   : > { %2151 = vrot.lane.b32.xlu0 %v2150_v52, %s2293_s27 }
  0x67   : > { %2156 = vrot.lane.b32.xlu0 %v2155_v5, %s2287_s21 }
  0x6b   : > { %2161 = vrot.lane.b32.xlu0 %v2160_v3, %s2288_s22 }
  0x6f   : > { %2166 = vrot.lane.b32.xlu0 %v2165_v58, %s2289_s23 }
  0x73   : > { %2176 = vrot.lane.b32.xlu0 %v2175_v39, %s2291_s25 }
  0x77   : > { %2181 = vrot.lane.b32.xlu0 %v2180_v56, %s2292_s26 }
  0x84   : > { %v624_v61 = vpop.permute.xlu1 %623 }
  0x85   : > { %v620_v21 = vpop.permute.xlu0 %619 }
  0x86   : > { %v667_v24 = vcombine.low %v620_v21, %v624_v61  ;;  %v668_v36 = vcombine.high %v620_v21, %v624_v61 }
  0x88   : > { %v626_v22 = vpop.permute.xlu1 %625  ;;  %v2864_v41 = vrot.slane %v667_v24, %v2385_v18  ;;  %v2896_v21 = vrot.slane %v668_v36, %v2385_v18 }
  0x89   : > { %v622_v27 = vpop.permute.xlu0 %621 }
  0x8a   : > { %v683_v32 = vcombine.low %v622_v27, %v626_v22  ;;  %v684_v4 = vcombine.high %v622_v27, %v626_v22 }
  0x8c   : > { %v630_v10 = vpop.permute.xlu1 %629  ;;  %v2861_v53 = vrot.slane %v683_v32, %v2385_v18  ;;  %v2887_v3 = vrot.slane %v684_v4, %v2385_v18 }
  0x8d   : > { %v628_v33 = vpop.permute.xlu0 %627 }
  0x8e   : > { %v731_v8 = vcombine.low %v2864_v41, %v2861_v53 }
  0x90   : > { %v634_v15 = vpop.permute.xlu1 %633  ;;  %v2871_v63 = vrot.slane %v731_v8, %v2420_v35 }
  0x91   : > { %v632_v25 = vpop.permute.xlu0 %631  ;;  %v715_v26 = vcombine.low %v630_v10, %v634_v15  ;;  %v716_v51 = vcombine.high %v630_v10, %v634_v15  ;;  %v747_v15 = vcombine.low %v2896_v21, %v2887_v3 }
  0x92   : > { %v699_v7 = vcombine.low %v628_v33, %v632_v25  ;;  %v700_v52 = vcombine.high %v628_v33, %v632_v25 }
  0x93   : > { %v723_v13 = vrot.slane %v715_v26, %v2385_v18  ;;  %v2879_v2 = vrot.slane %v716_v51, %v2385_v18  ;;  %v1225_v51 = vcombine.high %v2840_v54, %v2845_v34 }
  0x94   : > { %v707_v14 = vrot.slane %v699_v7, %v2385_v18  ;;  %v638_v31 = vpop.permute.xlu1 %637  ;;  %v2882_v55 = vrot.slane %v700_v52, %v2385_v18  ;;  %v732_v52 = vcombine.high %v2864_v41, %v2861_v53 }
  0x95   : > { %v636_v40 = vpop.permute.xlu0 %635 }
  0x96   : > { %v763_v62 = vcombine.low %v707_v14, %v723_v13  ;;  %v779_v22 = vcombine.low %v2882_v55, %v2879_v2  ;;  %v764_v8 = vcombine.high %v707_v14, %v723_v13 }
  0x98   : > { %v2874_v23 = vrot.slane %v763_v62, %v2420_v35  ;;  %v642_v11 = vpop.permute.xlu1 %641  ;;  %v778_v53 = vrot.slane %v764_v8, %v2420_v35 }
  0x99   : > { %v640_v49 = vpop.permute.xlu0 %639  ;;  %v819_v9 = vcombine.low %v638_v31, %v642_v11  ;;  %v820_v5 = vcombine.high %v638_v31, %v642_v11  ;;  %v2919_v11 = vrot.slane %v779_v22, %v2420_v35 }
  0x9a   : > { %v795_v50 = vcombine.low %v2871_v63, %v2874_v23  ;;  %v803_v19 = vcombine.low %v636_v40, %v640_v49  ;;  %v804_v29 = vcombine.high %v636_v40, %v640_v49 }
  0x9b   : > { %v827_v57 = vrot.slane %v819_v9, %v2385_v18  ;;  %v2890_v58 = vrot.slane %v820_v5, %v2385_v18 }
  0x9c   : > { %v646_v30 = vpop.permute.xlu1 %645  ;;  %v811_v28 = vrot.slane %v803_v19, %v2385_v18  ;;  %v2893_v48 = vrot.slane %v804_v29, %v2385_v18  ;;  %v2935_v19 = vrot.slane %v747_v15, %v2420_v35  ;;  %v796_v29 = vcombine.high %v2871_v63, %v2874_v23 }
  0x9d   : > { %v644_v12 = vpop.permute.xlu0 %643 }
  0x9e   : > { %v867_v27 = vcombine.low %v811_v28, %v827_v57  ;;  %v883_v25 = vcombine.low %v2893_v48, %v2890_v58  ;;  %v868_v49 = vcombine.high %v811_v28, %v827_v57  ;;  %v799_v28 = vcombine.low %v2935_v19, %v2919_v11 }
  0xa0   : > { %v650_v1 = vpop.permute.xlu1 %649  ;;  %v2926_v9 = vrot.slane %v867_v27, %v2420_v35  ;;  %v2938_v4 = vrot.slane %v883_v25, %v2420_v35  ;;  %v882_v36 = vrot.slane %v868_v49, %v2420_v35  ;;  %v748_v49 = vcombine.high %v2896_v21, %v2887_v3 }
  0xa1   : > { %v648_v39 = vpop.permute.xlu0 %647  ;;  %v851_v43 = vcombine.low %v646_v30, %v650_v1  ;;  %v852_v47 = vcombine.high %v646_v30, %v650_v1  ;;  %v1361_v30 = vcombine.high %v2848_v37, %v2851_v38  ;;  %v746_v37 = vrot.slane %v732_v52, %v2420_v35 }
  0xa2   : > { %v835_v56 = vcombine.low %v644_v12, %v648_v39  ;;  %v836_v61 = vcombine.high %v644_v12, %v648_v39  ;;  %v2294_v12 = vmov 0.0|0.0   ;;  %v780_v52 = vcombine.high %v2882_v55, %v2879_v2 }
  0xa3   : > { %v859_v32 = vrot.slane %v851_v43, %v2385_v18  ;;  %v2902_v10 = vrot.slane %v852_v47, %v2385_v18  ;;  %2071 = vmatprep.subr.bf16.mxu0 %v2294_v12  ;;  %v797_v27 = vcombine.low %v746_v37, %v778_v53 }
  0xa4   : > { %v843_v33 = vrot.slane %v835_v56, %v2385_v18  ;;  %v2906_v24 = vrot.slane %v836_v61, %v2385_v18  ;;  %v2912_v26 = vpop.permute.xlu1 %1434 }
  0xa5   : > { %v2914_v7 = vpop.permute.xlu0 %1432 }
  0xa6   : > { %v899_v31 = vcombine.low %v843_v33, %v859_v32  ;;  %v900_v40 = vcombine.high %v843_v33, %v859_v32  ;;  %v915_v62 = vcombine.low %v2906_v24, %v2902_v10  ;;  %v2205_v32 = vpack.i.bf16 %v1361_v30, %v1225_v51 }
  0xa7   : > { %v916_v25 = vcombine.high %v2906_v24, %v2902_v10  ;;  %v884_v30 = vcombine.high %v2893_v48, %v2890_v58  ;;  %v798_v10 = vcombine.high %v746_v37, %v778_v53 }
  0xa8   : > { %v2929_v13 = vrot.slane %v899_v31, %v2420_v35  ;;  %v2932_v14 = vrot.slane %v915_v62, %v2420_v35  ;;  %v914_v54 = vrot.slane %v900_v40, %v2420_v35  ;;  %v1439_v34 = vpop.permute.xlu1 %1438 }
  0xa9   : > { %v1437_v5 = vpop.permute.xlu0 %1436  ;;  %v1496_v39 = vcombine.low %v2912_v26, %v1439_v34  ;;  %v930_v55 = vrot.slane %v916_v25, %v2420_v35 }
  0xaa   : > { %v931_v41 = vcombine.low %v2926_v9, %v2929_v13  ;;  %v932_v57 = vcombine.high %v2926_v9, %v2929_v13  ;;  %v935_v1 = vcombine.low %v2938_v4, %v2932_v14  ;;  %v1480_v43 = vcombine.low %v2914_v7, %v1437_v5 }
  0xab   : > { %v933_v22 = vcombine.low %v882_v36, %v914_v54  ;;  %v2962_v33 = vrot.slane %v1496_v39, %v2385_v18  ;;  %v934_v62 = vcombine.high %v882_v36, %v914_v54  ;;  %v1481_v24 = vcombine.high %v2914_v7, %v1437_v5 }
  0xac   : > { %v1443_v38 = vpop.permute.xlu1 %1442  ;;  %v2185_v56 = vpack.i.bf16 %v932_v57, %v796_v29  ;;  %v2200_v61 = vpack.i.bf16 %v935_v1, %v799_v28  ;;  %v2965_v15 = vrot.slane %v1480_v43, %v2385_v18  ;;  %v1497_v57 = vcombine.high %v2912_v26, %v1439_v34 }
  0xad   : > { %v1441_v47 = vpop.permute.xlu0 %1440  ;;  %v2190_v40 = vpack.i.bf16 %v933_v22, %v797_v27  ;;  %v2195_v48 = vpack.i.bf16 %v934_v62, %v798_v10  ;;  %v936_v26 = vcombine.high %v2938_v4, %v2932_v14  ;;  %v794_v34 = vrot.slane %v780_v52, %v2420_v35 }
  0xae   : > { %2186 = vrot.lane.b32.xlu1 %v2185_v56, %s2287_s21  ;;  %2201 = vrot.lane.b32.xlu0 %v2200_v61, %s2290_s24  ;;  %v1544_v3 = vcombine.low %v2965_v15, %v2962_v33  ;;  %v762_v7 = vrot.slane %v748_v49, %v2420_v35  ;;  %v898_v5 = vrot.slane %v884_v30, %v2420_v35 }
  0xaf   : > { %v800_v36 = vcombine.high %v2935_v19, %v2919_v11  ;;  %v1511_v28 = vrot.slane %v1497_v57, %v2385_v18  ;;  %v1495_v1 = vrot.slane %v1481_v24, %v2385_v18  ;;  %v1545_v62 = vcombine.high %v2965_v15, %v2962_v33 }
  0xb0   : > { %v1447_v8 = vpop.permute.xlu1 %1446  ;;  %v2995_v39 = vrot.slane %v1544_v3, %v2420_v35  ;;  %v937_v22 = vcombine.low %v898_v5, %v930_v55  ;;  %v801_v11 = vcombine.low %v762_v7, %v794_v34  ;;  %v802_v57 = vcombine.high %v762_v7, %v794_v34 }
  0xb1   : > { %v1445_v31 = vpop.permute.xlu0 %1444  ;;  %v1528_v51 = vcombine.low %v1443_v38, %v1447_v8  ;;  %v1529_v4 = vcombine.high %v1443_v38, %v1447_v8  ;;  %v2210_v61 = vpack.i.bf16 %v936_v26, %v800_v36  ;;  %v1560_v49 = vcombine.low %v1495_v1, %v1511_v28 }
  0xb2   : > { %v1512_v29 = vcombine.low %v1441_v47, %v1445_v31  ;;  %2191 = vrot.lane.b32.xlu1 %v2190_v40, %s2288_s22  ;;  %2206 = vrot.lane.b32.xlu0 %v2205_v32, %s2293_s27  ;;  %v1513_v43 = vcombine.high %v1441_v47, %v1445_v31  ;;  %v2215_v52 = vpack.i.bf16 %v937_v22, %v801_v11 }
  0xb3   : > { %v1536_v21 = vrot.slane %v1528_v51, %v2385_v18  ;;  %v1543_v38 = vrot.slane %v1529_v4, %v2385_v18  ;;  %v938_v51 = vcombine.high %v898_v5, %v930_v55  ;;  %v3013_v15 = vrot.slane %v1545_v62, %v2420_v35 }
  0xb4   : > { %v1520_v2 = vrot.slane %v1512_v29, %v2385_v18  ;;  %v1451_v54 = vpop.permute.xlu1 %1450  ;;  %v1527_v47 = vrot.slane %v1513_v43, %v2385_v18  ;;  %v1561_v29 = vcombine.high %v1495_v1, %v1511_v28 }
  0xb5   : > { %v1449_v58 = vpop.permute.xlu0 %1448 }
  0xb6   : > { %v1576_v53 = vcombine.low %v1520_v2, %v1536_v21  ;;  %2196 = vrot.lane.b32.xlu1 %v2195_v48, %s2289_s23  ;;  %v1577_v30 = vcombine.high %v1520_v2, %v1536_v21  ;;  %v1592_v55 = vcombine.low %v1527_v47, %v1543_v38  ;;  %v1593_v21 = vcombine.high %v1527_v47, %v1543_v38 }
  0xb7   : > { %v2220_v48 = vpack.i.bf16 %v938_v51, %v802_v57  ;;  %v3019_v5 = vrot.slane %v1561_v29, %v2420_v35 }
  0xb8   : > { %v2998_v14 = vrot.slane %v1576_v53, %v2420_v35  ;;  %v1455_v37 = vpop.permute.xlu1 %1454  ;;  %v3022_v36 = vrot.slane %v1577_v30, %v2420_v35  ;;  %v3033_v22 = vrot.slane %v1593_v21, %v2420_v35 }
  0xb9   : > { %v1453_v56 = vpop.permute.xlu0 %1452  ;;  %v1632_v19 = vcombine.low %v1451_v54, %v1455_v37  ;;  %v1633_v32 = vcombine.high %v1451_v54, %v1455_v37  ;;  %v3016_v54 = vrot.slane %v1560_v49, %v2420_v35 }
  0xba   : > { %v1608_v27 = vcombine.low %v2995_v39, %v2998_v14  ;;  %v1616_v25 = vcombine.low %v1449_v58, %v1453_v56  ;;  %v1617_v40 = vcombine.high %v1449_v58, %v1453_v56  ;;  %2211 = vrot.lane.b32.xlu1 %v2210_v61, %s2291_s25  ;;  %v3030_v61 = vrot.slane %v1592_v55, %v2420_v35 }
  0xbb   : > { %v1640_v10 = vrot.slane %v1632_v19, %v2385_v18  ;;  %v1647_v24 = vrot.slane %v1633_v32, %v2385_v18  ;;  %v1614_v45 = vcombine.low %v3019_v5, %v3033_v22 }
  0xbc   : > { %v1459_v8 = vpop.permute.xlu1 %1458  ;;  %v1624_v3 = vrot.slane %v1616_v25, %v2385_v18  ;;  %v1631_v33 = vrot.slane %v1617_v40, %v2385_v18 }
  0xbd   : > { %v1457_v31 = vpop.permute.xlu0 %1456 }
  0xbe   : > { %2216 = vrot.lane.b32.xlu1 %v2215_v52, %s2292_s26  ;;  %v1680_v28 = vcombine.low %v1624_v3, %v1640_v10  ;;  %v1696_v1 = vcombine.low %v1631_v33, %v1647_v24  ;;  %v1681_v11 = vcombine.high %v1624_v3, %v1640_v10  ;;  %v1697_v19 = vcombine.high %v1631_v33, %v1647_v24 }
  0xbf   : > { %v1609_v24 = vcombine.high %v2995_v39, %v2998_v14  ;;  %v1612_v3 = vcombine.low %v3016_v54, %v3030_v61 }
  0xc0   : > { %v1463_v2 = vpop.permute.xlu1 %1462  ;;  %v3036_v38 = vrot.slane %v1680_v28, %v2420_v35  ;;  %v3039_v47 = vrot.slane %v1696_v1, %v2420_v35  ;;  %v1695_v57 = vrot.slane %v1681_v11, %v2420_v35  ;;  %v3053_v10 = vrot.slane %v1697_v19, %v2420_v35 }
  0xc1   : > { %v1461_v58 = vpop.permute.xlu0 %1460  ;;  %v1664_v26 = vcombine.low %v1459_v8, %v1463_v2  ;;  %v1665_v34 = vcombine.high %v1459_v8, %v1463_v2 }
  0xc2   : > { %v1648_v53 = vcombine.low %v1457_v31, %v1461_v58  ;;  %v1649_v7 = vcombine.high %v1457_v31, %v1461_v58  ;;  %2221 = vrot.lane.b32.xlu1 %v2220_v48, %s2293_s27 }
  0xc3   : > { %v1672_v4 = vrot.slane %v1664_v26, %v2385_v18  ;;  %v1679_v43 = vrot.slane %v1665_v34, %v2385_v18  ;;  %v3194_v26 = vcombine.low %v2576_v42, %v2579_v44 }
  0xc4   : > { %v1656_v37 = vrot.slane %v1648_v53, %v2385_v18  ;;  %v1663_v56 = vrot.slane %v1649_v7, %v2385_v18  ;;  %v2127_v30 = vpop.permute.xlu1 %2126 }
  0xc5   : > { %v2122_v32 = vpop.permute.xlu0 %2121  ;;  %v2128_v58 = vunpack.i.l.bf16 %v2127_v30  ;;  %v2129_v53 = vunpack.i.h.bf16 %v2127_v30 }
  0xc6   : > { %v1712_v25 = vcombine.low %v1656_v37, %v1672_v4  ;;  %v1713_v40 = vcombine.high %v1656_v37, %v1672_v4  ;;  %v1728_v62 = vcombine.low %v1663_v56, %v1679_v43  ;;  %v1729_v49 = vcombine.high %v1663_v56, %v1679_v43 }
  0xc7   : > { %v2124_v18 = vunpack.i.h.bf16 %v2122_v32  ;;  %v2123_v8 = vunpack.i.l.bf16 %v2122_v32  ;;  %v1610_v43 = vcombine.low %v3013_v15, %v3022_v36 }
  0xc8   : > { %v3042_v31 = vrot.slane %v1712_v25, %v2420_v35  ;;  %v1727_v52 = vrot.slane %v1713_v40, %v2420_v35  ;;  %v3046_v51 = vrot.slane %v1728_v62, %v2420_v35  ;;  %v3049_v29 = vrot.slane %v1729_v49, %v2420_v35  ;;  %v2137_v56 = vpop.permute.xlu1 %2136 }
  0xc9   : > { %v2132_v33 = vpop.permute.xlu0 %2131  ;;  %v584_v35 = vsel %vm582_vm1, %v518_v59, %v2124_v18  ;;  %v583_v34 = vsel %vm582_vm1, %v3194_v26, %v2123_v8  ;;  %v2139_v32 = vunpack.i.h.bf16 %v2137_v56  ;;  %v2138_v25 = vunpack.i.l.bf16 %v2137_v56 }
  0xca   : > { %v1744_v55 = vcombine.low %v3036_v38, %v3042_v31  ;;  %v1745_v21 = vcombine.high %v3036_v38, %v3042_v31  ;;  %v1748_v2 = vcombine.low %v3039_v47, %v3046_v51  ;;  %v1746_v48 = vcombine.low %v1695_v57, %v1727_v52 }
  0xcb   : > { %v1750_v1 = vcombine.low %v3053_v10, %v3049_v29  ;;  %v2134_v4 = vunpack.i.h.bf16 %v2132_v33  ;;  %v2133_v42 = vunpack.i.l.bf16 %v2132_v33  ;;  %v586_v37 = vsel %vm585_vm2, %v583_v34, %v2128_v58 }
  0xcc   : > { %v2225_v7 = vpack.i.bf16 %v1745_v21, %v1609_v24  ;;  %v2240_v28 = vpack.i.bf16 %v1748_v2, %v1612_v3  ;;  %v1747_v11 = vcombine.high %v1695_v57, %v1727_v52  ;;  %v587_v19 = vsel %vm585_vm2, %v584_v35, %v2129_v53 }
  0xcd   : > { %v2142_v46 = vpop.permute.xlu0 %2141  ;;  %v2230_v40 = vpack.i.bf16 %v1746_v48, %v1610_v43  ;;  %v2250_v62 = vpack.i.bf16 %v1750_v1, %v1614_v45  ;;  %v589_v49 = vsel %vm588_vm3, %v586_v37, %v2133_v42  ;;  %v590_v18 = vsel %vm588_vm3, %v587_v19, %v2134_v4  ;;  %v2172_v19 = vpop.permute.xlu1 %2171 }
  0xce   : > { %2226 = vrot.lane.b32.xlu1 %v2225_v7, %s2287_s21  ;;  %2241 = vrot.lane.b32.xlu0 %v2240_v28, %s2290_s24  ;;  %v2144_v44 = vunpack.i.h.bf16 %v2142_v46  ;;  %v2143_v59 = vunpack.i.l.bf16 %v2142_v46  ;;  %v1611_v8 = vcombine.high %v3013_v15, %v3022_v36  ;;  %v592_v24 = vsel %vm591_vm4, %v589_v49, %v2138_v25 }
  0xcf   : > { %v593_v3 = vsel %vm591_vm4, %v590_v18, %v2139_v32  ;;  %v1749_v15 = vcombine.high %v3039_v47, %v3046_v51  ;;  %v1613_v36 = vcombine.high %v3016_v54, %v3030_v61  ;;  %v2296_v53 = vmov 0.0  }
  0xd0   : > { %v595_v33 = vsel %vm594_vm5, %v592_v24, %v2143_v59  ;;  %v596_v21 = vsel %vm594_vm5, %v593_v3, %v2144_v44  ;;  %v2235_v2 = vpack.i.bf16 %v1747_v11, %v1611_v8  ;;  %2068 = vmatprep.mubr.msk.f32.mxu0 %vm2295_vm8, %v2296_v53  ;;  %v1751_v47 = vcombine.high %v3053_v10, %v3049_v29 }
  0xd1   : > { %v2147_v30 = vpop.permute.xlu0 %2146  ;;  %v2245_v7 = vpack.i.bf16 %v1749_v15, %v1613_v36  ;;  %v1615_v28 = vcombine.high %v3019_v5, %v3033_v22  ;;  %v2174_v32 = vunpack.i.h.bf16 %v2172_v19  ;;  %v2173_v25 = vunpack.i.l.bf16 %v2172_v19 }
  0xd2   : > { %2231 = vrot.lane.b32.xlu1 %v2230_v40, %s2288_s22  ;;  %2251 = vrot.lane.b32.xlu0 %v2250_v62, %s2292_s26  ;;  %v2149_v52 = vunpack.i.h.bf16 %v2147_v30  ;;  %v2148_v57 = vunpack.i.l.bf16 %v2147_v30 }
  0xd3   : > { %v2255_v1 = vpack.i.bf16 %v1751_v47, %v1615_v28 }
  0xd4   : > { %v598_v48 = vsel %vm597_vm6, %v595_v33, %v2148_v57  ;;  %v599_v35 = vsel %vm597_vm6, %v596_v21, %v2149_v52 }
  0xd5   : > { %v2152_v58 = vpop.permute.xlu0 %2151 }
  0xd6   : > { %2236 = vrot.lane.b32.xlu1 %v2235_v2, %s2289_s23  ;;  %v2154_v26 = vunpack.i.h.bf16 %v2152_v58  ;;  %v2153_v34 = vunpack.i.l.bf16 %v2152_v58 }
  0xd8   : > { %v601_v51 = vsel %vm600_vm7, %v598_v48, %v2153_v34  ;;  %v602_v54 = vsel %vm600_vm7, %v599_v35, %v2154_v26 }
  0xd9   : > { %v2072_v61 = vpack.c.bf16 %v602_v54, %v601_v51  ;;  %v2157_v4 = vpop.permute.xlu0 %2156 }
  0xda   : > { %2246 = vrot.lane.b32.xlu1 %v2245_v7, %s2291_s25  ;;  %v2159_v29 = vunpack.i.h.bf16 %v2157_v4  ;;  %v2158_v10 = vunpack.i.l.bf16 %v2157_v4 }
  0xdb   : > { %2073 = vmatpush3.bf16.msra.mxu0 %v2072_v61 }
  0xdc   : > { %2074 = vmatprep.subr.bf16.mxu0 %v2294_v12  ;;  %v1419_v59 = vsel %vm582_vm1, %v1354_v6, %v2159_v29  ;;  %v1418_v5 = vsel %vm582_vm1, %v1218_v20, %v2158_v10 }
  0xdd   : > { %v2162_v43 = vpop.permute.xlu0 %2161 }
  0xde   : > { %2256 = vrot.lane.b32.xlu1 %v2255_v1, %s2293_s27  ;;  %v2164_v46 = vunpack.i.h.bf16 %v2162_v43  ;;  %v2163_v42 = vunpack.i.l.bf16 %v2162_v43 }
  0xe0   : > { %v1420_v56 = vsel %vm585_vm2, %v1418_v5, %v2163_v42  ;;  %v1421_v11 = vsel %vm585_vm2, %v1419_v59, %v2164_v46 }
  0xe1   : > { %v2167_v45 = vpop.permute.xlu0 %2166 }
  0xe2   : > { %v2169_v22 = vunpack.i.h.bf16 %v2167_v45  ;;  %v2168_v37 = vunpack.i.l.bf16 %v2167_v45 }
  0xe4   : > { %v1422_v62 = vsel %vm588_vm3, %v1420_v56, %v2168_v37  ;;  %v1423_v16 = vsel %vm588_vm3, %v1421_v11, %v2169_v22 }
  0xe5   : > { %v2177_v44 = vpop.permute.xlu0 %2176  ;;  %v1424_v60 = vsel %vm591_vm4, %v1422_v62, %v2173_v25  ;;  %v1425_v0 = vsel %vm591_vm4, %v1423_v16, %v2174_v32 }
  0xe6   : > { %v2179_v17 = vunpack.i.h.bf16 %v2177_v44  ;;  %v2178_v6 = vunpack.i.l.bf16 %v2177_v44 }
  0xe8   : > { %v1426_v30 = vsel %vm594_vm5, %v1424_v60, %v2178_v6  ;;  %v1427_v24 = vsel %vm594_vm5, %v1425_v0, %v2179_v17 }
  0xe9   : > { %v2182_v40 = vpop.permute.xlu0 %2181 }
  0xea   : > { %v2184_v20 = vunpack.i.h.bf16 %v2182_v40  ;;  %v2183_v49 = vunpack.i.l.bf16 %v2182_v40 }
  0xec   : > { %v1428_v3 = vsel %vm597_vm6, %v1426_v30, %v2183_v49  ;;  %v1429_v52 = vsel %vm597_vm6, %v1427_v24, %v2184_v20 }
 0x120   : > { %v2187_v18 = vpop.permute.xlu1 %2186  ;;  %v2202_v8 = vpop.permute.xlu0 %2201 }
 0x121   : > { %v2189_v35 = vunpack.i.h.bf16 %v2187_v18  ;;  %v2188_v26 = vunpack.i.l.bf16 %v2187_v18  ;;  %v2204_v46 = vunpack.i.h.bf16 %v2202_v8  ;;  %v2203_v9 = vunpack.i.l.bf16 %v2202_v8 }
 0x123   : > { %v996_v54 = vsel %vm582_vm1, %v931_v41, %v2189_v35  ;;  %v995_v61 = vsel %vm582_vm1, %v795_v50, %v2188_v26 }
 0x124   : > { %v2192_v57 = vpop.permute.xlu1 %2191  ;;  %v2207_v33 = vpop.permute.xlu0 %2206 }
 0x125   : > { %v2209_v21 = vunpack.i.h.bf16 %v2207_v33  ;;  %v2208_v2 = vunpack.i.l.bf16 %v2207_v33  ;;  %v2194_v34 = vunpack.i.h.bf16 %v2192_v57  ;;  %v2193_v53 = vunpack.i.l.bf16 %v2192_v57 }
 0x127   : > { %v1430_v15 = vsel %vm600_vm7, %v1428_v3, %v2208_v2  ;;  %v1431_v36 = vsel %vm600_vm7, %v1429_v52, %v2209_v21  ;;  %v997_v28 = vsel %vm585_vm2, %v995_v61, %v2193_v53  ;;  %v998_v1 = vsel %vm585_vm2, %v996_v54, %v2194_v34 }
 0x128   : > { %v2197_v58 = vpop.permute.xlu1 %2196  ;;  %v2078_v48 = vpack.c.bf16 %v1431_v36, %v1430_v15 }
 0x129   : > { %v2199_v47 = vunpack.i.h.bf16 %v2197_v58  ;;  %v2198_v51 = vunpack.i.l.bf16 %v2197_v58 }
 0x12b   : > { %v999_v43 = vsel %vm588_vm3, %v997_v28, %v2198_v51  ;;  %v1000_v45 = vsel %vm588_vm3, %v998_v1, %v2199_v47 }
 0x12c   : > { %v2212_v7 = vpop.permute.xlu1 %2211  ;;  %v1001_v42 = vsel %vm591_vm4, %v999_v43, %v2203_v9  ;;  %v1002_v63 = vsel %vm591_vm4, %v1000_v45, %v2204_v46 }
 0x12d   : > { %v2214_v29 = vunpack.i.h.bf16 %v2212_v7  ;;  %v2213_v10 = vunpack.i.l.bf16 %v2212_v7  ;;  %v1822_v7 = vld [vmem:[%s3191_s1] sm:$0xff] }
 0x12f   : > { %v1003_v50 = vsel %vm594_vm5, %v1001_v42, %v2213_v10  ;;  %v1004_v44 = vsel %vm594_vm5, %v1002_v63, %v2214_v29 }
 0x130   : > { %v2217_v4 = vpop.permute.xlu1 %2216 }
 0x131   : > { %v2219_v13 = vunpack.i.h.bf16 %v2217_v4  ;;  %v2218_v41 = vunpack.i.l.bf16 %v2217_v4 }
 0x133   : > { %v1005_v22 = vsel %vm597_vm6, %v1003_v50, %v2218_v41  ;;  %v1006_v37 = vsel %vm597_vm6, %v1004_v44, %v2219_v13 }
 0x134   : > { %v2222_v23 = vpop.permute.xlu1 %2221 }
 0x135   : > { %v2224_v59 = vunpack.i.h.bf16 %v2222_v23  ;;  %v2223_v5 = vunpack.i.l.bf16 %v2222_v23 }
 0x137   : > { %v1007_v56 = vsel %vm600_vm7, %v1005_v22, %v2223_v5  ;;  %v1008_v11 = vsel %vm600_vm7, %v1006_v37, %v2224_v59 }
 0x138   : > { %v2075_v19 = vpack.c.bf16 %v1008_v11, %v1007_v56 }
 0x13a   : > { %2076 = vmatpush3.bf16.msra.mxu0 %v2075_v19 }
 0x13b   : > { %2077 = vmatprep.subr.bf16.mxu0 %v2294_v12 }
 0x13e   : > { %2079 = vmatpush3.bf16.msra.mxu0 %v2078_v48 }
 0x13f   : > { %2080 = vmatprep.subr.bf16.mxu0 %v2294_v12 }
 0x140   : > { %v2227_v32 = vpop.permute.xlu1 %2226  ;;  %v2242_v6 = vpop.permute.xlu0 %2241 }
 0x141   : > { %v2229_v40 = vunpack.i.h.bf16 %v2227_v32  ;;  %v2228_v62 = vunpack.i.l.bf16 %v2227_v32  ;;  %v2244_v3 = vunpack.i.h.bf16 %v2242_v6  ;;  %v2243_v52 = vunpack.i.l.bf16 %v2242_v6 }
 0x143   : > { %v1809_v0 = vsel %vm582_vm1, %v1744_v55, %v2229_v40  ;;  %v1808_v20 = vsel %vm582_vm1, %v1608_v27, %v2228_v62 }
 0x144   : > { %v2232_v25 = vpop.permute.xlu1 %2231  ;;  %v2252_v31 = vpop.permute.xlu0 %2251 }
 0x145   : > { %v2234_v16 = vunpack.i.h.bf16 %v2232_v25  ;;  %v2233_v17 = vunpack.i.l.bf16 %v2232_v25  ;;  %v2254_v21 = vunpack.i.h.bf16 %v2252_v31  ;;  %v2253_v2 = vunpack.i.l.bf16 %v2252_v31 }
 0x147   : > { %v1810_v12 = vsel %vm585_vm2, %v1808_v20, %v2233_v17  ;;  %v1811_v8 = vsel %vm585_vm2, %v1809_v0, %v2234_v16 }
 0x148   : > { %v2237_v60 = vpop.permute.xlu1 %2236 }
 0x149   : > { %v2239_v49 = vunpack.i.h.bf16 %v2237_v60  ;;  %v2238_v18 = vunpack.i.l.bf16 %v2237_v60 }
 0x14b   : > { %v1812_v30 = vsel %vm588_vm3, %v1810_v12, %v2238_v18  ;;  %v1813_v24 = vsel %vm588_vm3, %v1811_v8, %v2239_v49 }
 0x14c   : > { %v2247_v38 = vpop.permute.xlu1 %2246  ;;  %v1814_v39 = vsel %vm591_vm4, %v1812_v30, %v2243_v52  ;;  %v1815_v14 = vsel %vm591_vm4, %v1813_v24, %v2244_v3 }
 0x14d   : > { %v2249_v55 = vunpack.i.h.bf16 %v2247_v38  ;;  %v2248_v57 = vunpack.i.l.bf16 %v2247_v38 }
 0x14f   : > { %v1816_v27 = vsel %vm594_vm5, %v1814_v39, %v2248_v57  ;;  %v1817_v33 = vsel %vm594_vm5, %v1815_v14, %v2249_v55 }
 0x150   : > { %v2257_v15 = vpop.permute.xlu1 %2256  ;;  %v1818_v48 = vsel %vm597_vm6, %v1816_v27, %v2253_v2  ;;  %v1819_v35 = vsel %vm597_vm6, %v1817_v33, %v2254_v21 }
 0x151   : > { %v2259_v36 = vunpack.i.h.bf16 %v2257_v15  ;;  %v2258_v58 = vunpack.i.l.bf16 %v2257_v15 }
 0x153   : > { %v1820_v26 = vsel %vm600_vm7, %v1818_v48, %v2258_v58  ;;  %v1821_v34 = vsel %vm600_vm7, %v1819_v35, %v2259_v36 }
 0x154   : > { %v2081_v53 = vpack.c.bf16 %v1821_v34, %v1820_v26 }
 0x156   : > { %2082 = vmatpush3.bf16.msra.mxu0 %v2081_v53 }
 0x159   : > { %2069 = vmatmul.mubr.msk.f32.vlgmr.msra.gmra.mrb[0].mxu0 %vm1823_vm9, %v1822_v7 }
 0x22c   : > { %v1893_v47 = vpop.f32.mrb[0].mxu0 }
 0x22d   : > { %1897 = vst.msk [vmem:[%s214_s6] sm:$0xff] %vm1823_vm9, %v1893_v47  ;;  %v2070_v51 = vpop.f32.mrb[1].mxu0  ;;  %v1898_v54 = vsel %vm1823_vm9, %v1893_v47, 0.0  ;;  %v1901_v61 = vmul.f32 %v1893_v47, %v1893_v47 }
 0x22e   : > { %1899 = vadd.xlane.f32.xlu0 %v1898_v54 }
 0x22f   : > { %v1902_v28 = vsel %vm1823_vm9, %v1901_v61, 0.0 }
 0x230   : > { %1903 = vadd.xlane.f32.xlu1 %v1902_v28 }
 0x2bb   : > { %v1900_v1 = vpop.xlane.xlu0 %1899 }
 0x2bd   : > { %v1904_v4 = vpop.xlane.xlu1 %1903 }
 0x2be   : > { %v1906_v43 = vsel %vm1905_vm10, %v1900_v1, %v1904_v4 }
 0x2bf   : > { %1908 = vst.msk [vmem:[%s221_s9] sm:$0xff] %vm1907_vm11, %v1906_v43 }
 0x2c0 PF: > { %s14_s14 = sadd.s32 1, %s2282_s14   ;;  %s3195_s12 = smov %s2278_s13 }
 0x2c1   : > { %p11_p5 = scmp.ge.s32.totalorder %s14_s14, 4   ;;  %s3196_s13 = smov %s3198_s15 }
 0x2c3   :  { %13 = sbr.rel (!%p11_p5) target bundleno = 2 (0x2), region = 70 }

// kernel: encoder_block.4
= control target key start
LH: loop header
LB: loop body
LE: loop exit
PB: predicated region body
PF: predicated region fallthrough
CT: control target
= control target key end

     0   :  { %s3171_s18 = smov 0   ;;  %s3173_s19 = smov 0   ;;  %s4411_s0 = inlined_call_operand.vmem [shape: f32[2,8,8,8], index: 0, kind: input, shape index: {}]   ;;  %s4412_s1 = inlined_call_operand.vmem [shape: f32[8,1], index: 1, kind: input, shape index: {}]   ;;  %s4413_s2 = inlined_call_operand.vmem [shape: f32[8,1], index: 2, kind: input, shape index: {}]   ;;  %s4414_s3 = inlined_call_operand.vmem [shape: f32[8,72], index: 3, kind: input, shape index: {}]   ;;  %s4415_s4 = inlined_call_operand.vmem [shape: f32[2,8,64], index: 4, kind: output, shape index: {0}]   ;;  %s4416_s5 = inlined_call_operand.vmem [shape: f32[2,1,8,2], index: 5, kind: output, shape index: {1}]  }
   0x1   :  { %s3175_s20 = smov 0  }
   0x2 LB: > { %s28_s21 = sadd.s32 1, %s3117_s19  ;;  %p2845_p0 = scmp.ge.s32.totalorder %s3121_s20, 1  ;;  %s3121_s20 = sphi %s3175_s20, %s16_s20   ;;  %s3117_s19 = sphi %s3173_s19, %s4460_s19   ;;  %s3113_s18 = sphi %s3171_s18, %s4459_s18  }
   0x3   : > { %p30_p1 = scmp.ge.s32.totalorder %s28_s21, 2  ;;  %p206_p2 = scmp.lt.s32.totalorder %s3121_s20, 3 }
   0x5   : > { %s4462_s21 = smov (%p30_p1, %s28_s21), 0  ;;  %p207_p3 = pnand %p2845_p0, %p206_p2 }
   0x7   : > { %210 = sbr.rel (%p207_p3) target bundleno = 1072 (0x430), region = 36 }
   0xe   : > { %v368_v0 = vlaneseq  ;;  %v3123_v1 = vmov 0   ;;  %v3124_v2 = vmov 1966171168   ;;  %v362_v4 = vld [vmem:[%s4412_s1] sm:$0xff]  ;;  %p243_p4 = scmp.lt.s32.totalorder %s3113_s18, 1  ;;  %vm345_vm0 = vcmask 1040384  }
   0xf   : > { %2955 = vset.pattern.permute.xlu0 %v3123_v1  ;;  %v366_v3 = vunpack.c.l.s4 %v3124_v2  ;;  %2956 = vset.pattern.permute.xlu1 %v3123_v1  ;;  %v364_v7 = vcombine.high %v362_v4, %v362_v4  ;;  %v493_v8 = vld [vmem:[%s4413_s2] sm:$0xff]  ;;  %s3125_s30 = smov 127   ;;  %s3126_s6 = smov 1  }
  0x10   : > { %v3192_v5 = vshrl.u32 %v368_v0, 7  ;;  %s4464_s18 = smov (!%p243_p4, %s3113_s18), 1  ;;  %v495_v34 = vcombine.high %v493_v8, %v493_v8  ;;  %s3127_s7 = smov 3  }
  0x11   : > { %v367_v6 = vunpack.c.0.s8 %v366_v3  ;;  %s2869_s26 = sshll.u32 %s4464_s18, 6  ;;  %s3128_s8 = smov 126  }
  0x12   : > { %v3202_v11 = vsub.s32 0, %v3192_v5  ;;  %s3216_s29 = scalar_lea.vmem %s4411_s0, %s2869_s26  ;;  %s3131_s9 = smov 16  }
  0x13   : > { %v3198_v9 = vsub.s32 %v367_v6, %v3192_v5  ;;  %v3222_v25 = vld [vmem:[%s3216_s29 + $0x10] sm:$0xff]  ;;  %v3245_v46 = vld [vmem:[%s3216_s29 + $0x18] sm:$0xff]  ;;  %s3132_s10 = smov 8   ;;  %s3133_s11 = smov 32  }
  0x14   : > { %v2860_v28 = vld [vmem:[%s3216_s29 + $0x16] sm:$0x1]  ;;  %v307_v31 = vrot.slane %v3222_v25, 7  ;;  %v2861_v47 = vld [vmem:[%s3216_s29 + $0x1e] sm:$0x1]  ;;  %v308_v48 = vrot.slane %v3245_v46, 7 }
  0x15   : > { %v371_v10 = vrot.slane %v362_v4, %v3198_v9  ;;  %v378_v12 = vrot.slane %v364_v7, %v3198_v9  ;;  %v502_v13 = vrot.slane %v493_v8, %v3198_v9  ;;  %v331_v35 = vrot.slane %v2860_v28, 7  ;;  %v3238_v39 = vld [vmem:[%s3216_s29 + $0x30] sm:$0xff]  ;;  %v271_v57 = vld [vmem:[%s3216_s29 + $0x38] sm:$0xff]  ;;  %s3134_s12 = smov 24   ;;  %s3135_s13 = smov 40  }
  0x16   : > { %v2864_v40 = vld [vmem:[%s3216_s29 + $0x36] sm:$0x1]  ;;  %v311_v41 = vrot.slane %v3238_v39, 7  ;;  %v509_v44 = vrot.slane %v495_v34, %v3198_v9  ;;  %v332_v49 = vrot.slane %v2861_v47, 7  ;;  %v2865_v58 = vld [vmem:[%s3216_s29 + $0x3e] sm:$0x1] }
  0x17   : > { %v387_v14 = vrot.slane %v371_v10, %v3198_v9  ;;  %v379_v15 = vcombine.high %v371_v10, %v371_v10  ;;  %v394_v16 = vrot.slane %v378_v12, %v3198_v9  ;;  %v380_v17 = vcombine.high %v378_v12, %v378_v12  ;;  %v2857_v63 = vld [vmem:[%s3216_s29 + $0x39] sm:$0x1]  ;;  %v269_v34 = vld [vmem:[%s3216_s29 + $0x28] sm:$0xff]  ;;  %s3137_s14 = smov 48   ;;  %s3138_s15 = smov 56  }
  0x18   : > { %v510_v21 = vcombine.high %v502_v13, %v502_v13  ;;  %v518_v37 = vrot.slane %v502_v13, %v3198_v9  ;;  %v3235_v38 = vsel %vm345_vm0, %v307_v31, %v331_v35  ;;  %v335_v45 = vrot.slane %v2864_v40, 7  ;;  %v2854_v40 = vld [vmem:[%s3216_s29 + $0x21] sm:$0x1]  ;;  %s2848_s22 = sshll.u32 %s4464_s18, 3 }
  0x19   : > { %v416_v18 = vrot.slane %v387_v14, %v3202_v11  ;;  %v409_v19 = vcombine.high %v387_v14, %v387_v14  ;;  %v408_v20 = vrot.slane %v380_v17, %v3198_v9  ;;  %v432_v23 = vrot.slane %v394_v16, %v3202_v11  ;;  %s254_s25 = scalar_lea.vmem %s4415_s4, %s2848_s22  ;;  %s261_s28 = scalar_lea.vmem %s4416_s5, %s2848_s22 }
  0x1a   : > { %v401_v24 = vrot.slane %v379_v15, %v3198_v9  ;;  %v532_v27 = vrot.slane %v510_v21, %v3198_v9  ;;  %v410_v30 = vcombine.high %v394_v16, %v394_v16  ;;  %v547_v50 = vrot.slane %v518_v37, %v3202_v11  ;;  %v2851_v16 = vld [vmem:[%s3216_s29 + $0x9] sm:$0x1] }
  0x1b   : > { %446 = vperm.xlu0 %2955, %v416_v18   ;;  %v424_v22 = vrot.slane %v409_v19, %v3202_v11  ;;  %v436_v26 = vrot.slane %v408_v20, %v3202_v11  ;;  %v412_v43 = vcombine.high %v408_v20, %v408_v20  ;;  %v540_v51 = vcombine.high %v518_v37, %v518_v37  ;;  %v264_v18 = vld [vmem:[%s3216_s29] sm:$0xff] }
  0x1c   : > { %v420_v29 = vrot.slane %v401_v24, %v3202_v11  ;;  %v551_v32 = vrot.slane %v532_v27, %v3202_v11  ;;  %v411_v33 = vcombine.high %v401_v24, %v401_v24  ;;  %v440_v36 = vrot.slane %v410_v30, %v3202_v11 }
  0x1d   : > { %454 = vperm.xlu1 %2956, %v424_v22   ;;  %v3253_v52 = vsel %vm345_vm0, %v311_v41, %v335_v45  ;;  %v3258_v53 = vsel %vm345_vm0, %v308_v48, %v332_v49  ;;  %v444_v54 = vrot.slane %v412_v43, %v3202_v11  ;;  %v542_v55 = vcombine.high %v532_v27, %v532_v27  ;;  %v2850_v22 = vld [vmem:[%s3216_s29 + $0x1] sm:$0x1]  ;;  %v2855_v45 = vld [vmem:[%s3216_s29 + $0x29] sm:$0x1] }
  0x1e   : > { %v428_v42 = vrot.slane %v411_v33, %v3202_v11  ;;  %v511_v56 = vcombine.high %v509_v44, %v509_v44  ;;  %v312_v59 = vrot.slane %v271_v57, 7  ;;  %v336_v60 = vrot.slane %v2865_v58, 7 }
  0x1f   : > { %462 = vperm.xlu0 %2955, %v432_v23   ;;  %v555_v61 = vrot.slane %v540_v51, %v3202_v11  ;;  %v525_v62 = vrot.slane %v509_v44, %v3198_v9  ;;  %v559_v2 = vrot.slane %v542_v55, %v3202_v11  ;;  %v305_v20 = vrot.slane %v264_v18, 7  ;;  %v2863_v18 = vld [vmem:[%s3216_s29 + $0x2e] sm:$0x1] }
  0x20   : > { %v3267_v0 = vsel %vm345_vm0, %v2857_v63, %v312_v59  ;;  %v3270_v1 = vsel %vm345_vm0, %v312_v59, %v336_v60  ;;  %v539_v3 = vrot.slane %v511_v56, %v3198_v9  ;;  %v3279_v9 = vld [vmem:[%s3216_s29 + $0x8] sm:$0xff]  ;;  %v310_v43 = vrot.slane %v269_v34, 7  ;;  %v2858_v63 = vld [vmem:[%s3216_s29 + $0x6] sm:$0x1] }
  0x21   : > { %466 = vperm.xlu1 %2956, %v436_v26   ;;  %v563_v4 = vrot.slane %v525_v62, %v3202_v11  ;;  %v541_v6 = vcombine.high %v525_v62, %v525_v62  ;;  %v306_v15 = vrot.slane %v3279_v9, 7  ;;  %v346_v27 = vsel %vm345_vm0, %v2850_v22, %v305_v20 }
  0x22   : > { %v567_v7 = vrot.slane %v539_v3, %v3202_v11  ;;  %v543_v8 = vcombine.high %v539_v3, %v539_v3  ;;  %v2859_v3 = vld [vmem:[%s3216_s29 + $0xe] sm:$0x1] }
  0x23   : > { %450 = vperm.xlu0 %2955, %v420_v29   ;;  %v571_v10 = vrot.slane %v541_v6, %v3202_v11  ;;  %v268_v29 = vld [vmem:[%s3216_s29 + $0x20] sm:$0xff]  ;;  %v329_v6 = vrot.slane %v2858_v63, 7 }
  0x24   : > { %v575_v12 = vrot.slane %v543_v8, %v3202_v11  ;;  %v347_v11 = vsel %vm345_vm0, %v2851_v16, %v306_v15  ;;  %v2862_v8 = vld [vmem:[%s3216_s29 + $0x26] sm:$0x1] }
  0x25   : > { %581 = vperm.xlu1 %2956, %v551_v32   ;;  %v333_v16 = vrot.slane %v2862_v8, 7 }
  0x27   : > { %470 = vperm.xlu0 %2955, %v440_v36   ;;  %v309_v36 = vrot.slane %v268_v29, 7 }
  0x29   : > { %458 = vperm.xlu1 %2956, %v428_v42   ;;  %v350_v49 = vsel %vm345_vm0, %v2854_v40, %v309_v36  ;;  %v2852_v40 = vld [vmem:[%s3216_s29 + $0x11] sm:$0x1] }
  0x2b   : > { %577 = vperm.xlu0 %2955, %v547_v50  }
  0x2d   : > { %474 = vperm.xlu1 %2956, %v444_v54   ;;  %v351_v54 = vsel %vm345_vm0, %v2855_v45, %v310_v43  ;;  %v2856_v45 = vld [vmem:[%s3216_s29 + $0x31] sm:$0x1] }
  0x2f   : > { %585 = vperm.xlu0 %2955, %v555_v61  }
  0x31   : > { %589 = vperm.xlu1 %2956, %v559_v2  }
  0x33   : > { %593 = vperm.xlu0 %2955, %v563_v4  }
  0x35   : > { %597 = vperm.xlu1 %2956, %v567_v7  }
  0x37   : > { %601 = vperm.xlu0 %2955, %v571_v10   ;;  %v330_v10 = vrot.slane %v2859_v3, 7 }
  0x39   : > { %605 = vperm.xlu1 %2956, %v575_v12   ;;  %v354_v12 = vsel %vm345_vm0, %v305_v20, %v329_v6 }
  0x9a   : > { %v3281_v13 = vpop.permute.xlu0 %446 }
  0x9b   : > { %v477_v33 = vmul.f32 %v3281_v13, %v346_v27  ;;  %v478_v22 = vmul.f32 %v3281_v13, %v354_v12 }
  0x9c   : > { %v3283_v14 = vpop.permute.xlu1 %454 }
  0x9d   : > { %v482_v3 = vmul.f32 %v3283_v14, %v3235_v38 }
  0x9e   : > { %v3287_v17 = vpop.permute.xlu0 %462 }
  0x9f   : > { %v485_v56 = vmul.f32 %v3287_v17, %v350_v49 }
  0xa0   : > { %v3290_v19 = vpop.permute.xlu1 %466 }
  0xa1   : > { %v487_v58 = vmul.f32 %v3290_v19, %v351_v54 }
  0xa2   : > { %v451_v21 = vpop.permute.xlu0 %450 }
  0xa3   : > { %v479_v23 = vmul.f32 %v451_v21, %v347_v11  ;;  %v355_v11 = vsel %vm345_vm0, %v306_v15, %v330_v10 }
  0xa4   : > { %v3296_v24 = vpop.permute.xlu1 %581  ;;  %v480_v27 = vmul.f32 %v451_v21, %v355_v11 }
  0xa5   : > { %v610_v26 = vadd.f32 %v3296_v24, %v479_v23  ;;  %v334_v23 = vrot.slane %v2863_v18, 7 }
  0xa6   : > { %v3300_v28 = vpop.permute.xlu0 %470  ;;  %v611_v20 = vadd.f32 %v3296_v24, %v480_v27 }
  0xa7   : > { %vm626_vm1 = vcmp.ge.f32.partialorder %v610_v26, 0.0  ;;  %v642_v30 = vmul.f32 0.2, %v610_v26  ;;  %v359_v15 = vsel %vm345_vm0, %v310_v43, %v334_v23  ;;  %v2853_v43 = vld [vmem:[%s3216_s29 + $0x19] sm:$0x1] }
  0xa8   : > { %v3303_v32 = vpop.permute.xlu1 %458  ;;  %v643_v34 = vmul.f32 0.2, %v611_v20  ;;  %vm627_vm6 = vcmp.ge.f32.partialorder %v611_v20, 0.0  ;;  %v349_v49 = vsel %vm345_vm0, %v2853_v43, %v308_v48 }
  0xa9   : > { %v658_v35 = vsel %vm626_vm1, %v610_v26, %v642_v30  ;;  %v358_v26 = vsel %vm345_vm0, %v309_v36, %v333_v16  ;;  %v484_v6 = vmul.f32 %v3303_v32, %v3258_v53  ;;  %vm832_vm1 = vcmask 7168  }
  0xaa   : > { %v578_v37 = vpop.permute.xlu0 %577  ;;  %692 = vrot.lane.b32.xlu1 %v658_v35, %s3125_s30  ;;  %v486_v9 = vmul.f32 %v3287_v17, %v358_v26  ;;  %v659_v24 = vsel %vm627_vm6, %v611_v20, %v643_v34  ;;  %vm1030_vm6 = vcmask 64512  }
  0xab   : > { %v608_v42 = vadd.f32 %v578_v37, %v477_v33  ;;  %v609_v29 = vadd.f32 %v578_v37, %v478_v22  ;;  %v488_v33 = vmul.f32 %v3290_v19, %v359_v15 }
  0xac   : > { %v3309_v44 = vpop.permute.xlu1 %474 }
  0xad   : > { %vm624_vm2 = vcmp.ge.f32.partialorder %v608_v42, 0.0  ;;  %v640_v47 = vmul.f32 0.2, %v608_v42  ;;  %v641_v13 = vmul.f32 0.2, %v609_v29  ;;  %vm625_vm5 = vcmp.ge.f32.partialorder %v609_v29, 0.0 }
  0xae   : > { %v3313_v50 = vpop.permute.xlu0 %585  ;;  %v492_v38 = vmul.f32 %v3309_v44, %v3270_v1 }
  0xaf   : > { %v656_v51 = vsel %vm624_vm2, %v608_v42, %v640_v47  ;;  %v657_v36 = vsel %vm625_vm5, %v609_v29, %v641_v13  ;;  %v348_v42 = vsel %vm345_vm0, %v2852_v40, %v307_v31  ;;  %v483_v31 = vmul.f32 %v3303_v32, %v349_v49 }
  0xb0   : > { %v3316_v55 = vpop.permute.xlu1 %589  ;;  %688 = vrot.lane.b32.xlu0 %v656_v51, %s3125_s30  ;;  %v481_v47 = vmul.f32 %v3283_v14, %v348_v42  ;;  %vm849_vm2 = vcmask 72704   ;;  %vm3139_vm5 = vmmov 0  }
  0xb1   : > { %v615_v8 = vadd.f32 %v3316_v55, %v484_v6 }
  0xb2   : > { %v594_v57 = vpop.permute.xlu0 %593  ;;  %v612_v25 = vadd.f32 %v3313_v50, %v481_v47 }
  0xb3   : > { %v616_v59 = vadd.f32 %v594_v57, %v485_v56  ;;  %v617_v30 = vadd.f32 %v594_v57, %v486_v9  ;;  %v614_v57 = vadd.f32 %v3316_v55, %v483_v31  ;;  %vm631_vm14 = vcmp.ge.f32.partialorder %v615_v8, 0.0 }
  0xb4   : > { %v598_v60 = vpop.permute.xlu1 %597  ;;  %v644_v39 = vmul.f32 0.2, %v612_v25  ;;  %vm628_vm9 = vcmp.ge.f32.partialorder %v612_v25, 0.0 }
  0xb5   : > { %v618_v61 = vadd.f32 %v598_v60, %v487_v58  ;;  %vm632_vm3 = vcmp.ge.f32.partialorder %v616_v59, 0.0  ;;  %v648_v62 = vmul.f32 0.2, %v616_v59  ;;  %v619_v21 = vadd.f32 %v598_v60, %v488_v33 }
  0xb6   : > { %v649_v17 = vmul.f32 0.2, %v617_v30  ;;  %vm633_vm7 = vcmp.ge.f32.partialorder %v617_v30, 0.0  ;;  %v602_v54 = vpop.permute.xlu0 %601  ;;  %v660_v60 = vsel %vm628_vm9, %v612_v25, %v644_v39  ;;  %vm630_vm10 = vcmp.ge.f32.partialorder %v614_v57, 0.0 }
  0xb7   : > { %v664_v2 = vsel %vm632_vm3, %v616_v59, %v648_v62  ;;  %vm634_vm4 = vcmp.ge.f32.partialorder %v618_v61, 0.0  ;;  %v650_v4 = vmul.f32 0.2, %v618_v61  ;;  %vm635_vm8 = vcmp.ge.f32.partialorder %v619_v21, 0.0 }
  0xb8   : > { %704 = vrot.lane.b32.xlu0 %v664_v2, %s3125_s30  ;;  %v665_v19 = vsel %vm633_vm7, %v617_v30, %v649_v17  ;;  %v606_v58 = vpop.permute.xlu1 %605  ;;  %v646_v59 = vmul.f32 0.2, %v614_v57  ;;  %vm1450_vm3 = vcmask 1046528   ;;  %vm1032_vm7 = vcmask 130048  }
  0xb9   : > { %v666_v7 = vsel %vm634_vm4, %v618_v61, %v650_v4  ;;  %v613_v4 = vadd.f32 %v3313_v50, %v482_v3  ;;  %v623_v14 = vadd.f32 %v606_v58, %v492_v38  ;;  %v647_v50 = vmul.f32 0.2, %v615_v8 }
  0xba   : > { %708 = vrot.lane.b32.xlu1 %v666_v7, %s3125_s30  ;;  %v662_v62 = vsel %vm630_vm10, %v614_v57, %v646_v59  ;;  %v3130_v59 = vmov 1934713408   ;;  %vm2044_vm4 = vcmask 1045504   ;;  %vm1036_vm9 = vcmask 261120  }
  0xbb   : > { %v645_v12 = vmul.f32 0.2, %v613_v4  ;;  %vm629_vm13 = vcmp.ge.f32.partialorder %v613_v4, 0.0  ;;  %vm1038_vm10 = vcmask 326656  }
  0xbc   : > { %736 = vrot.lane.b32.xlu0 %v656_v51, %s3126_s6 }
  0xbd   : > { %v661_v53 = vsel %vm629_vm13, %v613_v4, %v645_v12  ;;  %vm2639_vm13 = vcmask 588800  }
  0xbe   : > { %740 = vrot.lane.b32.xlu1 %v658_v35, %s3126_s6 }
  0xc0   : > { %752 = vrot.lane.b32.xlu0 %v664_v2, %s3126_s6 }
  0xc2   : > { %756 = vrot.lane.b32.xlu1 %v666_v7, %s3126_s6 }
  0xc4   : > { %784 = vrot.lane.b32.xlu0 %v656_v51, %s3127_s7  ;;  %v352_v51 = vsel %vm345_vm0, %v2856_v45, %v311_v41  ;;  %v491_v41 = vmul.f32 %v3309_v44, %v3267_v0  ;;  %vm639_vm0 = vcmp.ge.f32.partialorder %v623_v14, 0.0 }
  0xc5   : > { %v489_v56 = vmul.f32 %v3300_v28, %v352_v51 }
  0xc6   : > { %788 = vrot.lane.b32.xlu1 %v658_v35, %s3127_s7  ;;  %v651_v35 = vmul.f32 0.2, %v619_v21  ;;  %v622_v48 = vadd.f32 %v606_v58, %v491_v41  ;;  %v3129_v41 = vmov 1983009808  }
  0xc7   : > { %v620_v46 = vadd.f32 %v602_v54, %v489_v56 }
  0xc8   : > { %800 = vrot.lane.b32.xlu0 %v664_v2, %s3127_s7  ;;  %v667_v37 = vsel %vm635_vm8, %v619_v21, %v651_v35  ;;  %v654_v63 = vmul.f32 0.2, %v622_v48  ;;  %vm638_vm12 = vcmp.ge.f32.partialorder %v622_v48, 0.0  ;;  %vm1034_vm8 = vcmask 195584  }
  0xc9   : > { %v652_v61 = vmul.f32 0.2, %v620_v46  ;;  %vm636_vm11 = vcmp.ge.f32.partialorder %v620_v46, 0.0 }
  0xca   : > { %804 = vrot.lane.b32.xlu1 %v666_v7, %s3127_s7  ;;  %v670_v0 = vsel %vm638_vm12, %v622_v48, %v654_v63  ;;  %v490_v7 = vmul.f32 %v3300_v28, %v3253_v52  ;;  %v663_v52 = vsel %vm631_vm14, %v615_v8, %v647_v50  ;;  %v655_v28 = vmul.f32 0.2, %v623_v14 }
  0xcb   : > { %v668_v2 = vsel %vm636_vm11, %v620_v46, %v652_v61  ;;  %v869_v48 = vunpack.c.l.s4 %v3129_v41  ;;  %vm1040_vm11 = vcmask 392192   ;;  %vm1042_vm12 = vcmask 457728  }
  0xcc   : > { %690 = vrot.lane.b32.xlu0 %v657_v36, %s3125_s30  ;;  %v621_v10 = vadd.f32 %v602_v54, %v490_v7  ;;  %v671_v1 = vsel %vm639_vm0, %v623_v14, %v655_v28  ;;  %vm2713_vm14 = vcmask 523264  }
  0xcd   : > { %v870_v63 = vunpack.c.0.s8 %v869_v48 }
  0xce   : > { %694 = vrot.lane.b32.xlu1 %v659_v24, %s3125_s30  ;;  %v653_v32 = vmul.f32 0.2, %v621_v10  ;;  %vm637_vm15 = vcmp.ge.f32.partialorder %v621_v10, 0.0 }
  0xcf   : > { %v3464_v12 = vsub.s32 %v870_v63, %v3192_v5 }
  0xd0   : > { %706 = vrot.lane.b32.xlu0 %v665_v19, %s3125_s30  ;;  %v669_v55 = vsel %vm637_vm15, %v621_v10, %v653_v32  ;;  %vm2723_vm15 = vcmask 15360  }
  0xd2   : > { %710 = vrot.lane.b32.xlu1 %v667_v37, %s3125_s30 }
  0xd4   : > { %738 = vrot.lane.b32.xlu0 %v657_v36, %s3126_s6 }
  0xd6   : > { %742 = vrot.lane.b32.xlu1 %v659_v24, %s3126_s6 }
  0xd8   : > { %754 = vrot.lane.b32.xlu0 %v665_v19, %s3126_s6 }
  0xda   : > { %758 = vrot.lane.b32.xlu1 %v667_v37, %s3126_s6 }
  0xdc   : > { %786 = vrot.lane.b32.xlu0 %v657_v36, %s3127_s7 }
  0xde   : > { %790 = vrot.lane.b32.xlu1 %v659_v24, %s3127_s7 }
  0xe0   : > { %802 = vrot.lane.b32.xlu0 %v665_v19, %s3127_s7 }
  0xe2   : > { %806 = vrot.lane.b32.xlu1 %v667_v37, %s3127_s7 }
  0xe4   : > { %696 = vrot.lane.b32.xlu0 %v660_v60, %s3125_s30 }
  0xe6   : > { %700 = vrot.lane.b32.xlu1 %v662_v62, %s3125_s30 }
  0xe8   : > { %712 = vrot.lane.b32.xlu0 %v668_v2, %s3125_s30 }
  0xea   : > { %716 = vrot.lane.b32.xlu1 %v670_v0, %s3125_s30 }
  0xec   : > { %744 = vrot.lane.b32.xlu0 %v660_v60, %s3126_s6 }
  0xee   : > { %748 = vrot.lane.b32.xlu1 %v662_v62, %s3126_s6 }
  0xf0   : > { %760 = vrot.lane.b32.xlu0 %v668_v2, %s3126_s6 }
  0xf2   : > { %764 = vrot.lane.b32.xlu1 %v670_v0, %s3126_s6 }
  0xf4   : > { %792 = vrot.lane.b32.xlu0 %v660_v60, %s3127_s7  ;;  %v933_v60 = vunpack.c.l.s4 %v3130_v59 }
  0xf6   : > { %796 = vrot.lane.b32.xlu1 %v662_v62, %s3127_s7 }
  0xf8   : > { %808 = vrot.lane.b32.xlu0 %v668_v2, %s3127_s7  ;;  %v934_v2 = vunpack.c.0.s8 %v933_v60 }
  0xfa   : > { %812 = vrot.lane.b32.xlu1 %v670_v0, %s3127_s7  ;;  %v3467_v38 = vsub.s32 %v934_v2, %v3192_v5 }
  0xfc   : > { %698 = vrot.lane.b32.xlu0 %v661_v53, %s3125_s30 }
  0xfe   : > { %702 = vrot.lane.b32.xlu1 %v663_v52, %s3125_s30 }
 0x100   : > { %714 = vrot.lane.b32.xlu0 %v669_v55, %s3125_s30 }
 0x102   : > { %718 = vrot.lane.b32.xlu1 %v671_v1, %s3125_s30 }
 0x104   : > { %746 = vrot.lane.b32.xlu0 %v661_v53, %s3126_s6 }
 0x106   : > { %750 = vrot.lane.b32.xlu1 %v663_v52, %s3126_s6 }
 0x108   : > { %762 = vrot.lane.b32.xlu0 %v669_v55, %s3126_s6 }
 0x10a   : > { %766 = vrot.lane.b32.xlu1 %v671_v1, %s3126_s6 }
 0x10c   : > { %794 = vrot.lane.b32.xlu0 %v661_v53, %s3127_s7 }
 0x10e   : > { %798 = vrot.lane.b32.xlu1 %v663_v52, %s3127_s7 }
 0x110   : > { %810 = vrot.lane.b32.xlu0 %v669_v55, %s3127_s7 }
 0x112   : > { %814 = vrot.lane.b32.xlu1 %v671_v1, %s3127_s7 }
 0x11c   : > { %v693_v16 = vpop.permute.xlu1 %692 }
 0x122   : > { %v689_v44 = vpop.permute.xlu0 %688 }
 0x12a   : > { %v705_v18 = vpop.permute.xlu0 %704 }
 0x12c   : > { %v709_v11 = vpop.permute.xlu1 %708 }
 0x12e   : > { %v737_v22 = vpop.permute.xlu0 %736 }
 0x12f   : > { %v833_v29 = vsel %vm832_vm1, %v689_v44, %v737_v22 }
 0x130   : > { %v741_v23 = vpop.permute.xlu1 %740 }
 0x131   : > { %v835_v20 = vsel %vm832_vm1, %v693_v16, %v741_v23 }
 0x132   : > { %v753_v26 = vpop.permute.xlu0 %752 }
 0x133   : > { %v841_v13 = vsel %vm832_vm1, %v705_v18, %v753_v26 }
 0x134   : > { %v757_v27 = vpop.permute.xlu1 %756 }
 0x135   : > { %v843_v36 = vsel %vm832_vm1, %v709_v11, %v757_v27 }
 0x136   : > { %v785_v9 = vpop.permute.xlu0 %784 }
 0x137   : > { %v3412_v15 = vsel %vm849_vm2, %v833_v29, %v785_v9 }
 0x138   : > { %1052 = vrot.lane.b32.xlu0 %v3412_v15, %s3125_s30  ;;  %v789_v30 = vpop.permute.xlu1 %788  ;;  %v1451_v1 = vrot.slane %v3412_v15, 1 }
 0x139   : > { %v3419_v33 = vsel %vm849_vm2, %v835_v20, %v789_v30 }
 0x13a   : > { %v801_v21 = vpop.permute.xlu0 %800  ;;  %1054 = vrot.lane.b32.xlu1 %v3419_v33, %s3125_s30  ;;  %v1454_v44 = vrot.slane %v3419_v33, 1 }
 0x13b   : > { %v3424_v34 = vsel %vm849_vm2, %v841_v13, %v801_v21 }
 0x13c   : > { %1060 = vrot.lane.b32.xlu0 %v3424_v34, %s3125_s30  ;;  %v805_v17 = vpop.permute.xlu1 %804 }
 0x13d   : > { %v3430_v24 = vsel %vm849_vm2, %v843_v36, %v805_v17 }
 0x13e   : > { %v691_v35 = vpop.permute.xlu0 %690  ;;  %1062 = vrot.lane.b32.xlu1 %v3430_v24, %s3125_s30 }
 0x140   : > { %1247 = vrot.lane.b32.xlu0 %v3412_v15, %s3128_s8  ;;  %v695_v19 = vpop.permute.xlu1 %694 }
 0x142   : > { %v707_v37 = vpop.permute.xlu0 %706  ;;  %1249 = vrot.lane.b32.xlu1 %v3419_v33, %s3128_s8 }
 0x144   : > { %1255 = vrot.lane.b32.xlu0 %v3424_v34, %s3128_s8  ;;  %v3440_v40 = vpop.permute.xlu1 %710 }
 0x146   : > { %v739_v42 = vpop.permute.xlu0 %738  ;;  %1257 = vrot.lane.b32.xlu1 %v3430_v24, %s3128_s8 }
 0x147   : > { %v834_v16 = vsel %vm832_vm1, %v691_v35, %v739_v42 }
 0x148   : > { %v743_v43 = vpop.permute.xlu1 %742 }
 0x149   : > { %v836_v26 = vsel %vm832_vm1, %v695_v19, %v743_v43 }
 0x14a   : > { %v755_v45 = vpop.permute.xlu0 %754 }
 0x14b   : > { %v842_v30 = vsel %vm832_vm1, %v707_v37, %v755_v45 }
 0x14c   : > { %v3444_v47 = vpop.permute.xlu1 %758 }
 0x14e   : > { %v787_v49 = vpop.permute.xlu0 %786 }
 0x14f   : > { %v3504_v13 = vsel %vm849_vm2, %v834_v16, %v787_v49 }
 0x150   : > { %v3446_v51 = vpop.permute.xlu1 %790  ;;  %v2046_v16 = vrot.slane %v3504_v13, 2 }
 0x152   : > { %v3448_v25 = vpop.permute.xlu0 %802 }
 0x154   : > { %v3450_v31 = vpop.permute.xlu1 %806 }
 0x156   : > { %v697_v54 = vpop.permute.xlu0 %696 }
 0x158   : > { %v701_v56 = vpop.permute.xlu1 %700 }
 0x15a   : > { %v713_v57 = vpop.permute.xlu0 %712 }
 0x15c   : > { %v717_v46 = vpop.permute.xlu1 %716 }
 0x15e   : > { %v745_v58 = vpop.permute.xlu0 %744 }
 0x15f   : > { %v837_v0 = vsel %vm832_vm1, %v697_v54, %v745_v58 }
 0x160   : > { %v749_v39 = vpop.permute.xlu1 %748 }
 0x161   : > { %v839_v8 = vsel %vm832_vm1, %v701_v56, %v749_v39  ;;  %v1452_v56 = vrot.slane %v3504_v13, 1  ;;  %v1463_v39 = vrot.slane %v3424_v34, 1 }
 0x162   : > { %v761_v61 = vpop.permute.xlu0 %760 }
 0x163   : > { %v845_v14 = vsel %vm832_vm1, %v713_v57, %v761_v61  ;;  %v853_v57 = vsel %vm849_vm2, %v836_v26, %v3446_v51  ;;  %v844_v61 = vsel %vm832_vm1, %v3440_v40, %v3444_v47 }
 0x164   : > { %v765_v62 = vpop.permute.xlu1 %764 }
 0x165   : > { %v847_v18 = vsel %vm832_vm1, %v717_v46, %v765_v62  ;;  %v859_v46 = vsel %vm849_vm2, %v842_v30, %v3448_v25 }
 0x166   : > { %v793_v3 = vpop.permute.xlu0 %792 }
 0x167   : > { %v3454_v4 = vsel %vm849_vm2, %v837_v0, %v793_v3  ;;  %v1455_v3 = vrot.slane %v853_v57, 1 }
 0x168   : > { %v866_v6 = vcombine.low %v3412_v15, %v3454_v4  ;;  %v867_v7 = vcombine.high %v3412_v15, %v3454_v4  ;;  %1056 = vrot.lane.b32.xlu0 %v3454_v4, %s3125_s30  ;;  %v797_v10 = vpop.permute.xlu1 %796 }
 0x169   : > { %v3471_v50 = vsel %vm849_vm2, %v839_v8, %v797_v10  ;;  %v3559_v8 = vsel %vm1450_vm3, %v1451_v1, %v1452_v56 }
 0x16a   : > { %v809_v53 = vpop.permute.xlu0 %808  ;;  %v882_v32 = vcombine.low %v3419_v33, %v3471_v50  ;;  %v883_v52 = vcombine.high %v3419_v33, %v3471_v50  ;;  %1058 = vrot.lane.b32.xlu1 %v3471_v50, %s3125_s30  ;;  %v874_v27 = vrot.slane %v866_v6, %v3464_v12  ;;  %v881_v29 = vrot.slane %v867_v7, %v3464_v12 }
 0x16b   : > { %v3480_v28 = vsel %vm849_vm2, %v845_v14, %v809_v53  ;;  %v1464_v6 = vrot.slane %v859_v46, 1  ;;  %v861_v14 = vsel %vm849_vm2, %v844_v61, %v3450_v31  ;;  %v1460_v56 = vrot.slane %v3471_v50, 1 }
 0x16c   : > { %v898_v5 = vcombine.low %v3424_v34, %v3480_v28  ;;  %v899_v55 = vcombine.high %v3424_v34, %v3480_v28  ;;  %1064 = vrot.lane.b32.xlu0 %v3480_v28, %s3125_s30  ;;  %v890_v11 = vrot.slane %v882_v32, %v3464_v12  ;;  %v897_v22 = vrot.slane %v883_v52, %v3464_v12  ;;  %v813_v23 = vpop.permute.xlu1 %812 }
 0x16d   : > { %v3498_v9 = vsel %vm849_vm2, %v847_v18, %v813_v23  ;;  %v2049_v18 = vrot.slane %v853_v57, 2  ;;  %v1467_v26 = vrot.slane %v861_v14, 1  ;;  %v3595_v13 = vsel %vm1450_vm3, %v1463_v39, %v1464_v6 }
 0x16e   : > { %v3500_v20 = vpop.permute.xlu0 %698  ;;  %v914_v21 = vcombine.low %v3430_v24, %v3498_v9  ;;  %v915_v36 = vcombine.high %v3430_v24, %v3498_v9  ;;  %1066 = vrot.lane.b32.xlu1 %v3498_v9, %s3125_s30  ;;  %v931_v17 = vcombine.high %v874_v27, %v890_v11  ;;  %v930_v35 = vcombine.low %v874_v27, %v890_v11 }
 0x16f   : > { %v946_v19 = vcombine.low %v881_v29, %v897_v22  ;;  %v947_v42 = vcombine.high %v881_v29, %v897_v22  ;;  %v906_v37 = vrot.slane %v898_v5, %v3464_v12  ;;  %v913_v43 = vrot.slane %v899_v55, %v3464_v12 }
 0x170   : > { %1251 = vrot.lane.b32.xlu0 %v3454_v4, %s3128_s8  ;;  %v922_v45 = vrot.slane %v914_v21, %v3464_v12  ;;  %v929_v49 = vrot.slane %v915_v36, %v3464_v12  ;;  %v3518_v54 = vpop.permute.xlu1 %702  ;;  %v3536_v51 = vrot.slane %v931_v17, %v3467_v38  ;;  %v3539_v25 = vrot.slane %v930_v35, %v3467_v38 }
 0x171   : > { %v3542_v62 = vrot.slane %v946_v19, %v3467_v38  ;;  %v3562_v10 = vrot.slane %v947_v42, %v3467_v38  ;;  %v2058_v11 = vrot.slane %v859_v46, 2  ;;  %v2061_v27 = vrot.slane %v861_v14, 2 }
 0x172   : > { %v3525_v58 = vpop.permute.xlu0 %714  ;;  %1253 = vrot.lane.b32.xlu1 %v3471_v50, %s3128_s8  ;;  %v963_v41 = vcombine.high %v906_v37, %v922_v45  ;;  %v962_v48 = vcombine.low %v906_v37, %v922_v45  ;;  %v978_v59 = vcombine.low %v913_v43, %v929_v49  ;;  %v979_v60 = vcombine.high %v913_v43, %v929_v49 }
 0x173   : > { %v3590_v29 = vsel %vm1450_vm3, %v1454_v44, %v1455_v3  ;;  %v2045_v21 = vrot.slane %v3412_v15, 2  ;;  %v2048_v36 = vrot.slane %v3419_v33, 2  ;;  %v2057_v17 = vrot.slane %v3424_v34, 2 }
 0x174   : > { %1259 = vrot.lane.b32.xlu0 %v3480_v28, %s3128_s8  ;;  %v3544_v63 = vpop.permute.xlu1 %718  ;;  %v3547_v2 = vrot.slane %v963_v41, %v3467_v38  ;;  %v3550_v0 = vrot.slane %v962_v48, %v3467_v38  ;;  %v3553_v40 = vrot.slane %v978_v59, %v3467_v38  ;;  %v3556_v47 = vrot.slane %v979_v60, %v3467_v38 }
 0x175   : > { %v1466_v44 = vrot.slane %v3430_v24, 1  ;;  %v2060_v35 = vrot.slane %v3430_v24, 2  ;;  %v3605_v42 = vsel %vm2044_vm4, %v2045_v21, %v2046_v16  ;;  %v3608_v37 = vsel %vm2044_vm4, %v2048_v36, %v2049_v18 }
 0x176   : > { %v747_v7 = vpop.permute.xlu0 %746  ;;  %1261 = vrot.lane.b32.xlu1 %v3498_v9, %s3128_s8  ;;  %v996_v53 = vcombine.low %v3536_v51, %v3547_v2  ;;  %v995_v32 = vcombine.high %v3539_v25, %v3550_v0  ;;  %v3611_v15 = vsel %vm2044_vm4, %v2057_v17, %v2058_v11  ;;  %v1457_v24 = vrot.slane %v3454_v4, 1 }
 0x177   : > { %v838_v33 = vsel %vm832_vm1, %v3500_v20, %v747_v7  ;;  %v3616_v34 = vsel %vm1450_vm3, %v1466_v44, %v1467_v26  ;;  %v3619_v45 = vsel %vm2044_vm4, %v2060_v35, %v2061_v27  ;;  %v1469_v57 = vrot.slane %v3480_v28, 1 }
 0x178   : > { %1654 = vrot.lane.b32.xlu0 %v3559_v8, %s3125_s30  ;;  %v751_v22 = vpop.permute.xlu1 %750  ;;  %v2051_v20 = vrot.slane %v3454_v4, 2  ;;  %v2054_v41 = vrot.slane %v3471_v50, 2  ;;  %v2063_v48 = vrot.slane %v3480_v28, 2  ;;  %v1472_v3 = vrot.slane %v3498_v9, 1 }
 0x179   : > { %v840_v59 = vsel %vm832_vm1, %v3518_v54, %v751_v22  ;;  %v2066_v4 = vrot.slane %v3498_v9, 2 }
 0x17a   : > { %v763_v30 = vpop.permute.xlu0 %762  ;;  %1656 = vrot.lane.b32.xlu1 %v3590_v29, %s3125_s30 }
 0x17b   : > { %v846_v60 = vsel %vm832_vm1, %v3525_v58, %v763_v30 }
 0x17c   : > { %1662 = vrot.lane.b32.xlu0 %v3595_v13, %s3125_s30  ;;  %v767_v19 = vpop.permute.xlu1 %766 }
 0x17d   : > { %v848_v6 = vsel %vm832_vm1, %v3544_v63, %v767_v19 }
 0x17e   : > { %v795_v43 = vpop.permute.xlu0 %794  ;;  %1664 = vrot.lane.b32.xlu1 %v3616_v34, %s3125_s30 }
 0x17f   : > { %v855_v49 = vsel %vm849_vm2, %v838_v33, %v795_v43 }
 0x180   : > { %v1458_v46 = vrot.slane %v855_v49, 1  ;;  %v2052_v39 = vrot.slane %v855_v49, 2  ;;  %1849 = vrot.lane.b32.xlu0 %v3559_v8, %s3128_s8  ;;  %v799_v61 = vpop.permute.xlu1 %798 }
 0x181   : > { %v857_v7 = vsel %vm849_vm2, %v840_v59, %v799_v61 }
 0x182   : > { %v811_v14 = vpop.permute.xlu0 %810  ;;  %v3642_v50 = vsel %vm1450_vm3, %v1457_v24, %v1458_v46  ;;  %v3645_v28 = vsel %vm2044_vm4, %v2051_v20, %v2052_v39  ;;  %v1461_v54 = vrot.slane %v857_v7, 1  ;;  %v2055_v16 = vrot.slane %v857_v7, 2  ;;  %1851 = vrot.lane.b32.xlu1 %v3590_v29, %s3128_s8 }
 0x183   : > { %v863_v58 = vsel %vm849_vm2, %v846_v60, %v811_v14  ;;  %v1483_v9 = vcombine.low %v3559_v8, %v3642_v50  ;;  %v1484_v11 = vcombine.high %v3559_v8, %v3642_v50  ;;  %v2077_v22 = vcombine.low %v3605_v42, %v3645_v28 }
 0x184   : > { %v1470_v63 = vrot.slane %v863_v58, 1  ;;  %v2064_v18 = vrot.slane %v863_v58, 2  ;;  %1857 = vrot.lane.b32.xlu0 %v3595_v13, %s3128_s8  ;;  %v815_v26 = vpop.permute.xlu1 %814  ;;  %v3660_v30 = vsel %vm1450_vm3, %v1460_v56, %v1461_v54  ;;  %v2078_v21 = vcombine.high %v3605_v42, %v3645_v28 }
 0x185   : > { %v1491_v27 = vrot.slane %v1483_v9, %v3464_v12  ;;  %v3665_v36 = vsel %vm2044_vm4, %v2054_v41, %v2055_v16  ;;  %v865_v17 = vsel %vm849_vm2, %v848_v6, %v815_v26  ;;  %v1498_v44 = vrot.slane %v1484_v11, %v3464_v12 }
 0x186   : > { %v1499_v8 = vcombine.low %v3590_v29, %v3660_v30  ;;  %v1500_v35 = vcombine.high %v3590_v29, %v3660_v30  ;;  %v1473_v19 = vrot.slane %v865_v17, 1  ;;  %v2067_v33 = vrot.slane %v865_v17, 2  ;;  %1859 = vrot.lane.b32.xlu1 %v3616_v34, %s3128_s8 }
 0x187   : > { %v3676_v43 = vsel %vm1450_vm3, %v1469_v57, %v1470_v63  ;;  %v3679_v24 = vrot.slane %v2077_v22, %v3464_v12  ;;  %v3693_v57 = vrot.slane %v2078_v21, %v3464_v12  ;;  %v2093_v39 = vcombine.low %v3608_v37, %v3665_v36 }
 0x188   : > { %2248 = vrot.lane.b32.xlu0 %v3605_v42, %s3125_s30  ;;  %v1507_v49 = vrot.slane %v1499_v8, %v3464_v12  ;;  %v1514_v56 = vrot.slane %v1500_v35, %v3464_v12  ;;  %v1515_v29 = vcombine.low %v3595_v13, %v3676_v43  ;;  %v1516_v20 = vcombine.high %v3595_v13, %v3676_v43 }
 0x189   : > { %v3690_v46 = vsel %vm1450_vm3, %v1472_v3, %v1473_v19  ;;  %v2094_v41 = vcombine.high %v3608_v37, %v3665_v36  ;;  %v2101_v54 = vrot.slane %v2093_v39, %v3464_v12  ;;  %v3712_v58 = vsel %vm2044_vm4, %v2063_v48, %v2064_v18 }
 0x18a   : > { %v1547_v59 = vcombine.low %v1491_v27, %v1507_v49  ;;  %v1548_v60 = vcombine.high %v1491_v27, %v1507_v49  ;;  %v1563_v61 = vcombine.low %v1498_v44, %v1514_v56  ;;  %v1564_v6 = vcombine.high %v1498_v44, %v1514_v56  ;;  %2250 = vrot.lane.b32.xlu1 %v3608_v37, %s3125_s30 }
 0x18b   : > { %v1523_v13 = vrot.slane %v1515_v29, %v3464_v12  ;;  %v1530_v3 = vrot.slane %v1516_v20, %v3464_v12  ;;  %v1531_v7 = vcombine.low %v3616_v34, %v3690_v46  ;;  %v1532_v14 = vcombine.high %v3616_v34, %v3690_v46 }
 0x18c   : > { %2256 = vrot.lane.b32.xlu0 %v3611_v15, %s3125_s30  ;;  %v2108_v16 = vrot.slane %v2094_v41, %v3464_v12  ;;  %v3715_v9 = vsel %vm2044_vm4, %v2066_v4, %v2067_v33  ;;  %v2109_v34 = vcombine.low %v3611_v15, %v3712_v58  ;;  %v2110_v22 = vcombine.high %v3611_v15, %v3712_v58 }
 0x18d   : > { %v1539_v63 = vrot.slane %v1531_v7, %v3464_v12  ;;  %v1546_v11 = vrot.slane %v1532_v14, %v3464_v12  ;;  %v2141_v26 = vcombine.low %v3679_v24, %v2101_v54  ;;  %v2142_v27 = vcombine.high %v3679_v24, %v2101_v54 }
 0x18e   : > { %v2157_v48 = vcombine.low %v3693_v57, %v2108_v16  ;;  %v2158_v18 = vcombine.high %v3693_v57, %v2108_v16  ;;  %2258 = vrot.lane.b32.xlu1 %v3619_v45, %s3125_s30  ;;  %v2117_v8 = vrot.slane %v2109_v34, %v3464_v12  ;;  %v2124_v35 = vrot.slane %v2110_v22, %v3464_v12 }
 0x18f   : > { %v1579_v4 = vcombine.low %v1523_v13, %v1539_v63  ;;  %v1580_v21 = vcombine.high %v1523_v13, %v1539_v63  ;;  %v1595_v17 = vcombine.low %v1530_v3, %v1546_v11  ;;  %v1596_v44 = vcombine.high %v1530_v3, %v1546_v11 }
 0x190   : > { %2443 = vrot.lane.b32.xlu0 %v3605_v42, %s3128_s8  ;;  %v2125_v19 = vcombine.low %v3619_v45, %v3715_v9  ;;  %v2126_v33 = vcombine.high %v3619_v45, %v3715_v9  ;;  %v3738_v24 = vrot.slane %v1547_v59, %v3467_v38  ;;  %v3744_v56 = vrot.slane %v1548_v60, %v3467_v38 }
 0x191   : > { %v3741_v49 = vrot.slane %v1579_v4, %v3467_v38  ;;  %v3747_v42 = vrot.slane %v1580_v21, %v3467_v38  ;;  %v3752_v57 = vrot.slane %v1563_v61, %v3467_v38  ;;  %v3755_v39 = vrot.slane %v1595_v17, %v3467_v38 }
 0x192   : > { %v2133_v29 = vrot.slane %v2125_v19, %v3464_v12  ;;  %v2140_v20 = vrot.slane %v2126_v33, %v3464_v12  ;;  %2445 = vrot.lane.b32.xlu1 %v3608_v37, %s3128_s8  ;;  %v3766_v13 = vrot.slane %v1564_v6, %v3467_v38  ;;  %v3775_v16 = vrot.slane %v1596_v44, %v3467_v38 }
 0x193   : > { %v3778_v63 = vrot.slane %v2141_v26, %v3467_v38  ;;  %v3790_v34 = vrot.slane %v2157_v48, %v3467_v38 }
 0x194   : > { %2451 = vrot.lane.b32.xlu0 %v3611_v15, %s3128_s8  ;;  %v2173_v61 = vcombine.low %v2117_v8, %v2133_v29  ;;  %v2174_v3 = vcombine.high %v2117_v8, %v2133_v29  ;;  %v2189_v7 = vcombine.low %v2124_v35, %v2140_v20  ;;  %v2190_v14 = vcombine.high %v2124_v35, %v2140_v20 }
 0x195   : > { %v3784_v15 = vrot.slane %v2142_v27, %v3467_v38  ;;  %v3802_v27 = vrot.slane %v2158_v18, %v3467_v38 }
 0x196   : > { %v3781_v6 = vrot.slane %v2173_v61, %v3467_v38  ;;  %v3787_v11 = vrot.slane %v2174_v3, %v3467_v38  ;;  %2453 = vrot.lane.b32.xlu1 %v3619_v45, %s3128_s8  ;;  %v3799_v4 = vrot.slane %v2189_v7, %v3467_v38  ;;  %v3813_v17 = vrot.slane %v2190_v14, %v3467_v38 }
 0x198   : > { %1658 = vrot.lane.b32.xlu0 %v3642_v50, %s3125_s30  ;;  %4424 = vst [vmem:[#allocation2_spill] sm:$0xff] %v3813_v17 }
 0x19a   : > { %1660 = vrot.lane.b32.xlu1 %v3660_v30, %s3125_s30 }
 0x19c   : > { %1666 = vrot.lane.b32.xlu0 %v3676_v43, %s3125_s30 }
 0x19e   : > { %1668 = vrot.lane.b32.xlu1 %v3690_v46, %s3125_s30 }
 0x1a0   : > { %1853 = vrot.lane.b32.xlu0 %v3642_v50, %s3128_s8 }
 0x1a2   : > { %1855 = vrot.lane.b32.xlu1 %v3660_v30, %s3128_s8 }
 0x1a4   : > { %1861 = vrot.lane.b32.xlu0 %v3676_v43, %s3128_s8 }
 0x1a6   : > { %1863 = vrot.lane.b32.xlu1 %v3690_v46, %s3128_s8 }
 0x1a8   : > { %2252 = vrot.lane.b32.xlu0 %v3645_v28, %s3125_s30 }
 0x1aa   : > { %2254 = vrot.lane.b32.xlu1 %v3665_v36, %s3125_s30  ;;  %v1053_v50 = vpop.permute.xlu0 %1052 }
 0x1ac   : > { %2260 = vrot.lane.b32.xlu0 %v3712_v58, %s3125_s30  ;;  %v1055_v30 = vpop.permute.xlu1 %1054 }
 0x1ae   : > { %2262 = vrot.lane.b32.xlu1 %v3715_v9, %s3125_s30  ;;  %v1061_v43 = vpop.permute.xlu0 %1060 }
 0x1b0   : > { %2447 = vrot.lane.b32.xlu0 %v3645_v28, %s3128_s8  ;;  %v1063_v46 = vpop.permute.xlu1 %1062 }
 0x1b2   : > { %2449 = vrot.lane.b32.xlu1 %v3665_v36, %s3128_s8  ;;  %v3857_v29 = vpop.permute.xlu0 %1247 }
 0x1b4   : > { %2455 = vrot.lane.b32.xlu0 %v3712_v58, %s3128_s8  ;;  %v3859_v20 = vpop.permute.xlu1 %1249 }
 0x1b6   : > { %2457 = vrot.lane.b32.xlu1 %v3715_v9, %s3128_s8  ;;  %v3861_v61 = vpop.permute.xlu0 %1255 }
 0x1b8   : > { %v3863_v28 = vpop.permute.xlu1 %1257 }
 0x1da   : > { %v1057_v3 = vpop.permute.xlu0 %1056 }
 0x1db   : > { %v1076_v58 = vcombine.low %v1053_v50, %v1057_v3  ;;  %v1077_v18 = vcombine.high %v1053_v50, %v1057_v3 }
 0x1dc   : > { %v1059_v36 = vpop.permute.xlu1 %1058 }
 0x1dd   : > { %v1092_v7 = vcombine.low %v1055_v30, %v1059_v36  ;;  %v1093_v35 = vcombine.high %v1055_v30, %v1059_v36  ;;  %v1084_v44 = vrot.slane %v1076_v58, %v3464_v12  ;;  %v3877_v50 = vrot.slane %v1077_v18, %v3464_v12 }
 0x1de   : > { %v1065_v14 = vpop.permute.xlu0 %1064 }
 0x1df   : > { %v1108_v8 = vcombine.low %v1061_v43, %v1065_v14  ;;  %v1100_v9 = vrot.slane %v1092_v7, %v3464_v12  ;;  %v1109_v23 = vcombine.high %v1061_v43, %v1065_v14  ;;  %v3870_v48 = vrot.slane %v1093_v35, %v3464_v12 }
 0x1e0   : > { %v1067_v33 = vpop.permute.xlu1 %1066 }
 0x1e1   : > { %v1124_v21 = vcombine.low %v1063_v46, %v1067_v33  ;;  %v1125_v45 = vcombine.high %v1063_v46, %v1067_v33  ;;  %v1116_v26 = vrot.slane %v1108_v8, %v3464_v12  ;;  %v1140_v22 = vcombine.low %v1084_v44, %v1100_v9 }
 0x1e2   : > { %v3866_v19 = vpop.permute.xlu0 %1251  ;;  %v1123_v30 = vrot.slane %v1109_v23, %v3464_v12  ;;  %v1141_v46 = vcombine.high %v1084_v44, %v1100_v9  ;;  %v1156_v23 = vcombine.low %v3877_v50, %v3870_v48 }
 0x1e3   : > { %v1132_v36 = vrot.slane %v1124_v21, %v3464_v12  ;;  %v1139_v43 = vrot.slane %v1125_v45, %v3464_v12  ;;  %v1271_v3 = vcombine.low %v3857_v29, %v3866_v19  ;;  %v3886_v45 = vrot.slane %v1140_v22, %v3467_v38 }
 0x1e4   : > { %v1254_v7 = vpop.permute.xlu1 %1253  ;;  %v1155_v9 = vrot.slane %v1141_v46, %v3467_v38 }
 0x1e5   : > { %v1287_v33 = vcombine.low %v3859_v20, %v1254_v7  ;;  %v1172_v14 = vcombine.low %v1116_v26, %v1132_v36  ;;  %v1173_v8 = vcombine.high %v1116_v26, %v1132_v36  ;;  %v1188_v58 = vcombine.low %v1123_v30, %v1139_v43 }
 0x1e6   : > { %v1260_v35 = vpop.permute.xlu0 %1259  ;;  %v1279_v44 = vrot.slane %v1271_v3, %v3464_v12 }
 0x1e7   : > { %v1295_v21 = vrot.slane %v1287_v33, %v3464_v12  ;;  %v3889_v18 = vrot.slane %v1172_v14, %v3467_v38  ;;  %v1187_v37 = vrot.slane %v1173_v8, %v3467_v38  ;;  %v1303_v54 = vcombine.low %v3861_v61, %v1260_v35 }
 0x1e8   : > { %v1262_v1 = vpop.permute.xlu1 %1261  ;;  %v1196_v36 = vrot.slane %v1188_v58, %v3467_v38  ;;  %v1164_v14 = vrot.slane %v1156_v23, %v3467_v38 }
 0x1e9   : > { %4425 = vst [vmem:[#allocation3_spill] sm:$0xff] %v3889_v18  ;;  %v1319_v33 = vcombine.low %v3863_v28, %v1262_v1  ;;  %v1335_v60 = vcombine.low %v1279_v44, %v1295_v21  ;;  %v1311_v8 = vrot.slane %v1303_v54, %v3464_v12  ;;  %v1206_v3 = vcombine.low %v1155_v9, %v1187_v37 }
 0x1ea   : > { %v3894_v26 = vpop.permute.xlu0 %1654  ;;  %v1205_v46 = vcombine.high %v3886_v45, %v3889_v18  ;;  %v1320_v58 = vcombine.high %v3863_v28, %v1262_v1  ;;  %v1208_v5 = vcombine.low %v1164_v14, %v1196_v36  ;;  %v1189_v54 = vcombine.high %v1123_v30, %v1139_v43 }
 0x1eb   : > { %v1327_v55 = vrot.slane %v1319_v33, %v3464_v12  ;;  %v2962_v23 = vpack.i.bf16 %v1206_v3, %v996_v53  ;;  %v1288_v33 = vcombine.high %v3859_v20, %v1254_v7  ;;  %v1207_v17 = vcombine.high %v1155_v9, %v1187_v37 }
 0x1ec   : > { %v3904_v59 = vpop.permute.xlu1 %1656  ;;  %v2957_v52 = vpack.i.bf16 %v1205_v46, %v995_v32  ;;  %v1336_v18 = vcombine.high %v1279_v44, %v1295_v21  ;;  %v3919_v1 = vrot.slane %v1335_v60, %v3467_v38  ;;  %v1304_v28 = vcombine.high %v3861_v61, %v1260_v35 }
 0x1ed   : > { %v1367_v22 = vcombine.low %v1311_v8, %v1327_v55  ;;  %v1368_v41 = vcombine.high %v1311_v8, %v1327_v55  ;;  %2963 = vrot.lane.b32.xlu1 %v2962_v23, %s3131_s9  ;;  %v1157_v20 = vcombine.high %v3877_v50, %v3870_v48  ;;  %v1272_v32 = vcombine.high %v3857_v29, %v3866_v19 }
 0x1ee   : > { %v3909_v31 = vpop.permute.xlu0 %1662  ;;  %v1334_v37 = vrot.slane %v1320_v58, %v3464_v12  ;;  %2958 = vrot.lane.b32.xlu0 %v2957_v52, %s3132_s10  ;;  %v4427_v43 = vcombine.low %v3542_v62, %v3553_v40  ;;  %v1203_v19 = vrot.slane %v1189_v54, %v3467_v38  ;;  %v4428_v29 = vcombine.high %v3536_v51, %v3547_v2 }
 0x1ef   : > { %v3923_v55 = vrot.slane %v1367_v22, %v3467_v38  ;;  %v1382_v61 = vrot.slane %v1368_v41, %v3467_v38  ;;  %v1209_v50 = vcombine.high %v1164_v14, %v1196_v36  ;;  %v1302_v35 = vrot.slane %v1288_v33, %v3464_v12 }
 0x1f0   : > { %v3926_v53 = vpop.permute.xlu1 %1664  ;;  %v2972_v7 = vpack.i.bf16 %v1208_v5, %v4427_v43  ;;  %v2967_v52 = vpack.i.bf16 %v1207_v17, %v4428_v29  ;;  %v1350_v41 = vrot.slane %v1336_v18, %v3467_v38  ;;  %v1318_v21 = vrot.slane %v1304_v28, %v3464_v12 }
 0x1f1   : > { %4426 = vst [vmem:[#allocation4_spill] sm:$0xff] %v3923_v55  ;;  %v1400_v48 = vcombine.high %v3919_v1, %v3923_v55  ;;  %v4429_v44 = vcombine.high %v3738_v24, %v3741_v49  ;;  %v1171_v22 = vrot.slane %v1157_v20, %v3467_v38  ;;  %v1286_v2 = vrot.slane %v1272_v32, %v3464_v12 }
 0x1f2   : > { %v3934_v60 = vpop.permute.xlu0 %1849  ;;  %2973 = vrot.lane.b32.xlu1 %v2972_v7, %s3133_s11  ;;  %2968 = vrot.lane.b32.xlu0 %v2967_v52, %s3134_s12  ;;  %v1383_v17 = vcombine.low %v1318_v21, %v1334_v37  ;;  %v1401_v18 = vcombine.low %v1350_v41, %v1382_v61  ;;  %v4430_v36 = vcombine.high %v3542_v62, %v3553_v40  ;;  %v4420_v43 = vmov 0.0|0.0  }
 0x1f3   : > { %v2982_v9 = vpack.i.bf16 %v4429_v44, %v1400_v48  ;;  %v1210_v8 = vcombine.low %v1171_v22, %v1203_v19  ;;  %v1351_v3 = vcombine.low %v1286_v2, %v1302_v35  ;;  %v1384_v58 = vcombine.high %v1318_v21, %v1334_v37  ;;  %2901 = vmatprep.subr.bf16.mxu0 %v4420_v43 }
 0x1f4   : > { %v3952_v5 = vpop.permute.xlu1 %1851  ;;  %v2977_v14 = vpack.i.bf16 %v1209_v50, %v4430_v36  ;;  %v1391_v54 = vrot.slane %v1383_v17, %v3467_v38  ;;  %v4431_v33 = vcombine.low %v3744_v56, %v3747_v42  ;;  %v1402_v62 = vcombine.high %v1350_v41, %v1382_v61 }
 0x1f5   : > { %v4432_v40 = vcombine.low %v3562_v10, %v3556_v47  ;;  %v1211_v32 = vcombine.high %v1171_v22, %v1203_v19  ;;  %v1352_v37 = vcombine.high %v1286_v2, %v1302_v35  ;;  %v1359_v7 = vrot.slane %v1351_v3, %v3467_v38 }
 0x1f6   : > { %v3959_v51 = vpop.permute.xlu0 %1857  ;;  %2983 = vrot.lane.b32.xlu1 %v2982_v9, %s3132_s10  ;;  %2978 = vrot.lane.b32.xlu0 %v2977_v14, %s3135_s13  ;;  %v2992_v28 = vpack.i.bf16 %v4431_v33, %v1401_v18  ;;  %v1398_v61 = vrot.slane %v1384_v58, %v3467_v38  ;;  %v4433_v19 = vcombine.high %v3744_v56, %v3747_v42 }
 0x1f7   : > { %v2987_v20 = vpack.i.bf16 %v1210_v8, %v4432_v40  ;;  %v1404_v50 = vcombine.high %v1359_v7, %v1391_v54  ;;  %v4434_v35 = vcombine.high %v3562_v10, %v3556_v47  ;;  %v1403_v21 = vcombine.low %v1359_v7, %v1391_v54 }
 0x1f8   : > { %v3966_v46 = vpop.permute.xlu1 %1859  ;;  %v3002_v52 = vpack.i.bf16 %v4433_v19, %v1402_v62  ;;  %v1366_v44 = vrot.slane %v1352_v37, %v3467_v38  ;;  %v4435_v56 = vcombine.high %v3752_v57, %v3755_v39  ;;  %v4436_v47 = vcombine.low %v3752_v57, %v3755_v39 }
 0x1f9   : > { %v2997_v41 = vpack.i.bf16 %v1211_v32, %v4434_v35  ;;  %v4437_v36 = vcombine.low %v3766_v13, %v3775_v16  ;;  %v4438_v57 = vcombine.high %v3766_v13, %v3775_v16 }
 0x1fa   : > { %v3969_v23 = vpop.permute.xlu0 %2248  ;;  %2993 = vrot.lane.b32.xlu1 %v2992_v28, %s3131_s9  ;;  %2988 = vrot.lane.b32.xlu0 %v2987_v20, %s3137_s14  ;;  %v3012_v42 = vpack.i.bf16 %v4435_v56, %v1404_v50  ;;  %v1405_v2 = vcombine.low %v1366_v44, %v1398_v61  ;;  %v3007_v10 = vpack.i.bf16 %v4436_v47, %v1403_v21 }
 0x1fb   : > { %v1406_v8 = vcombine.high %v1366_v44, %v1398_v61 }
 0x1fc   : > { %v3981_v48 = vpop.permute.xlu1 %2250  ;;  %v3017_v14 = vpack.i.bf16 %v4437_v36, %v1405_v2 }
 0x1fd   : > { %v3022_v39 = vpack.i.bf16 %v4438_v57, %v1406_v8 }
 0x1fe   : > { %v3984_v29 = vpop.permute.xlu0 %2256  ;;  %3003 = vrot.lane.b32.xlu1 %v3002_v52, %s3134_s12  ;;  %2998 = vrot.lane.b32.xlu0 %v2997_v41, %s3138_s15 }
 0x200   : > { %v3995_v9 = vpop.permute.xlu1 %2258 }
 0x202   : > { %v3998_v22 = vpop.permute.xlu0 %2443  ;;  %3013 = vrot.lane.b32.xlu1 %v3012_v42, %s3135_s13  ;;  %3008 = vrot.lane.b32.xlu0 %v3007_v10, %s3133_s11 }
 0x204   : > { %v4007_v17 = vpop.permute.xlu1 %2445 }
 0x206   : > { %v4010_v18 = vpop.permute.xlu0 %2451  ;;  %3018 = vrot.lane.b32.xlu1 %v3017_v14, %s3137_s14 }
 0x208   : > { %v4016_v3 = vpop.permute.xlu1 %2453 }
 0x20a   : > { %v1659_v58 = vpop.permute.xlu0 %1658  ;;  %3023 = vrot.lane.b32.xlu1 %v3022_v39, %s3138_s15 }
 0x20b   : > { %v1678_v62 = vcombine.low %v3894_v26, %v1659_v58 }
 0x20c   : > { %v1661_v54 = vpop.permute.xlu1 %1660 }
 0x20d   : > { %v1694_v33 = vcombine.low %v3904_v59, %v1661_v54  ;;  %v1686_v7 = vrot.slane %v1678_v62, %v3464_v12  ;;  %v1695_v62 = vcombine.high %v3904_v59, %v1661_v54 }
 0x20e   : > { %v1667_v28 = vpop.permute.xlu0 %1666 }
 0x20f   : > { %v4025_v40 = vrot.slane %v1694_v33, %v3464_v12  ;;  %v1710_v20 = vcombine.low %v3909_v31, %v1667_v28 }
 0x210   : > { %v1669_v32 = vpop.permute.xlu1 %1668 }
 0x211   : > { %v1726_v13 = vcombine.low %v3926_v53, %v1669_v32  ;;  %v1742_v16 = vcombine.low %v1686_v7, %v4025_v40  ;;  %v4032_v61 = vrot.slane %v1710_v20, %v3464_v12  ;;  %v1727_v10 = vcombine.high %v3926_v53, %v1669_v32 }
 0x212   : > { %v1854_v37 = vpop.permute.xlu0 %1853  ;;  %v1711_v20 = vcombine.high %v3909_v31, %v1667_v28  ;;  %v4081_v28 = vrot.slane %v1695_v62, %v3464_v12 }
 0x213   : > { %v4035_v19 = vrot.slane %v1726_v13, %v3464_v12  ;;  %v1873_v21 = vcombine.low %v3934_v60, %v1854_v37  ;;  %v4042_v44 = vrot.slane %v1742_v16, %v3467_v38  ;;  %v1874_v13 = vcombine.high %v3934_v60, %v1854_v37 }
 0x214   : > { %v1856_v52 = vpop.permute.xlu1 %1855 }
 0x215   : > { %v1889_v50 = vcombine.low %v3952_v5, %v1856_v52  ;;  %v1774_v41 = vcombine.low %v4032_v61, %v4035_v19  ;;  %v1890_v36 = vcombine.high %v3952_v5, %v1856_v52  ;;  %v1881_v57 = vrot.slane %v1873_v21, %v3464_v12 }
 0x216   : > { %v1862_v35 = vpop.permute.xlu0 %1861 }
 0x217   : > { %v4045_v56 = vrot.slane %v1774_v41, %v3467_v38  ;;  %v1897_v42 = vrot.slane %v1889_v50, %v3464_v12  ;;  %v1905_v2 = vcombine.low %v3959_v51, %v1862_v35  ;;  %v1906_v39 = vcombine.high %v3959_v51, %v1862_v35 }
 0x218   : > { %v1864_v47 = vpop.permute.xlu1 %1863  ;;  %v1679_v50 = vcombine.high %v3894_v26, %v1659_v58  ;;  %v4066_v51 = vrot.slane %v1727_v10, %v3464_v12  ;;  %v4069_v35 = vrot.slane %v1890_v36, %v3464_v12  ;;  %v4084_v26 = vrot.slane %v1711_v20, %v3464_v12 }
 0x219   : > { %4439 = vst [vmem:[#allocation5_spill] sm:$0xff] %v4045_v56  ;;  %v1921_v33 = vcombine.low %v3966_v46, %v1864_v47  ;;  %v1937_v53 = vcombine.low %v1881_v57, %v1897_v42  ;;  %v1913_v5 = vrot.slane %v1905_v2, %v3464_v12  ;;  %v1922_v32 = vcombine.high %v3966_v46, %v1864_v47 }
 0x21a   : > { %v4051_v14 = vpop.permute.xlu0 %2252  ;;  %v4074_v31 = vrot.slane %v1906_v39, %v3464_v12  ;;  %v4087_v58 = vrot.slane %v1874_v13, %v3464_v12  ;;  %v4100_v10 = vrot.slane %v1679_v50, %v3464_v12  ;;  %v1743_v36 = vcombine.high %v1686_v7, %v4025_v40 }
 0x21b   : > { %v1929_v16 = vrot.slane %v1921_v33, %v3464_v12  ;;  %v4077_v60 = vrot.slane %v1922_v32, %v3464_v12  ;;  %v4090_v37 = vrot.slane %v1937_v53, %v3467_v38  ;;  %v2272_v2 = vcombine.low %v3969_v23, %v4051_v14 }
 0x21c   : > { %v2255_v52 = vpop.permute.xlu1 %2254  ;;  %v1790_v39 = vcombine.low %v4084_v26, %v4066_v51  ;;  %v1953_v33 = vcombine.low %v4087_v58, %v4069_v35  ;;  %v1758_v53 = vcombine.low %v4100_v10, %v4081_v28  ;;  %v1775_v40 = vcombine.high %v4032_v61, %v4035_v19 }
 0x21d   : > { %v1969_v46 = vcombine.low %v1913_v5, %v1929_v16  ;;  %v2288_v54 = vcombine.low %v3981_v48, %v2255_v52  ;;  %v1985_v21 = vcombine.low %v4074_v31, %v4077_v60  ;;  %v1938_v32 = vcombine.high %v1881_v57, %v1897_v42 }
 0x21e   : > { %v4071_v59 = vpop.permute.xlu0 %2260  ;;  %v4126_v62 = vrot.slane %v1743_v36, %v3467_v38  ;;  %v4129_v43 = vrot.slane %v1790_v39, %v3467_v38  ;;  %v4132_v61 = vrot.slane %v1953_v33, %v3467_v38  ;;  %v1970_v19 = vcombine.high %v1913_v5, %v1929_v16 }
 0x21f   : > { %v4093_v41 = vrot.slane %v1969_v46, %v3467_v38  ;;  %v2296_v20 = vrot.slane %v2288_v54, %v3464_v12  ;;  %v2304_v13 = vcombine.low %v3984_v29, %v4071_v59  ;;  %v4119_v50 = vrot.slane %v1985_v21, %v3467_v38 }
 0x220   : > { %v2263_v47 = vpop.permute.xlu1 %2262  ;;  %v2280_v46 = vrot.slane %v2272_v2, %v3464_v12  ;;  %v4137_v2 = vrot.slane %v1758_v53, %v3467_v38  ;;  %v1789_v30 = vrot.slane %v1775_v40, %v3467_v38  ;;  %v1791_v36 = vcombine.high %v4084_v26, %v4066_v51 }
 0x221   : > { %v2320_v8 = vcombine.low %v3995_v9, %v2263_v47  ;;  %v2312_v57 = vrot.slane %v2304_v13, %v3464_v12  ;;  %v2289_v39 = vcombine.high %v3981_v48, %v2255_v52  ;;  %v1952_v55 = vrot.slane %v1938_v32, %v3467_v38 }
 0x222   : > { %v4116_v7 = vpop.permute.xlu0 %2447  ;;  %v2336_v42 = vcombine.low %v2280_v46, %v2296_v20  ;;  %v2005_v5 = vcombine.low %v4132_v61, %v4119_v50  ;;  %v2002_v16 = vcombine.high %v4090_v37, %v4093_v41  ;;  %v2321_v13 = vcombine.high %v3995_v9, %v2263_v47 }
 0x223   : > { %v2328_v21 = vrot.slane %v2320_v8, %v3464_v12  ;;  %v2273_v8 = vcombine.high %v3969_v23, %v4051_v14  ;;  %v1810_v53 = vcombine.low %v4137_v2, %v4129_v43  ;;  %v1807_v48 = vcombine.high %v4042_v44, %v4045_v56 }
 0x224   : > { %v4123_v54 = vpop.permute.xlu1 %2449  ;;  %v1984_v51 = vrot.slane %v1970_v19, %v3467_v38  ;;  %v4159_v26 = vrot.slane %v2336_v42, %v3467_v38  ;;  %v4167_v9 = vrot.slane %v2289_v39, %v3464_v12  ;;  %v2337_v14 = vcombine.high %v2280_v46, %v2296_v20 }
 0x225   : > { %v2368_v33 = vcombine.low %v2312_v57, %v2328_v21  ;;  %v2369_v40 = vcombine.high %v2312_v57, %v2328_v21  ;;  %v2305_v47 = vcombine.high %v3984_v29, %v4071_v59  ;;  %v2483_v56 = vcombine.low %v4007_v17, %v4123_v54 }
 0x226   : > { %v4155_v52 = vpop.permute.xlu0 %2455  ;;  %v3042_v42 = vpack.i.bf16 %v2005_v5, %v1810_v53  ;;  %v3027_v57 = vpack.i.bf16 %v2002_v16, %v1807_v48  ;;  %v2335_v39 = vrot.slane %v2321_v13, %v3464_v12  ;;  %v2467_v20 = vcombine.low %v3998_v22, %v4116_v7 }
 0x227   : > { %v4162_v32 = vrot.slane %v2368_v33, %v3467_v38  ;;  %v2499_v21 = vcombine.low %v4010_v18, %v4155_v52  ;;  %v1986_v33 = vcombine.high %v4074_v31, %v4077_v60  ;;  %v2383_v59 = vrot.slane %v2369_v40, %v3467_v38 }
 0x228   : > { %v4164_v23 = vpop.permute.xlu1 %2457  ;;  %3043 = vrot.lane.b32.xlu1 %v3042_v42, %s3133_s11  ;;  %3028 = vrot.lane.b32.xlu0 %v3027_v57, %s3132_s10  ;;  %v1808_v46 = vcombine.low %v4126_v62, %v1789_v30  ;;  %v2003_v5 = vcombine.low %v1952_v55, %v1984_v51  ;;  %v2351_v16 = vrot.slane %v2337_v14, %v3467_v38 }
 0x229   : > { %v2400_v19 = vcombine.low %v4159_v26, %v4162_v32  ;;  %v2515_v29 = vcombine.low %v4016_v3, %v4164_v23  ;;  %v2319_v31 = vrot.slane %v2305_v47, %v3464_v12  ;;  %v4191_v60 = vrot.slane %v2483_v56, %v3464_v12 }
 0x22a   : > { %v4197_v53 = vrot.slane %v2499_v21, %v3464_v12  ;;  %v3032_v48 = vpack.i.bf16 %v2003_v5, %v1808_v46  ;;  %v2004_v40 = vcombine.high %v1952_v55, %v1984_v51  ;;  %v2401_v42 = vcombine.high %v4159_v26, %v4162_v32 }
 0x22b   : > { %v4194_v13 = vrot.slane %v2515_v29, %v3464_v12  ;;  %v1954_v57 = vcombine.high %v4087_v58, %v4069_v35  ;;  %v2287_v14 = vrot.slane %v2273_v8, %v3464_v12  ;;  %v2384_v47 = vcombine.low %v2319_v31, %v2335_v39 }
 0x22c   : > { %v2475_v56 = vrot.slane %v2467_v20, %v3464_v12  ;;  %3033 = vrot.lane.b32.xlu0 %v3032_v48, %s3131_s9  ;;  %v1809_v21 = vcombine.high %v4126_v62, %v1789_v30  ;;  %v4440_v55 = vcombine.high %v3778_v63, %v3781_v6  ;;  %v2402_v46 = vcombine.low %v2351_v16, %v2383_v59 }
 0x22d   : > { %v2563_v29 = vcombine.low %v4197_v53, %v4194_v13  ;;  %v1759_v35 = vcombine.high %v4100_v10, %v4081_v28  ;;  %v2352_v58 = vcombine.low %v2287_v14, %v4167_v9  ;;  %v2000_v8 = vrot.slane %v1986_v33, %v3467_v38 }
 0x22e   : > { %v3052_v51 = vpack.i.bf16 %v2401_v42, %v4440_v55  ;;  %v2531_v20 = vcombine.low %v2475_v56, %v4191_v60  ;;  %v3037_v5 = vpack.i.bf16 %v2004_v40, %v1809_v21  ;;  %v2006_v30 = vcombine.high %v4132_v61, %v4119_v50 }
 0x22f   : > { %v1805_v62 = vrot.slane %v1791_v36, %v3467_v38  ;;  %v1968_v48 = vrot.slane %v1954_v57, %v3467_v38  ;;  %v2385_v42 = vcombine.high %v2319_v31, %v2335_v39  ;;  %v2392_v55 = vrot.slane %v2384_v47, %v3467_v38 }
 0x230   : > { %3053 = vrot.lane.b32.xlu1 %v3052_v51, %s3132_s10  ;;  %v4224_v28 = vrot.slane %v2563_v29, %v3467_v38  ;;  %3038 = vrot.lane.b32.xlu0 %v3037_v5, %s3134_s12  ;;  %v1811_v10 = vcombine.high %v4137_v2, %v4129_v43  ;;  %v4441_v33 = vcombine.low %v3784_v15, %v3787_v11 }
 0x231   : > { %v2403_v50 = vcombine.high %v2351_v16, %v2383_v59  ;;  %v1773_v61 = vrot.slane %v1759_v35, %v3467_v38  ;;  %v2353_v36 = vcombine.high %v2287_v14, %v4167_v9  ;;  %v2360_v39 = vrot.slane %v2352_v58, %v3467_v38 }
 0x232   : > { %v3062_v40 = vpack.i.bf16 %v2402_v46, %v4441_v33  ;;  %v4236_v31 = vrot.slane %v2531_v20, %v3467_v38  ;;  %v3047_v57 = vpack.i.bf16 %v2006_v30, %v1811_v10  ;;  %v2007_v47 = vcombine.low %v1968_v48, %v2000_v8  ;;  %v4444_v30 = vld [vmem:[#allocation2_spill] sm:$0xff] }
 0x233   : > { %v2399_v43 = vrot.slane %v2385_v42, %v3467_v38  ;;  %v2516_v2 = vcombine.high %v4016_v3, %v4164_v23  ;;  %v1812_v59 = vcombine.low %v1773_v61, %v1805_v62  ;;  %v4442_v9 = vcombine.high %v3784_v15, %v3787_v11 }
 0x234   : > { %3063 = vrot.lane.b32.xlu1 %v3062_v40, %s3131_s9  ;;  %3048 = vrot.lane.b32.xlu0 %v3047_v57, %s3135_s13  ;;  %v2405_v14 = vcombine.high %v2360_v39, %v2392_v55  ;;  %v2595_v29 = vcombine.low %v4236_v31, %v4224_v28  ;;  %v2484_v21 = vcombine.high %v4007_v17, %v4123_v54 }
 0x235   : > { %v3072_v16 = vpack.i.bf16 %v2403_v50, %v4442_v9  ;;  %v2367_v51 = vrot.slane %v2353_v36, %v3467_v38  ;;  %v2500_v46 = vcombine.high %v4010_v18, %v4155_v52  ;;  %v3057_v3 = vpack.i.bf16 %v2007_v47, %v1812_v59 }
 0x236   : > { %v2008_v23 = vcombine.high %v1968_v48, %v2000_v8  ;;  %v2468_v15 = vcombine.high %v3998_v22, %v4116_v7  ;;  %v2530_v11 = vrot.slane %v2516_v2, %v3464_v12  ;;  %v2564_v35 = vcombine.high %v4197_v53, %v4194_v13 }
 0x237   : > { %v1813_v17 = vcombine.high %v1773_v61, %v1805_v62  ;;  %v4443_v54 = vcombine.high %v3790_v34, %v3799_v4  ;;  %v2407_v18 = vcombine.high %v2367_v51, %v2399_v43  ;;  %v2498_v52 = vrot.slane %v2484_v21, %v3464_v12 }
 0x238   : > { %3073 = vrot.lane.b32.xlu1 %v3072_v16, %s3134_s12  ;;  %3058 = vrot.lane.b32.xlu0 %v3057_v3, %s3137_s14  ;;  %v2532_v8 = vcombine.high %v2475_v56, %v4191_v60  ;;  %v2514_v20 = vrot.slane %v2500_v46, %v3464_v12  ;;  %v2404_v7 = vcombine.low %v2360_v39, %v2392_v55 }
 0x239   : > { %v3082_v58 = vpack.i.bf16 %v2405_v14, %v4443_v54  ;;  %v3067_v22 = vpack.i.bf16 %v2008_v23, %v1813_v17  ;;  %v2482_v13 = vrot.slane %v2468_v15, %v3464_v12  ;;  %v2578_v53 = vrot.slane %v2564_v35, %v3467_v38  ;;  %v4448_v35 = vld [vmem:[#allocation3_spill] sm:$0xff] }
 0x23a   : > { %v2579_v5 = vcombine.low %v2514_v20, %v2530_v11  ;;  %v4445_v62 = vcombine.high %v3802_v27, %v4444_v30  ;;  %v2546_v42 = vrot.slane %v2532_v8, %v3467_v38  ;;  %v4446_v56 = vcombine.low %v3790_v34, %v3799_v4 }
 0x23b   : > { %v2547_v60 = vcombine.low %v2482_v13, %v2498_v52  ;;  %v2406_v55 = vcombine.low %v2367_v51, %v2399_v43  ;;  %v2580_v12 = vcombine.high %v2514_v20, %v2530_v11  ;;  %v2548_v50 = vcombine.high %v2482_v13, %v2498_v52 }
 0x23c   : > { %3083 = vrot.lane.b32.xlu1 %v3082_v58, %s3135_s13  ;;  %3068 = vrot.lane.b32.xlu0 %v3067_v22, %s3138_s15  ;;  %v3092_v48 = vpack.i.bf16 %v2407_v18, %v4445_v62  ;;  %v3077_v10 = vpack.i.bf16 %v2404_v7, %v4446_v56  ;;  %v2587_v33 = vrot.slane %v2579_v5, %v3467_v38 }
 0x23d   : > { %v2597_v40 = vcombine.low %v2546_v42, %v2578_v53  ;;  %v2555_v61 = vrot.slane %v2547_v60, %v3467_v38  ;;  %v4447_v36 = vcombine.low %v3802_v27, %v4444_v30  ;;  %v2594_v34 = vrot.slane %v2580_v12, %v3467_v38 }
 0x23e   : > { %v2562_v57 = vrot.slane %v2548_v50, %v3467_v38  ;;  %v2596_v47 = vcombine.high %v4236_v31, %v4224_v28  ;;  %v3140_v27 = vmov 0.0   ;;  %v2598_v2 = vcombine.high %v2546_v42, %v2578_v53 }
 0x23f   : > { %v3087_v39 = vpack.i.bf16 %v2406_v55, %v4447_v36  ;;  %v2599_v4 = vcombine.low %v2555_v61, %v2587_v33  ;;  %2898 = vmatprep.mubr.msk.f32.mxu0 %vm3139_vm5, %v3140_v27  ;;  %v2600_v59 = vcombine.high %v2555_v61, %v2587_v33  ;;  %v4449_v17 = vcombine.low %v3886_v45, %v4448_v35 }
 0x240   : > { %3093 = vrot.lane.b32.xlu1 %v3092_v48, %s3138_s15  ;;  %3078 = vrot.lane.b32.xlu0 %v3077_v10, %s3133_s11  ;;  %v2601_v43 = vcombine.low %v2562_v57, %v2594_v34  ;;  %v2602_v38 = vcombine.high %v2562_v57, %v2594_v34  ;;  %v4450_v58 = vcombine.low %v3539_v25, %v3550_v0 }
 0x244   : > { %2608 = vrot.lane.b32.xlu1 %v2597_v40, %s3131_s9  ;;  %3088 = vrot.lane.b32.xlu0 %v3087_v39, %s3137_s14 }
 0x248   : > { %2616 = vrot.lane.b32.xlu1 %v2599_v4, %s3133_s11  ;;  %2604 = vrot.lane.b32.xlu0 %v2596_v47, %s3132_s10 }
 0x24c   : > { %2624 = vrot.lane.b32.xlu1 %v2601_v43, %s3137_s14  ;;  %2612 = vrot.lane.b32.xlu0 %v2598_v2, %s3134_s12 }
 0x250   : > { %2620 = vrot.lane.b32.xlu0 %v2600_v59, %s3135_s13 }
 0x254   : > { %2628 = vrot.lane.b32.xlu0 %v2602_v38, %s3138_s15 }
 0x25f   : > { %v2964_v9 = vpop.permute.xlu1 %2963 }
 0x260   : > { %v2959_v16 = vpop.permute.xlu0 %2958  ;;  %v2966_v23 = vunpack.i.h.bf16 %v2964_v9  ;;  %v2965_v15 = vunpack.i.l.bf16 %v2964_v9 }
 0x261   : > { %v2961_v51 = vunpack.i.h.bf16 %v2959_v16  ;;  %v2960_v46 = vunpack.i.l.bf16 %v2959_v16 }
 0x263   : > { %v1240_v54 = vsel %vm1030_vm6, %v4449_v17, %v2961_v51  ;;  %v1031_v18 = vsel %vm1030_vm6, %v4450_v58, %v2960_v46  ;;  %v4452_v46 = vld [vmem:[#allocation4_spill] sm:$0xff]  ;;  %v4454_v17 = vmov 0.0|0.0  }
 0x264   : > { %v2974_v14 = vpop.permute.xlu1 %2973  ;;  %v2969_v21 = vpop.permute.xlu0 %2968  ;;  %v1033_v13 = vsel %vm1032_vm7, %v1031_v18, %v2965_v15  ;;  %v1241_v53 = vsel %vm1032_vm7, %v1240_v54, %v2966_v23 }
 0x265   : > { %v2971_v52 = vunpack.i.h.bf16 %v2969_v21  ;;  %v2970_v8 = vunpack.i.l.bf16 %v2969_v21  ;;  %v2976_v22 = vunpack.i.h.bf16 %v2974_v14  ;;  %v2975_v7 = vunpack.i.l.bf16 %v2974_v14 }
 0x266   : > { %v4451_v21 = vcombine.low %v3738_v24, %v3741_v49 }
 0x267   : > { %v1035_v45 = vsel %vm1034_vm8, %v1033_v13, %v2970_v8  ;;  %v1242_v30 = vsel %vm1034_vm8, %v1241_v53, %v2971_v52 }
 0x268   : > { %v2984_v3 = vpop.permute.xlu1 %2983  ;;  %v2979_v11 = vpop.permute.xlu0 %2978  ;;  %v1037_v60 = vsel %vm1036_vm9, %v1035_v45, %v2975_v7  ;;  %v1243_v56 = vsel %vm1036_vm9, %v1242_v30, %v2976_v22 }
 0x269   : > { %v2981_v62 = vunpack.i.h.bf16 %v2979_v11  ;;  %v2980_v25 = vunpack.i.l.bf16 %v2979_v11  ;;  %v2986_v50 = vunpack.i.h.bf16 %v2984_v3  ;;  %v2985_v61 = vunpack.i.l.bf16 %v2984_v3 }
 0x26a   : > { %v4453_v3 = vcombine.low %v3919_v1, %v4452_v46 }
 0x26b   : > { %v1039_v55 = vsel %vm1038_vm10, %v1037_v60, %v2980_v25  ;;  %v1244_v12 = vsel %vm1038_vm10, %v1243_v56, %v2981_v62  ;;  %v1647_v51 = vsel %vm1030_vm6, %v4451_v21, %v2986_v50 }
 0x26c   : > { %v2994_v20 = vpop.permute.xlu1 %2993  ;;  %v2989_v5 = vpop.permute.xlu0 %2988  ;;  %v1435_v23 = vsel %vm1030_vm6, %v4453_v3, %v2985_v61 }
 0x26d   : > { %v2991_v0 = vunpack.i.h.bf16 %v2989_v5  ;;  %v2990_v48 = vunpack.i.l.bf16 %v2989_v5  ;;  %v2996_v34 = vunpack.i.h.bf16 %v2994_v20  ;;  %v2995_v4 = vunpack.i.l.bf16 %v2994_v20 }
 0x26f   : > { %v1041_v36 = vsel %vm1040_vm11, %v1039_v55, %v2990_v48  ;;  %v1245_v39 = vsel %vm1040_vm11, %v1244_v12, %v2991_v0  ;;  %v1436_v15 = vsel %vm1032_vm7, %v1435_v23, %v2995_v4  ;;  %v1648_v11 = vsel %vm1032_vm7, %v1647_v51, %v2996_v34 }
 0x270   : > { %v3004_v42 = vpop.permute.xlu1 %3003  ;;  %v2999_v10 = vpop.permute.xlu0 %2998  ;;  %v4455_v34 = vcombine.low %v4090_v37, %v4093_v41 }
 0x271   : > { %v3001_v33 = vunpack.i.h.bf16 %v2999_v10  ;;  %v3000_v40 = vunpack.i.l.bf16 %v2999_v10  ;;  %v3006_v2 = vunpack.i.h.bf16 %v3004_v42  ;;  %v3005_v59 = vunpack.i.l.bf16 %v3004_v42 }
 0x273   : > { %v1043_v47 = vsel %vm1042_vm12, %v1041_v36, %v3000_v40  ;;  %v1246_v43 = vsel %vm1042_vm12, %v1245_v39, %v3001_v33  ;;  %v1437_v54 = vsel %vm1034_vm8, %v1436_v15, %v3005_v59  ;;  %v1649_v58 = vsel %vm1034_vm8, %v1648_v11, %v3006_v2 }
 0x274   : > { %v3014_v57 = vpop.permute.xlu1 %3013  ;;  %v3009_v38 = vpop.permute.xlu0 %3008  ;;  %v2902_v9 = vpack.c.bf16 %v1246_v43, %v1043_v47 }
 0x275   : > { %v3011_v16 = vunpack.i.h.bf16 %v3009_v38  ;;  %v3010_v14 = vunpack.i.l.bf16 %v3009_v38  ;;  %v3016_v24 = vunpack.i.h.bf16 %v3014_v57  ;;  %v3015_v49 = vunpack.i.l.bf16 %v3014_v57  ;;  %v4456_v57 = vld [vmem:[#allocation5_spill] sm:$0xff] }
 0x276   : > { %2903 = vmatpush3.bf16.msra.mxu0 %v2902_v9  ;;  %v4457_v47 = vcombine.low %v4042_v44, %v4456_v57 }
 0x277   : > { %2904 = vmatprep.subr.bf16.mxu0 %v4454_v17  ;;  %v1650_v18 = vsel %vm1036_vm9, %v1649_v58, %v3011_v16  ;;  %v1438_v1 = vsel %vm1036_vm9, %v1437_v54, %v3010_v14 }
 0x278   : > { %v3019_v35 = vpop.permute.xlu1 %3018  ;;  %v1439_v22 = vsel %vm1038_vm10, %v1438_v1, %v3015_v49  ;;  %v1651_v7 = vsel %vm1038_vm10, %v1650_v18, %v3016_v24 }
 0x279   : > { %v3021_v52 = vunpack.i.h.bf16 %v3019_v35  ;;  %v3020_v8 = vunpack.i.l.bf16 %v3019_v35 }
 0x27b   : > { %v1440_v5 = vsel %vm1040_vm11, %v1439_v22, %v3020_v8  ;;  %v1652_v45 = vsel %vm1040_vm11, %v1651_v7, %v3021_v52 }
 0x27c   : > { %v3024_v20 = vpop.permute.xlu1 %3023 }
 0x27d   : > { %v3026_v13 = vunpack.i.h.bf16 %v3024_v20  ;;  %v3025_v53 = vunpack.i.l.bf16 %v3024_v20 }
 0x27f   : > { %v1441_v30 = vsel %vm1042_vm12, %v1440_v5, %v3025_v53  ;;  %v1653_v62 = vsel %vm1042_vm12, %v1652_v45, %v3026_v13  ;;  %v4458_v53 = vcombine.low %v3778_v63, %v3781_v6 }
 0x280   : > { %v2905_v25 = vpack.c.bf16 %v1653_v62, %v1441_v30 }
 0x282   : > { %2906 = vmatpush3.bf16.msra.mxu0 %v2905_v25 }
 0x283   : > { %2907 = vmatprep.subr.bf16.mxu0 %v4454_v17 }
 0x29a   : > { %v3029_v0 = vpop.permute.xlu0 %3028  ;;  %v3044_v48 = vpop.permute.xlu1 %3043 }
 0x29b   : > { %v3031_v55 = vunpack.i.h.bf16 %v3029_v0  ;;  %v3030_v12 = vunpack.i.l.bf16 %v3029_v0  ;;  %v3046_v51 = vunpack.i.h.bf16 %v3044_v48  ;;  %v3045_v37 = vunpack.i.l.bf16 %v3044_v48 }
 0x29d   : > { %v2037_v4 = vsel %vm1030_vm6, %v4455_v34, %v3031_v55  ;;  %v1842_v43 = vsel %vm1030_vm6, %v4457_v47, %v3030_v12 }
 0x29e   : > { %v3034_v42 = vpop.permute.xlu0 %3033 }
 0x29f   : > { %v3036_v33 = vunpack.i.h.bf16 %v3034_v42  ;;  %v3035_v40 = vunpack.i.l.bf16 %v3034_v42 }
 0x2a1   : > { %v1843_v2 = vsel %vm1032_vm7, %v1842_v43, %v3035_v40  ;;  %v2038_v59 = vsel %vm1032_vm7, %v2037_v4, %v3036_v33 }
 0x2a2   : > { %v3054_v60 = vpop.permute.xlu1 %3053  ;;  %v3039_v56 = vpop.permute.xlu0 %3038 }
 0x2a3   : > { %v3041_v61 = vunpack.i.h.bf16 %v3039_v56  ;;  %v3040_v36 = vunpack.i.l.bf16 %v3039_v56  ;;  %v3056_v3 = vunpack.i.h.bf16 %v3054_v60  ;;  %v3055_v23 = vunpack.i.l.bf16 %v3054_v60 }
 0x2a5   : > { %v1844_v9 = vsel %vm1034_vm8, %v1843_v2, %v3040_v36  ;;  %v2039_v16 = vsel %vm1034_vm8, %v2038_v59, %v3041_v61  ;;  %v2241_v5 = vsel %vm1030_vm6, %v4458_v53, %v3055_v23  ;;  %v2436_v45 = vsel %vm1030_vm6, %v2400_v19, %v3056_v3 }
 0x2a6   : > { %v3064_v10 = vpop.permute.xlu1 %3063  ;;  %v3049_v50 = vpop.permute.xlu0 %3048  ;;  %v1845_v35 = vsel %vm1036_vm9, %v1844_v9, %v3045_v37  ;;  %v2040_v54 = vsel %vm1036_vm9, %v2039_v16, %v3046_v51 }
 0x2a7   : > { %v3051_v14 = vunpack.i.h.bf16 %v3049_v50  ;;  %v3050_v21 = vunpack.i.l.bf16 %v3049_v50  ;;  %v3066_v15 = vunpack.i.h.bf16 %v3064_v10  ;;  %v3065_v11 = vunpack.i.l.bf16 %v3064_v10 }
 0x2a9   : > { %v1846_v24 = vsel %vm1038_vm10, %v1845_v35, %v3050_v21  ;;  %v2041_v49 = vsel %vm1038_vm10, %v2040_v54, %v3051_v14  ;;  %v2242_v25 = vsel %vm1032_vm7, %v2241_v5, %v3065_v11  ;;  %v2437_v0 = vsel %vm1032_vm7, %v2436_v45, %v3066_v15 }
 0x2aa   : > { %v3074_v39 = vpop.permute.xlu1 %3073  ;;  %v3059_v38 = vpop.permute.xlu0 %3058 }
 0x2ab   : > { %v3061_v41 = vunpack.i.h.bf16 %v3059_v38  ;;  %v3060_v46 = vunpack.i.l.bf16 %v3059_v38  ;;  %v3076_v52 = vunpack.i.h.bf16 %v3074_v39  ;;  %v3075_v8 = vunpack.i.l.bf16 %v3074_v39 }
 0x2ad   : > { %v1847_v20 = vsel %vm1040_vm11, %v1846_v24, %v3060_v46  ;;  %v2042_v22 = vsel %vm1040_vm11, %v2041_v49, %v3061_v41  ;;  %v2243_v56 = vsel %vm1034_vm8, %v2242_v25, %v3075_v8  ;;  %v2438_v63 = vsel %vm1034_vm8, %v2437_v0, %v3076_v52 }
 0x2ae   : > { %v3084_v44 = vpop.permute.xlu1 %3083  ;;  %v3069_v58 = vpop.permute.xlu0 %3068 }
 0x2af   : > { %v3071_v18 = vunpack.i.h.bf16 %v3069_v58  ;;  %v3070_v1 = vunpack.i.l.bf16 %v3069_v58  ;;  %v3086_v32 = vunpack.i.h.bf16 %v3084_v44  ;;  %v3085_v19 = vunpack.i.l.bf16 %v3084_v44 }
 0x2b1   : > { %v1848_v7 = vsel %vm1042_vm12, %v1847_v20, %v3070_v1  ;;  %v2043_v13 = vsel %vm1042_vm12, %v2042_v22, %v3071_v18 }
 0x2b2   : > { %v3079_v30 = vpop.permute.xlu0 %3078  ;;  %v2908_v62 = vpack.c.bf16 %v2043_v13, %v1848_v7  ;;  %v3094_v48 = vpop.permute.xlu1 %3093 }
 0x2b3   : > { %v3081_v42 = vunpack.i.h.bf16 %v3079_v30  ;;  %v3080_v60 = vunpack.i.l.bf16 %v3079_v30  ;;  %v3096_v33 = vunpack.i.h.bf16 %v3094_v48  ;;  %v3095_v40 = vunpack.i.l.bf16 %v3094_v48 }
 0x2b4   : > { %2909 = vmatpush3.bf16.msra.mxu0 %v2908_v62 }
 0x2b5   : > { %v2439_v6 = vsel %vm1036_vm9, %v2438_v63, %v3081_v42  ;;  %v2244_v26 = vsel %vm1036_vm9, %v2243_v56, %v3080_v60  ;;  %2910 = vmatprep.subr.bf16.mxu0 %v4454_v17 }
 0x2b6   : > { %v3089_v10 = vpop.permute.xlu0 %3088  ;;  %v2245_v50 = vsel %vm1038_vm10, %v2244_v26, %v3085_v19  ;;  %v2440_v61 = vsel %vm1038_vm10, %v2439_v6, %v3086_v32  ;;  %v2609_v36 = vpop.permute.xlu1 %2608 }
 0x2b7   : > { %v3091_v55 = vunpack.i.h.bf16 %v3089_v10  ;;  %v3090_v12 = vunpack.i.l.bf16 %v3089_v10 }
 0x2b9   : > { %v2246_v39 = vsel %vm1040_vm11, %v2245_v50, %v3090_v12  ;;  %v2441_v34 = vsel %vm1040_vm11, %v2440_v61, %v3091_v55 }
 0x2ba   : > { %v2605_v4 = vpop.permute.xlu0 %2604  ;;  %v2247_v57 = vsel %vm1042_vm12, %v2246_v39, %v3095_v40  ;;  %v2442_v17 = vsel %vm1042_vm12, %v2441_v34, %v3096_v33  ;;  %v2617_v38 = vpop.permute.xlu1 %2616 }
 0x2bb   : > { %v2631_v47 = vsel %vm1030_vm6, %v2595_v29, %v2605_v4  ;;  %v2911_v43 = vpack.c.bf16 %v2442_v17, %v2247_v57  ;;  %v2638_v29 = vld [vmem:[%s4414_s3] sm:$0xff] }
 0x2bc   : > { %v2632_v2 = vsel %vm1032_vm7, %v2631_v47, %v2609_v36 }
 0x2bd   : > { %2912 = vmatpush3.bf16.msra.mxu0 %v2911_v43 }
 0x2be   : > { %v2613_v59 = vpop.permute.xlu0 %2612  ;;  %2896 = vmatprep.subr.mxu0 %v3140_v27  ;;  %v2625_v51 = vpop.permute.xlu1 %2624 }
 0x2bf   : > { %v2633_v9 = vsel %vm1034_vm8, %v2632_v2, %v2613_v59 }
 0x2c0   : > { %v2634_v16 = vsel %vm1036_vm9, %v2633_v9, %v2617_v38 }
 0x2c2   : > { %v2621_v14 = vpop.permute.xlu0 %2620 }
 0x2c3   : > { %v2635_v21 = vsel %vm1038_vm10, %v2634_v16, %v2621_v14 }
 0x2c4   : > { %v2636_v31 = vsel %vm1040_vm11, %v2635_v21, %v2625_v51 }
 0x2c6   : > { %v2629_v28 = vpop.permute.xlu0 %2628 }
 0x2c7   : > { %v2637_v37 = vsel %vm1042_vm12, %v2636_v31, %v2629_v28 }
 0x2c8   : > { %2897 = vmatpush3.msra.mxu0 %v2637_v37 }
 0x2c9   : > { %2899 = vmatmul.mubr.msk.f32.vlgmr.msra.gmra.mrb[0].mxu0 %vm2639_vm13, %v2638_v29 }
 0x39c   : > { %v2709_v27 = vpop.f32.mrb[0].mxu0 }
 0x39d   : > { %2714 = vst.msk [vmem:[%s254_s25] sm:$0xff] %vm2713_vm14, %v2709_v27  ;;  %v2718_v41 = vmul.f32 %v2709_v27, %v2709_v27  ;;  %v2900_v46 = vpop.f32.mrb[1].mxu0  ;;  %v2715_v3 = vsel %vm2713_vm14, %v2709_v27, 0.0 }
 0x39e   : > { %2716 = vadd.xlane.f32.xlu1 %v2715_v3 }
 0x39f   : > { %v2719_v23 = vsel %vm2713_vm14, %v2718_v41, 0.0 }
 0x3a0   : > { %2720 = vadd.xlane.f32.xlu0 %v2719_v23 }
 0x42b   : > { %v2717_v44 = vpop.xlane.xlu1 %2716 }
 0x42d   : > { %v2721_v15 = vpop.xlane.xlu0 %2720 }
 0x42e   : > { %v2722_v11 = vsel %vm832_vm1, %v2717_v44, %v2721_v15 }
 0x42f   : > { %2724 = vst.msk [vmem:[%s261_s28] sm:$0xff] %vm2723_vm15, %v2722_v11 }
 0x430 PF: > { %s16_s20 = sadd.s32 1, %s3121_s20   ;;  %s4459_s18 = smov %s3117_s19 }
 0x431   : > { %p13_p5 = scmp.ge.s32.totalorder %s16_s20, 4   ;;  %s4460_s19 = smov %s4462_s21 }
 0x433   :  { %15 = sbr.rel (!%p13_p5) target bundleno = 2 (0x2), region = 81 }

</bundles_post_ra>
